<compile_context>
chip_gen: v6e
topology: v6e:2x2x1
jax: 0.10.0
libtpu: 0.0.40
codegen_flags: <defaults>
</compile_context>

<pallas_src>
import functools
import math

import jax
import jax.numpy as jnp
from jax.experimental import pallas as pl
from jax.experimental.pallas import tpu as pltpu


def _full_spec(shape):
    nd = len(shape)
    return pl.BlockSpec(tuple(shape), lambda i, _nd=nd: (0,) * _nd)


# -----------------------------------------------------------------------------
# Kernel 1: token embedding + positional encoding + fused qkv projection +
#           value half of out_proj + circular cross-correlation.
# -----------------------------------------------------------------------------
def _encoder_front_kernel(xpad_ref, convw_ref, cpe_ref, qkvw_ref, qkvb_ref,
                          wv_ref, wbias_ref, src_ref, vproj_ref, cor_ref,
                          *, nheads):
    B, C, Lp = xpad_ref.shape
    D, L = cpe_ref.shape
    K = Lp - L + 1                       # conv kernel size (circular pad K-1)
    kdim = qkvw_ref.shape[0] // 3        # kdim == vdim in this module
    H = nheads
    hd = kdim // H

    # --- TokenEmbedding: circular Conv1d(C, D, k=3) as ONE im2col matmul per
    #     batch; (conv bias + positional encoding) precomputed as `cpe`. ---
    src_parts = []
    for b in range(B):
        xp = xpad_ref[b]                                               # (C, L+K-1)
        slab = jnp.concatenate([xp[:, k:k + L] for k in range(K)], axis=0)  # (K*C, L)
        src_parts.append(
            jnp.dot(convw_ref[...], slab, preferred_element_type=jnp.float32)
            + cpe_ref[...])                                            # (D, L)
    srcT = jnp.concatenate(src_parts, axis=1)                          # (D, B*L), col = b*L+t
    src_ref[...] = srcT

    # --- fused q/k/v projection: one (3*kdim, D) @ (D, B*L) matmul ---
    qkvT = (jnp.dot(qkvw_ref[...], srcT, preferred_element_type=jnp.float32)
            + qkvb_ref[...])                                           # (3*kdim, B*L)
    qT = qkvT[0:kdim, :]
    kT = qkvT[kdim:2 * kdim, :]
    vT = qkvT[2 * kdim:3 * kdim, :]

    # --- value half of out_proj (independent of the lag top-k weighting):
    #     vproj = W_v^T @ v + per-batch weights_arr-half bias ---
    vproj_ref[...] = (jnp.dot(wv_ref[...], vT, preferred_element_type=jnp.float32)
                      + wbias_ref[...])                                # (D, B*L)

    # --- circular cross-correlation (== irfft(rfft(q) * conj(rfft(k)))):
    #     cor[bh, i, j, tau] = sum_t q[bh, i, t] * k[bh, j, (t - tau) % L]  ---
    q3 = jnp.stack([qT[h * hd:(h + 1) * hd, b * L:(b + 1) * L]
                    for b in range(B) for h in range(H)], axis=0)      # (B*H, hd, L)
    k3 = jnp.stack([kT[h * hd:(h + 1) * hd, b * L:(b + 1) * L]
                    for b in range(B) for h in range(H)], axis=0)      # (B*H, hd, L)
    # doubled-K slab: each lag becomes a single static lane slice (a roll),
    # so no per-iteration concatenation is materialized.
    k3d = jnp.concatenate([k3, k3], axis=2)                            # (B*H, hd, 2L)
    pieces = []
    for tau in range(L):
        kr = k3d[:, :, L - tau:2 * L - tau]     # kr[..., t] = k3[..., (t - tau) % L]
        c = jax.lax.dot_general(q3, kr, (((2,), (2,)), ((0,), (0,))),
                                preferred_element_type=jnp.float32)    # (B*H, hd, hd)
        pieces.append(c.reshape(B * H, hd * hd))
    # single lane-dense (B*H, L*hd*hd) = (16, 128) store
    cor_ref[...] = jnp.concatenate(pieces, axis=1)


def _call_front(xpad, convw, cpe, qkvw, qkvb, wv, wbias, *, heads):
    B, _, _ = xpad.shape
    D, L = cpe.shape
    kdim = qkvw.shape[0] // 3
    hd = kdim // heads
    Bh = B * heads
    return pl.pallas_call(
        functools.partial(_encoder_front_kernel, nheads=heads),
        grid=(1,),
        in_specs=[_full_spec(xpad.shape), _full_spec(convw.shape),
                  _full_spec(cpe.shape), _full_spec(qkvw.shape),
                  _full_spec(qkvb.shape), _full_spec(wv.shape),
                  _full_spec(wbias.shape)],
        out_specs=(_full_spec((D, B * L)), _full_spec((D, B * L)),
                   _full_spec((Bh, L * hd * hd))),
        out_shape=(jax.ShapeDtypeStruct((D, B * L), jnp.float32),
                   jax.ShapeDtypeStruct((D, B * L), jnp.float32),
                   jax.ShapeDtypeStruct((Bh, L * hd * hd), jnp.float32)),
    )(xpad, convw, cpe, qkvw, qkvb, wv, wbias)


# -----------------------------------------------------------------------------
# Kernel 2: residual + out_proj bias + LayerNorm1 + FFN + residual + LayerNorm2 +
#           final encoder LayerNorm + decoder Linear (all fused).
# -----------------------------------------------------------------------------
def _layernorm_cols(x, g, b):
    # LayerNorm over the feature (sublane) axis; tokens live on the lane axis.
    mu = jnp.mean(x, axis=0, keepdims=True)
    xc = x - mu
    var = jnp.mean(xc * xc, axis=0, keepdims=True)
    return xc * jax.lax.rsqrt(var + 1e-5) * g + b


def _encoder_back_kernel(src_ref, vproj_ref, coeff_ref, outb_ref,
                         n1g_ref, n1b_ref, f1w_ref, f1b_ref, f2w_ref, f2b_ref,
                         n2g_ref, n2b_ref, nfg_ref, nfb_ref, dw_ref, db_ref,
                         out_ref):
    coeff = coeff_ref[0]                                    # scalar from SMEM
    # src2 = out_proj(intervals_agg) = coeff * (v-half + weights_arr-half) + out_b
    x = src_ref[...] + coeff * vproj_ref[...] + outb_ref[...]
    x = _layernorm_cols(x, n1g_ref[...], n1b_ref[...])
    # FFN.  nn.LeakyReLU(True) -> negative_slope == 1.0 -> identity (no op);
    # dropout layers are identities in eval mode.
    h = jnp.dot(f1w_ref[...], x, preferred_element_type=jnp.float32) + f1b_ref[...]
    h = jnp.dot(f2w_ref[...], h, preferred_element_type=jnp.float32) + f2b_ref[...]
    x = x + h
    x = _layernorm_cols(x, n2g_ref[...], n2b_ref[...])
    x = _layernorm_cols(x, nfg_ref[...], nfb_ref[...])       # encoder final norm
    out_ref[...] = (jnp.dot(dw_ref[...], x, preferred_element_type=jnp.float32)
                    + db_ref[...])                            # decoder (C, B*L)


def _call_back(srcT, vprojT, coeff, outb, n1g, n1b, f1w, f1b, f2w, f2b,
               n2g, n2b, nfg, nfb, dw, db):
    D, N = srcT.shape
    Cc = dw.shape[0]
    args = (srcT, vprojT, coeff, outb, n1g, n1b, f1w, f1b, f2w, f2b,
            n2g, n2b, nfg, nfb, dw, db)
    in_specs = []
    for idx, a in enumerate(args):
        if idx == 2:   # scalar coefficient lives in SMEM
            in_specs.append(pl.BlockSpec(memory_space=pltpu.MemorySpace.SMEM))
        else:
            in_specs.append(_full_spec(a.shape))
    return pl.pallas_call(
        _encoder_back_kernel,
        grid=(1,),
        in_specs=in_specs,
        out_specs=_full_spec((Cc, N)),
        out_shape=jax.ShapeDtypeStruct((Cc, N), jnp.float32),
    )(*args)


# -----------------------------------------------------------------------------
# Parameters
# -----------------------------------------------------------------------------
def make_pe(d_model, max_len=64):
    pos = jnp.arange(max_len, dtype=jnp.float32)[:, None]
    div = jnp.exp(jnp.arange(0, d_model, 2, dtype=jnp.float32)
                  * (-math.log(10000.0) / d_model))
    pe = jnp.zeros((max_len, d_model), jnp.float32)
    pe = pe.at[:, 0::2].set(jnp.sin(pos * div))
    pe = pe.at[:, 1::2].set(jnp.cos(pos * div))
    return pe                                   # (max_len, d_model)


def init_params(key, c_in, d_model, heads, bsz, dim_ff=16, max_len=64):
    kdim = vdim = c_in * heads
    hd = kdim // heads                          # == c_in
    ks = jax.random.split(key, 10)

    def nrm(k, shape, s=0.1):
        return (s * jax.random.normal(k, shape)).astype(jnp.float32)

    return dict(
        # TokenEmbedding Conv1d(c_in, d_model, k=3, circular pad=1); stored (K, D, C)
        tok_w=nrm(ks[0], (3, d_model, c_in)),
        tok_b=jnp.zeros((d_model,), jnp.float32),
        pe=make_pe(d_model, max_len),
        # Cross_Correlation projections (stored as (in, out))
        q_w=nrm(ks[1], (d_model, kdim)), q_b=jnp.zeros((kdim,), jnp.float32),
        k_w=nrm(ks[2], (d_model, kdim)), k_b=jnp.zeros((kdim,), jnp.float32),
        v_w=nrm(ks[3], (d_model, vdim)), v_b=jnp.zeros((vdim,), jnp.float32),
        out_w=nrm(ks[4], (2 * vdim, d_model)),
        out_b=jnp.zeros((d_model,), jnp.float32),
        # In PyTorch this is a *fresh random* nn.Embedding(head_dim, heads*bsz)
        # created inside forward(); here it is a fixed deterministic parameter.
        weights_arr=nrm(ks[5], (hd, heads * bsz), s=1.0),
        # Feed-forward
        l1_w=nrm(ks[6], (d_model, dim_ff)), l1_b=jnp.zeros((dim_ff,), jnp.float32),
        l2_w=nrm(ks[7], (dim_ff, d_model)), l2_b=jnp.zeros((d_model,), jnp.float32),
        # LayerNorms (norm1, norm2, encoder final norm)
        n1_g=jnp.ones((d_model,), jnp.float32), n1_b=jnp.zeros((d_model,), jnp.float32),
        n2_g=jnp.ones((d_model,), jnp.float32), n2_b=jnp.zeros((d_model,), jnp.float32),
        nf_g=jnp.ones((d_model,), jnp.float32), nf_b=jnp.zeros((d_model,), jnp.float32),
        # decoder Linear(d_model, c_in)
        dec_w=nrm(ks[8], (d_model, c_in)), dec_b=jnp.zeros((c_in,), jnp.float32),
    )


# -----------------------------------------------------------------------------
# Forward (fully jitted, no host sync)
# -----------------------------------------------------------------------------
@functools.partial(jax.jit, static_argnames=("heads",))
def trans_forward(params, x, *, heads):
    """x: (B, L, C_in) float32 -> (out (B, L, C_in), [dim_corr], [ji_mat])."""
    x = x.astype(jnp.float32)
    B, L, C = x.shape
    K, D, _ = params["tok_w"].shape
    kdim = params["q_w"].shape[1]
    vdim = params["v_w"].shape[1]
    H = heads
    hd = kdim // H
    Bh = B * H
    scale = float(hd) ** (-0.5)

    # ---- TokenEmbedding prep: circular pad, im2col conv weight, bias + PE ----
    xc = jnp.transpose(x, (0, 2, 1))                                    # (B, C, L)
    xpad = jnp.concatenate([xc[:, :, -1:], xc, xc[:, :, :1]], axis=-1)  # (B, C, L+2)
    convw = jnp.transpose(params["tok_w"], (1, 0, 2)).reshape(D, K * C)
    cpe = params["tok_b"][:, None] + params["pe"][:L].T                 # (D, L)

    # ---- fused q/k/v weights (transposed orientation) ----
    qkvw = jnp.concatenate([params["q_w"].T, params["k_w"].T, params["v_w"].T], axis=0)
    qkvb = jnp.concatenate([params["q_b"], params["k_b"], params["v_b"]])[:, None]

    # ---- out_proj split: v-half matmul weight + weights_arr-half per-batch bias ----
    ow = params["out_w"].reshape(H, 2 * hd, D)
    w_v = ow[:, :hd, :].reshape(vdim, D)          # rows h*hd + d (v part)
    w_w = ow[:, hd:, :].reshape(vdim, D)          # rows h*hd + d (weights_arr part)
    wa = params["weights_arr"]                    # (hd, H*B), column index = b*H + h
    wbias_bd = wa.T.reshape(B, H * hd) @ w_w      # (B, D)
    wbias = jnp.repeat(wbias_bd.T, L, axis=1)     # (D, B*L), column b*L + t

    # ---- kernel 1 ----
    srcT, vprojT, cor = _call_front(xpad, convw, cpe, qkvw, qkvb, w_v.T, wbias,
                                    heads=H)

    # ---- ji matrix / per-feature top-k weighting (tiny; stays in XLA) ----
    norms = jnp.sqrt(jnp.sum(wa * wa, axis=-1))
    cos_ji = (wa @ wa.T) / (norms[:, None] * norms[None, :])
    ji_mat = jax.nn.softmax(cos_ji, axis=-1)
    ji_num = round(math.sqrt(hd)) * round(math.log(hd))
    tkw, tki = jax.lax.top_k(cos_ji, ji_num)
    tkw = jax.nn.softmax(tkw, axis=-1)
    w2 = jnp.sum(tkw[:, :, None] * jax.nn.one_hot(tki, hd, dtype=jnp.float32), axis=1)

    # ---- top-k over lags (all traced, no device_get) ----
    cor4 = cor.reshape(Bh, L, hd, hd)                      # cor4[bh, tau, i, j]
    len_corr = jnp.einsum("btij,ij->bt", cor4, w2) / hd    # (Bh, L)
    mlc = jnp.mean(len_corr, axis=0)                       # (L,)
    top_k = int(math.log(L))
    weight, index = jax.lax.top_k(mlc, top_k)
    tmp_corr = jax.nn.softmax(weight, axis=-1)
    mapped = jnp.where(index >= L // 2, L - index, index)
    coeff = jnp.sum(jnp.where(mapped <= 1, tmp_corr, jnp.zeros_like(tmp_corr)))
    # TODO(synk): lags whose mapped kernel size is >= 2 route through a *freshly
    # randomly initialized* weight-normed TemporalBlock (data-dependent kernel
    # size, active dropout) in the PyTorch reference; that non-deterministic
    # branch is omitted, so those top-k contributions are dropped.
    coeff = coeff.reshape(1).astype(jnp.float32)

    # ---- dim_cor ----
    mcor = jnp.mean(cor4.reshape(B, H, L, hd, hd), axis=(0, 1))   # (L, hd, hd)
    sel = jnp.take(mcor, index, axis=0)                           # (top_k, hd, hd)
    dim_cor = jnp.sum(sel * tmp_corr[:, None, None], axis=0)
    dim_cor = jax.nn.softmax(scale * dim_cor, axis=-1)

    # ---- kernel 2 ----
    outT = _call_back(
        srcT, vprojT, coeff,
        params["out_b"][:, None],
        params["n1_g"][:, None], params["n1_b"][:, None],
        params["l1_w"].T, params["l1_b"][:, None],
        params["l2_w"].T, params["l2_b"][:, None],
        params["n2_g"][:, None], params["n2_b"][:, None],
        params["nf_g"][:, None], params["nf_b"][:, None],
        params["dec_w"].T, params["dec_b"][:, None],
    )                                                             # (C, B*L)
    out = outT.T.reshape(B, L, C)
    return out, [dim_cor], [ji_mat]


if __name__ == "__main__":
    B, L, C = 2, 8, 4           # batch, seq, num_inputs
    feature_size, heads = 32, 8

    key = jax.random.PRNGKey(0)
    k_param, k_x = jax.random.split(key)
    params = init_params(k_param, C, feature_size, heads, B)
    x = jax.random.normal(k_x, (B, L, C), dtype=jnp.float32)

    out, dim_corrs, ji_mats = trans_forward(params, x, heads=heads)
    jax.block_until_ready(out)
    jax.block_until_ready(dim_corrs[0])
    jax.block_until_ready(ji_mats[0])

    assert out.shape == (B, L, C)
    assert dim_corrs[0].shape == (C, C)          # head_dim == c_in
    assert ji_mats[0].shape == (C, C)
    print("KERNEL_OK")
</pallas_src>

<mosaic_0001>
module attributes {stable_mosaic.version = 11 : i64} {
  func.func @_encoder_front_kernel(%arg0: i32, %arg1: memref<2x4x10xf32, #tpu.memory_space<vmem>>, %arg2: memref<32x12xf32, #tpu.memory_space<vmem>>, %arg3: memref<32x8xf32, #tpu.memory_space<vmem>>, %arg4: memref<96x32xf32, #tpu.memory_space<vmem>>, %arg5: memref<96x1xf32, #tpu.memory_space<vmem>>, %arg6: memref<32x32xf32, #tpu.memory_space<vmem>>, %arg7: memref<32x16xf32, #tpu.memory_space<vmem>>, %arg8: memref<32x16xf32, #tpu.memory_space<vmem>>, %arg9: memref<32x16xf32, #tpu.memory_space<vmem>>, %arg10: memref<16x128xf32, #tpu.memory_space<vmem>>) attributes {dimension_semantics = [#tpu.dimension_semantics<arbitrary>], iteration_bounds = array<i64: 1>, scalar_prefetch = 0 : i64, scratch_operands = 0 : i64, tpu.core_type = #tpu.core_type<tc>, window_params = [{pipeline_mode = #tpu.pipeline_mode<synchronous>, transform_indices = @transform_0, window_bounds = array<i64: 2, 4, 10>}, {pipeline_mode = #tpu.pipeline_mode<synchronous>, transform_indices = @transform_1, window_bounds = array<i64: 32, 12>}, {pipeline_mode = #tpu.pipeline_mode<synchronous>, transform_indices = @transform_2, window_bounds = array<i64: 32, 8>}, {pipeline_mode = #tpu.pipeline_mode<synchronous>, transform_indices = @transform_3, window_bounds = array<i64: 96, 32>}, {pipeline_mode = #tpu.pipeline_mode<synchronous>, transform_indices = @transform_4, window_bounds = array<i64: 96, 1>}, {pipeline_mode = #tpu.pipeline_mode<synchronous>, transform_indices = @transform_5, window_bounds = array<i64: 32, 32>}, {pipeline_mode = #tpu.pipeline_mode<synchronous>, transform_indices = @transform_6, window_bounds = array<i64: 32, 16>}, {pipeline_mode = #tpu.pipeline_mode<synchronous>, transform_indices = @transform_7, window_bounds = array<i64: 32, 16>}, {pipeline_mode = #tpu.pipeline_mode<synchronous>, transform_indices = @transform_8, window_bounds = array<i64: 32, 16>}, {pipeline_mode = #tpu.pipeline_mode<synchronous>, transform_indices = @transform_9, window_bounds = array<i64: 16, 128>}]} {
    %c0 = arith.constant 0 : index
    %c0_0 = arith.constant 0 : index
    %c0_1 = arith.constant 0 : index
    %0 = vector.load %arg1[%c0, %c0_0, %c0_1] : memref<2x4x10xf32, #tpu.memory_space<vmem>>, vector<1x4x10xf32>
    %1 = vector.shape_cast %0 : vector<1x4x10xf32> to vector<4x10xf32>
    %2 = vector.extract_strided_slice %1 {offsets = [0, 0], sizes = [4, 8], strides = [1, 1]} : vector<4x10xf32> to vector<4x8xf32>
    %3 = vector.extract_strided_slice %1 {offsets = [0, 1], sizes = [4, 8], strides = [1, 1]} : vector<4x10xf32> to vector<4x8xf32>
    %4 = vector.extract_strided_slice %1 {offsets = [0, 2], sizes = [4, 8], strides = [1, 1]} : vector<4x10xf32> to vector<4x8xf32>
    %5 = tpu.concatenate %2, %3, %4 in 0 : vector<4x8xf32>, vector<4x8xf32>, vector<4x8xf32> -> vector<12x8xf32>
    %c0_2 = arith.constant 0 : index
    %c0_3 = arith.constant 0 : index
    %6 = vector.load %arg2[%c0_2, %c0_3] : memref<32x12xf32, #tpu.memory_space<vmem>>, vector<32x12xf32>
    %cst = arith.constant dense<0.000000e+00> : vector<32x8xf32>
    %7 = tpu.matmul %6, %5, %cst {dimension_numbers = #tpu.dot_dimension_numbers<[1], [0], [0], [1], [0, 0, 1, 1], [], []>} : vector<32x12xf32>, vector<12x8xf32>, vector<32x8xf32> -> vector<32x8xf32>
    %c0_4 = arith.constant 0 : index
    %c0_5 = arith.constant 0 : index
    %8 = vector.load %arg3[%c0_4, %c0_5] : memref<32x8xf32, #tpu.memory_space<vmem>>, vector<32x8xf32>
    %9 = arith.addf %7, %8 : vector<32x8xf32>
    %c1 = arith.constant 1 : index
    %c0_6 = arith.constant 0 : index
    %c0_7 = arith.constant 0 : index
    %10 = vector.load %arg1[%c1, %c0_6, %c0_7] : memref<2x4x10xf32, #tpu.memory_space<vmem>>, vector<1x4x10xf32>
    %11 = vector.shape_cast %10 : vector<1x4x10xf32> to vector<4x10xf32>
    %12 = vector.extract_strided_slice %11 {offsets = [0, 0], sizes = [4, 8], strides = [1, 1]} : vector<4x10xf32> to vector<4x8xf32>
    %13 = vector.extract_strided_slice %11 {offsets = [0, 1], sizes = [4, 8], strides = [1, 1]} : vector<4x10xf32> to vector<4x8xf32>
    %14 = vector.extract_strided_slice %11 {offsets = [0, 2], sizes = [4, 8], strides = [1, 1]} : vector<4x10xf32> to vector<4x8xf32>
    %15 = tpu.concatenate %12, %13, %14 in 0 : vector<4x8xf32>, vector<4x8xf32>, vector<4x8xf32> -> vector<12x8xf32>
    %c0_8 = arith.constant 0 : index
    %c0_9 = arith.constant 0 : index
    %16 = vector.load %arg2[%c0_8, %c0_9] : memref<32x12xf32, #tpu.memory_space<vmem>>, vector<32x12xf32>
    %cst_10 = arith.constant dense<0.000000e+00> : vector<32x8xf32>
    %17 = tpu.matmul %16, %15, %cst_10 {dimension_numbers = #tpu.dot_dimension_numbers<[1], [0], [0], [1], [0, 0, 1, 1], [], []>} : vector<32x12xf32>, vector<12x8xf32>, vector<32x8xf32> -> vector<32x8xf32>
    %c0_11 = arith.constant 0 : index
    %c0_12 = arith.constant 0 : index
    %18 = vector.load %arg3[%c0_11, %c0_12] : memref<32x8xf32, #tpu.memory_space<vmem>>, vector<32x8xf32>
    %19 = arith.addf %17, %18 : vector<32x8xf32>
    %20 = tpu.concatenate %9, %19 in 1 : vector<32x8xf32>, vector<32x8xf32> -> vector<32x16xf32>
    %c0_13 = arith.constant 0 : index
    %c0_14 = arith.constant 0 : index
    %21 = vector.load %arg8[%c0_13, %c0_14] : memref<32x16xf32, #tpu.memory_space<vmem>>, vector<32x16xf32>
    tpu.vector_store %arg8[%c0_13, %c0_14], %20 {strides = array<i32>} : memref<32x16xf32, #tpu.memory_space<vmem>>, vector<32x16xf32>,
    %c0_15 = arith.constant 0 : index
    %c0_16 = arith.constant 0 : index
    %22 = vector.load %arg4[%c0_15, %c0_16] : memref<96x32xf32, #tpu.memory_space<vmem>>, vector<96x32xf32>
    %cst_17 = arith.constant dense<0.000000e+00> : vector<96x16xf32>
    %23 = tpu.matmul %22, %20, %cst_17 {dimension_numbers = #tpu.dot_dimension_numbers<[1], [0], [0], [1], [0, 0, 1, 1], [], []>} : vector<96x32xf32>, vector<32x16xf32>, vector<96x16xf32> -> vector<96x16xf32>
    %c0_18 = arith.constant 0 : index
    %c0_19 = arith.constant 0 : index
    %24 = vector.load %arg5[%c0_18, %c0_19] : memref<96x1xf32, #tpu.memory_space<vmem>>, vector<96x1xf32>
    %25 = vector.broadcast %24 : vector<96x1xf32> to vector<96x16xf32>
    %26 = arith.addf %23, %25 : vector<96x16xf32>
    %27 = vector.extract_strided_slice %26 {offsets = [0, 0], sizes = [32, 16], strides = [1, 1]} : vector<96x16xf32> to vector<32x16xf32>
    %28 = vector.extract_strided_slice %26 {offsets = [32, 0], sizes = [32, 16], strides = [1, 1]} : vector<96x16xf32> to vector<32x16xf32>
    %29 = vector.extract_strided_slice %26 {offsets = [64, 0], sizes = [32, 16], strides = [1, 1]} : vector<96x16xf32> to vector<32x16xf32>
    %c0_20 = arith.constant 0 : index
    %c0_21 = arith.constant 0 : index
    %30 = vector.load %arg6[%c0_20, %c0_21] : memref<32x32xf32, #tpu.memory_space<vmem>>, vector<32x32xf32>
    %cst_22 = arith.constant dense<0.000000e+00> : vector<32x16xf32>
    %31 = tpu.matmul %30, %29, %cst_22 {dimension_numbers = #tpu.dot_dimension_numbers<[1], [0], [0], [1], [0, 0, 1, 1], [], []>} : vector<32x32xf32>, vector<32x16xf32>, vector<32x16xf32> -> vector<32x16xf32>
    %c0_23 = arith.constant 0 : index
    %c0_24 = arith.constant 0 : index
    %32 = vector.load %arg7[%c0_23, %c0_24] : memref<32x16xf32, #tpu.memory_space<vmem>>, vector<32x16xf32>
    %33 = arith.addf %31, %32 : vector<32x16xf32>
    %c0_25 = arith.constant 0 : index
    %c0_26 = arith.constant 0 : index
    %34 = vector.load %arg9[%c0_25, %c0_26] : memref<32x16xf32, #tpu.memory_space<vmem>>, vector<32x16xf32>
    tpu.vector_store %arg9[%c0_25, %c0_26], %33 {strides = array<i32>} : memref<32x16xf32, #tpu.memory_space<vmem>>, vector<32x16xf32>,
    %35 = vector.extract_strided_slice %27 {offsets = [0, 0], sizes = [4, 8], strides = [1, 1]} : vector<32x16xf32> to vector<4x8xf32>
    %36 = vector.extract_strided_slice %27 {offsets = [4, 0], sizes = [4, 8], strides = [1, 1]} : vector<32x16xf32> to vector<4x8xf32>
    %37 = vector.extract_strided_slice %27 {offsets = [8, 0], sizes = [4, 8], strides = [1, 1]} : vector<32x16xf32> to vector<4x8xf32>
    %38 = vector.extract_strided_slice %27 {offsets = [12, 0], sizes = [4, 8], strides = [1, 1]} : vector<32x16xf32> to vector<4x8xf32>
    %39 = vector.extract_strided_slice %27 {offsets = [16, 0], sizes = [4, 8], strides = [1, 1]} : vector<32x16xf32> to vector<4x8xf32>
    %40 = vector.extract_strided_slice %27 {offsets = [20, 0], sizes = [4, 8], strides = [1, 1]} : vector<32x16xf32> to vector<4x8xf32>
    %41 = vector.extract_strided_slice %27 {offsets = [24, 0], sizes = [4, 8], strides = [1, 1]} : vector<32x16xf32> to vector<4x8xf32>
    %42 = vector.extract_strided_slice %27 {offsets = [28, 0], sizes = [4, 8], strides = [1, 1]} : vector<32x16xf32> to vector<4x8xf32>
    %43 = vector.extract_strided_slice %27 {offsets = [0, 8], sizes = [4, 8], strides = [1, 1]} : vector<32x16xf32> to vector<4x8xf32>
    %44 = vector.extract_strided_slice %27 {offsets = [4, 8], sizes = [4, 8], strides = [1, 1]} : vector<32x16xf32> to vector<4x8xf32>
    %45 = vector.extract_strided_slice %27 {offsets = [8, 8], sizes = [4, 8], strides = [1, 1]} : vector<32x16xf32> to vector<4x8xf32>
    %46 = vector.extract_strided_slice %27 {offsets = [12, 8], sizes = [4, 8], strides = [1, 1]} : vector<32x16xf32> to vector<4x8xf32>
    %47 = vector.extract_strided_slice %27 {offsets = [16, 8], sizes = [4, 8], strides = [1, 1]} : vector<32x16xf32> to vector<4x8xf32>
    %48 = vector.extract_strided_slice %27 {offsets = [20, 8], sizes = [4, 8], strides = [1, 1]} : vector<32x16xf32> to vector<4x8xf32>
    %49 = vector.extract_strided_slice %27 {offsets = [24, 8], sizes = [4, 8], strides = [1, 1]} : vector<32x16xf32> to vector<4x8xf32>
    %50 = vector.extract_strided_slice %27 {offsets = [28, 8], sizes = [4, 8], strides = [1, 1]} : vector<32x16xf32> to vector<4x8xf32>
    %51 = vector.shape_cast %35 : vector<4x8xf32> to vector<1x4x8xf32>
    %52 = vector.shape_cast %36 : vector<4x8xf32> to vector<1x4x8xf32>
    %53 = vector.shape_cast %37 : vector<4x8xf32> to vector<1x4x8xf32>
    %54 = vector.shape_cast %38 : vector<4x8xf32> to vector<1x4x8xf32>
    %55 = vector.shape_cast %39 : vector<4x8xf32> to vector<1x4x8xf32>
    %56 = vector.shape_cast %40 : vector<4x8xf32> to vector<1x4x8xf32>
    %57 = vector.shape_cast %41 : vector<4x8xf32> to vector<1x4x8xf32>
    %58 = vector.shape_cast %42 : vector<4x8xf32> to vector<1x4x8xf32>
    %59 = vector.shape_cast %43 : vector<4x8xf32> to vector<1x4x8xf32>
    %60 = vector.shape_cast %44 : vector<4x8xf32> to vector<1x4x8xf32>
    %61 = vector.shape_cast %45 : vector<4x8xf32> to vector<1x4x8xf32>
    %62 = vector.shape_cast %46 : vector<4x8xf32> to vector<1x4x8xf32>
    %63 = vector.shape_cast %47 : vector<4x8xf32> to vector<1x4x8xf32>
    %64 = vector.shape_cast %48 : vector<4x8xf32> to vector<1x4x8xf32>
    %65 = vector.shape_cast %49 : vector<4x8xf32> to vector<1x4x8xf32>
    %66 = vector.shape_cast %50 : vector<4x8xf32> to vector<1x4x8xf32>
    %67 = tpu.concatenate %51, %52, %53, %54, %55, %56, %57, %58, %59, %60, %61, %62, %63, %64, %65, %66 in 0 : vector<1x4x8xf32>, vector<1x4x8xf32>, vector<1x4x8xf32>, vector<1x4x8xf32>, vector<1x4x8xf32>, vector<1x4x8xf32>, vector<1x4x8xf32>, vector<1x4x8xf32>, vector<1x4x8xf32>, vector<1x4x8xf32>, vector<1x4x8xf32>, vector<1x4x8xf32>, vector<1x4x8xf32>, vector<1x4x8xf32>, vector<1x4x8xf32>, vector<1x4x8xf32> -> vector<16x4x8xf32>
    %68 = vector.extract_strided_slice %28 {offsets = [0, 0], sizes = [4, 8], strides = [1, 1]} : vector<32x16xf32> to vector<4x8xf32>
    %69 = vector.extract_strided_slice %28 {offsets = [4, 0], sizes = [4, 8], strides = [1, 1]} : vector<32x16xf32> to vector<4x8xf32>
    %70 = vector.extract_strided_slice %28 {offsets = [8, 0], sizes = [4, 8], strides = [1, 1]} : vector<32x16xf32> to vector<4x8xf32>
    %71 = vector.extract_strided_slice %28 {offsets = [12, 0], sizes = [4, 8], strides = [1, 1]} : vector<32x16xf32> to vector<4x8xf32>
    %72 = vector.extract_strided_slice %28 {offsets = [16, 0], sizes = [4, 8], strides = [1, 1]} : vector<32x16xf32> to vector<4x8xf32>
    %73 = vector.extract_strided_slice %28 {offsets = [20, 0], sizes = [4, 8], strides = [1, 1]} : vector<32x16xf32> to vector<4x8xf32>
    %74 = vector.extract_strided_slice %28 {offsets = [24, 0], sizes = [4, 8], strides = [1, 1]} : vector<32x16xf32> to vector<4x8xf32>
    %75 = vector.extract_strided_slice %28 {offsets = [28, 0], sizes = [4, 8], strides = [1, 1]} : vector<32x16xf32> to vector<4x8xf32>
    %76 = vector.extract_strided_slice %28 {offsets = [0, 8], sizes = [4, 8], strides = [1, 1]} : vector<32x16xf32> to vector<4x8xf32>
    %77 = vector.extract_strided_slice %28 {offsets = [4, 8], sizes = [4, 8], strides = [1, 1]} : vector<32x16xf32> to vector<4x8xf32>
    %78 = vector.extract_strided_slice %28 {offsets = [8, 8], sizes = [4, 8], strides = [1, 1]} : vector<32x16xf32> to vector<4x8xf32>
    %79 = vector.extract_strided_slice %28 {offsets = [12, 8], sizes = [4, 8], strides = [1, 1]} : vector<32x16xf32> to vector<4x8xf32>
    %80 = vector.extract_strided_slice %28 {offsets = [16, 8], sizes = [4, 8], strides = [1, 1]} : vector<32x16xf32> to vector<4x8xf32>
    %81 = vector.extract_strided_slice %28 {offsets = [20, 8], sizes = [4, 8], strides = [1, 1]} : vector<32x16xf32> to vector<4x8xf32>
    %82 = vector.extract_strided_slice %28 {offsets = [24, 8], sizes = [4, 8], strides = [1, 1]} : vector<32x16xf32> to vector<4x8xf32>
    %83 = vector.extract_strided_slice %28 {offsets = [28, 8], sizes = [4, 8], strides = [1, 1]} : vector<32x16xf32> to vector<4x8xf32>
    %84 = vector.shape_cast %68 : vector<4x8xf32> to vector<1x4x8xf32>
    %85 = vector.shape_cast %69 : vector<4x8xf32> to vector<1x4x8xf32>
    %86 = vector.shape_cast %70 : vector<4x8xf32> to vector<1x4x8xf32>
    %87 = vector.shape_cast %71 : vector<4x8xf32> to vector<1x4x8xf32>
    %88 = vector.shape_cast %72 : vector<4x8xf32> to vector<1x4x8xf32>
    %89 = vector.shape_cast %73 : vector<4x8xf32> to vector<1x4x8xf32>
    %90 = vector.shape_cast %74 : vector<4x8xf32> to vector<1x4x8xf32>
    %91 = vector.shape_cast %75 : vector<4x8xf32> to vector<1x4x8xf32>
    %92 = vector.shape_cast %76 : vector<4x8xf32> to vector<1x4x8xf32>
    %93 = vector.shape_cast %77 : vector<4x8xf32> to vector<1x4x8xf32>
    %94 = vector.shape_cast %78 : vector<4x8xf32> to vector<1x4x8xf32>
    %95 = vector.shape_cast %79 : vector<4x8xf32> to vector<1x4x8xf32>
    %96 = vector.shape_cast %80 : vector<4x8xf32> to vector<1x4x8xf32>
    %97 = vector.shape_cast %81 : vector<4x8xf32> to vector<1x4x8xf32>
    %98 = vector.shape_cast %82 : vector<4x8xf32> to vector<1x4x8xf32>
    %99 = vector.shape_cast %83 : vector<4x8xf32> to vector<1x4x8xf32>
    %100 = tpu.concatenate %84, %85, %86, %87, %88, %89, %90, %91, %92, %93, %94, %95, %96, %97, %98, %99 in 0 : vector<1x4x8xf32>, vector<1x4x8xf32>, vector<1x4x8xf32>, vector<1x4x8xf32>, vector<1x4x8xf32>, vector<1x4x8xf32>, vector<1x4x8xf32>, vector<1x4x8xf32>, vector<1x4x8xf32>, vector<1x4x8xf32>, vector<1x4x8xf32>, vector<1x4x8xf32>, vector<1x4x8xf32>, vector<1x4x8xf32>, vector<1x4x8xf32>, vector<1x4x8xf32> -> vector<16x4x8xf32>
    %101 = tpu.concatenate %100, %100 in 2 : vector<16x4x8xf32>, vector<16x4x8xf32> -> vector<16x4x16xf32>
    %102 = vector.extract_strided_slice %101 {offsets = [0, 0, 8], sizes = [16, 4, 8], strides = [1, 1, 1]} : vector<16x4x16xf32> to vector<16x4x8xf32>
    %cst_27 = arith.constant dense<0.000000e+00> : vector<16x4x4xf32>
    %103 = tpu.matmul %67, %102, %cst_27 {dimension_numbers = #tpu.dot_dimension_numbers<[2], [2], [1], [1], [0, 0, 0, 1, 1, 1], [0], [0]>} : vector<16x4x8xf32>, vector<16x4x8xf32>, vector<16x4x4xf32> -> vector<16x4x4xf32>
    %104 = vector.shape_cast %103 : vector<16x4x4xf32> to vector<16x16xf32>
    %105 = vector.extract_strided_slice %101 {offsets = [0, 0, 7], sizes = [16, 4, 8], strides = [1, 1, 1]} : vector<16x4x16xf32> to vector<16x4x8xf32>
    %cst_28 = arith.constant dense<0.000000e+00> : vector<16x4x4xf32>
    %106 = tpu.matmul %67, %105, %cst_28 {dimension_numbers = #tpu.dot_dimension_numbers<[2], [2], [1], [1], [0, 0, 0, 1, 1, 1], [0], [0]>} : vector<16x4x8xf32>, vector<16x4x8xf32>, vector<16x4x4xf32> -> vector<16x4x4xf32>
    %107 = vector.shape_cast %106 : vector<16x4x4xf32> to vector<16x16xf32>
    %108 = vector.extract_strided_slice %101 {offsets = [0, 0, 6], sizes = [16, 4, 8], strides = [1, 1, 1]} : vector<16x4x16xf32> to vector<16x4x8xf32>
    %cst_29 = arith.constant dense<0.000000e+00> : vector<16x4x4xf32>
    %109 = tpu.matmul %67, %108, %cst_29 {dimension_numbers = #tpu.dot_dimension_numbers<[2], [2], [1], [1], [0, 0, 0, 1, 1, 1], [0], [0]>} : vector<16x4x8xf32>, vector<16x4x8xf32>, vector<16x4x4xf32> -> vector<16x4x4xf32>
    %110 = vector.shape_cast %109 : vector<16x4x4xf32> to vector<16x16xf32>
    %111 = vector.extract_strided_slice %101 {offsets = [0, 0, 5], sizes = [16, 4, 8], strides = [1, 1, 1]} : vector<16x4x16xf32> to vector<16x4x8xf32>
    %cst_30 = arith.constant dense<0.000000e+00> : vector<16x4x4xf32>
    %112 = tpu.matmul %67, %111, %cst_30 {dimension_numbers = #tpu.dot_dimension_numbers<[2], [2], [1], [1], [0, 0, 0, 1, 1, 1], [0], [0]>} : vector<16x4x8xf32>, vector<16x4x8xf32>, vector<16x4x4xf32> -> vector<16x4x4xf32>
    %113 = vector.shape_cast %112 : vector<16x4x4xf32> to vector<16x16xf32>
    %114 = vector.extract_strided_slice %101 {offsets = [0, 0, 4], sizes = [16, 4, 8], strides = [1, 1, 1]} : vector<16x4x16xf32> to vector<16x4x8xf32>
    %cst_31 = arith.constant dense<0.000000e+00> : vector<16x4x4xf32>
    %115 = tpu.matmul %67, %114, %cst_31 {dimension_numbers = #tpu.dot_dimension_numbers<[2], [2], [1], [1], [0, 0, 0, 1, 1, 1], [0], [0]>} : vector<16x4x8xf32>, vector<16x4x8xf32>, vector<16x4x4xf32> -> vector<16x4x4xf32>
    %116 = vector.shape_cast %115 : vector<16x4x4xf32> to vector<16x16xf32>
    %117 = vector.extract_strided_slice %101 {offsets = [0, 0, 3], sizes = [16, 4, 8], strides = [1, 1, 1]} : vector<16x4x16xf32> to vector<16x4x8xf32>
    %cst_32 = arith.constant dense<0.000000e+00> : vector<16x4x4xf32>
    %118 = tpu.matmul %67, %117, %cst_32 {dimension_numbers = #tpu.dot_dimension_numbers<[2], [2], [1], [1], [0, 0, 0, 1, 1, 1], [0], [0]>} : vector<16x4x8xf32>, vector<16x4x8xf32>, vector<16x4x4xf32> -> vector<16x4x4xf32>
    %119 = vector.shape_cast %118 : vector<16x4x4xf32> to vector<16x16xf32>
    %120 = vector.extract_strided_slice %101 {offsets = [0, 0, 2], sizes = [16, 4, 8], strides = [1, 1, 1]} : vector<16x4x16xf32> to vector<16x4x8xf32>
    %cst_33 = arith.constant dense<0.000000e+00> : vector<16x4x4xf32>
    %121 = tpu.matmul %67, %120, %cst_33 {dimension_numbers = #tpu.dot_dimension_numbers<[2], [2], [1], [1], [0, 0, 0, 1, 1, 1], [0], [0]>} : vector<16x4x8xf32>, vector<16x4x8xf32>, vector<16x4x4xf32> -> vector<16x4x4xf32>
    %122 = vector.shape_cast %121 : vector<16x4x4xf32> to vector<16x16xf32>
    %123 = vector.extract_strided_slice %101 {offsets = [0, 0, 1], sizes = [16, 4, 8], strides = [1, 1, 1]} : vector<16x4x16xf32> to vector<16x4x8xf32>
    %cst_34 = arith.constant dense<0.000000e+00> : vector<16x4x4xf32>
    %124 = tpu.matmul %67, %123, %cst_34 {dimension_numbers = #tpu.dot_dimension_numbers<[2], [2], [1], [1], [0, 0, 0, 1, 1, 1], [0], [0]>} : vector<16x4x8xf32>, vector<16x4x8xf32>, vector<16x4x4xf32> -> vector<16x4x4xf32>
    %125 = vector.shape_cast %124 : vector<16x4x4xf32> to vector<16x16xf32>
    %126 = tpu.concatenate %104, %107, %110, %113, %116, %119, %122, %125 in 1 : vector<16x16xf32>, vector<16x16xf32>, vector<16x16xf32>, vector<16x16xf32>, vector<16x16xf32>, vector<16x16xf32>, vector<16x16xf32>, vector<16x16xf32> -> vector<16x128xf32>
    %c0_35 = arith.constant 0 : index
    %c0_36 = arith.constant 0 : index
    %127 = vector.load %arg10[%c0_35, %c0_36] : memref<16x128xf32, #tpu.memory_space<vmem>>, vector<16x128xf32>
    tpu.vector_store %arg10[%c0_35, %c0_36], %126 {strides = array<i32>} : memref<16x128xf32, #tpu.memory_space<vmem>>, vector<16x128xf32>,
    return
  }
  func.func @transform_0(%arg0: i32) -> (i32, i32, i32) {
    %c0_i32 = arith.constant 0 : i32
    %c0_i32_0 = arith.constant 0 : i32
    %c0_i32_1 = arith.constant 0 : i32
    %c0_i32_2 = arith.constant 0 : i32
    return %c0_i32, %c0_i32_0, %c0_i32_1 : i32, i32, i32
  }
  func.func @transform_1(%arg0: i32) -> (i32, i32) {
    %c0_i32 = arith.constant 0 : i32
    %c0_i32_0 = arith.constant 0 : i32
    %c0_i32_1 = arith.constant 0 : i32
    return %c0_i32, %c0_i32_0 : i32, i32
  }
  func.func @transform_2(%arg0: i32) -> (i32, i32) {
    %c0_i32 = arith.constant 0 : i32
    %c0_i32_0 = arith.constant 0 : i32
    %c0_i32_1 = arith.constant 0 : i32
    return %c0_i32, %c0_i32_0 : i32, i32
  }
  func.func @transform_3(%arg0: i32) -> (i32, i32) {
    %c0_i32 = arith.constant 0 : i32
    %c0_i32_0 = arith.constant 0 : i32
    %c0_i32_1 = arith.constant 0 : i32
    return %c0_i32, %c0_i32_0 : i32, i32
  }
  func.func @transform_4(%arg0: i32) -> (i32, i32) {
    %c0_i32 = arith.constant 0 : i32
    %c0_i32_0 = arith.constant 0 : i32
    %c0_i32_1 = arith.constant 0 : i32
    return %c0_i32, %c0_i32_0 : i32, i32
  }
  func.func @transform_5(%arg0: i32) -> (i32, i32) {
    %c0_i32 = arith.constant 0 : i32
    %c0_i32_0 = arith.constant 0 : i32
    %c0_i32_1 = arith.constant 0 : i32
    return %c0_i32, %c0_i32_0 : i32, i32
  }
  func.func @transform_6(%arg0: i32) -> (i32, i32) {
    %c0_i32 = arith.constant 0 : i32
    %c0_i32_0 = arith.constant 0 : i32
    %c0_i32_1 = arith.constant 0 : i32
    return %c0_i32, %c0_i32_0 : i32, i32
  }
  func.func @transform_7(%arg0: i32) -> (i32, i32) {
    %c0_i32 = arith.constant 0 : i32
    %c0_i32_0 = arith.constant 0 : i32
    %c0_i32_1 = arith.constant 0 : i32
    return %c0_i32, %c0_i32_0 : i32, i32
  }
  func.func @transform_8(%arg0: i32) -> (i32, i32) {
    %c0_i32 = arith.constant 0 : i32
    %c0_i32_0 = arith.constant 0 : i32
    %c0_i32_1 = arith.constant 0 : i32
    return %c0_i32, %c0_i32_0 : i32, i32
  }
  func.func @transform_9(%arg0: i32) -> (i32, i32) {
    %c0_i32 = arith.constant 0 : i32
    %c0_i32_0 = arith.constant 0 : i32
    %c0_i32_1 = arith.constant 0 : i32
    return %c0_i32, %c0_i32_0 : i32, i32
  }
}

module attributes {stable_mosaic.version = 11 : i64} {
  func.func @_encoder_back_kernel(%arg0: i32, %arg1: memref<32x16xf32, #tpu.memory_space<vmem>>, %arg2: memref<32x16xf32, #tpu.memory_space<vmem>>, %arg3: memref<1xf32, #tpu.memory_space<smem>>, %arg4: memref<32x1xf32, #tpu.memory_space<vmem>>, %arg5: memref<32x1xf32, #tpu.memory_space<vmem>>, %arg6: memref<32x1xf32, #tpu.memory_space<vmem>>, %arg7: memref<16x32xf32, #tpu.memory_space<vmem>>, %arg8: memref<16x1xf32, #tpu.memory_space<vmem>>, %arg9: memref<32x16xf32, #tpu.memory_space<vmem>>, %arg10: memref<32x1xf32, #tpu.memory_space<vmem>>, %arg11: memref<32x1xf32, #tpu.memory_space<vmem>>, %arg12: memref<32x1xf32, #tpu.memory_space<vmem>>, %arg13: memref<32x1xf32, #tpu.memory_space<vmem>>, %arg14: memref<32x1xf32, #tpu.memory_space<vmem>>, %arg15: memref<4x32xf32, #tpu.memory_space<vmem>>, %arg16: memref<4x1xf32, #tpu.memory_space<vmem>>, %arg17: memref<4x16xf32, #tpu.memory_space<vmem>>) attributes {dimension_semantics = [#tpu.dimension_semantics<arbitrary>], iteration_bounds = array<i64: 1>, scalar_prefetch = 0 : i64, scratch_operands = 0 : i64, tpu.core_type = #tpu.core_type<tc>, window_params = [{pipeline_mode = #tpu.pipeline_mode<synchronous>, transform_indices = @transform_0, window_bounds = array<i64: 32, 16>}, {pipeline_mode = #tpu.pipeline_mode<synchronous>, transform_indices = @transform_1, window_bounds = array<i64: 32, 16>}, {transform_indices = @transform_2, window_bounds = array<i64: 1>}, {pipeline_mode = #tpu.pipeline_mode<synchronous>, transform_indices = @transform_3, window_bounds = array<i64: 32, 1>}, {pipeline_mode = #tpu.pipeline_mode<synchronous>, transform_indices = @transform_4, window_bounds = array<i64: 32, 1>}, {pipeline_mode = #tpu.pipeline_mode<synchronous>, transform_indices = @transform_5, window_bounds = array<i64: 32, 1>}, {pipeline_mode = #tpu.pipeline_mode<synchronous>, transform_indices = @transform_6, window_bounds = array<i64: 16, 32>}, {pipeline_mode = #tpu.pipeline_mode<synchronous>, transform_indices = @transform_7, window_bounds = array<i64: 16, 1>}, {pipeline_mode = #tpu.pipeline_mode<synchronous>, transform_indices = @transform_8, window_bounds = array<i64: 32, 16>}, {pipeline_mode = #tpu.pipeline_mode<synchronous>, transform_indices = @transform_9, window_bounds = array<i64: 32, 1>}, {pipeline_mode = #tpu.pipeline_mode<synchronous>, transform_indices = @transform_10, window_bounds = array<i64: 32, 1>}, {pipeline_mode = #tpu.pipeline_mode<synchronous>, transform_indices = @transform_11, window_bounds = array<i64: 32, 1>}, {pipeline_mode = #tpu.pipeline_mode<synchronous>, transform_indices = @transform_12, window_bounds = array<i64: 32, 1>}, {pipeline_mode = #tpu.pipeline_mode<synchronous>, transform_indices = @transform_13, window_bounds = array<i64: 32, 1>}, {pipeline_mode = #tpu.pipeline_mode<synchronous>, transform_indices = @transform_14, window_bounds = array<i64: 4, 32>}, {pipeline_mode = #tpu.pipeline_mode<synchronous>, transform_indices = @transform_15, window_bounds = array<i64: 4, 1>}, {pipeline_mode = #tpu.pipeline_mode<synchronous>, transform_indices = @transform_16, window_bounds = array<i64: 4, 16>}]} {
    %c0 = arith.constant 0 : index
    %0 = memref.load %arg3[%c0] : memref<1xf32, #tpu.memory_space<smem>>
    %c0_0 = arith.constant 0 : index
    %c0_1 = arith.constant 0 : index
    %1 = vector.load %arg1[%c0_0, %c0_1] : memref<32x16xf32, #tpu.memory_space<vmem>>, vector<32x16xf32>
    %c0_2 = arith.constant 0 : index
    %c0_3 = arith.constant 0 : index
    %2 = vector.load %arg2[%c0_2, %c0_3] : memref<32x16xf32, #tpu.memory_space<vmem>>, vector<32x16xf32>
    %3 = vector.broadcast %0 : f32 to vector<32x16xf32>
    %4 = arith.mulf %3, %2 : vector<32x16xf32>
    %5 = arith.addf %1, %4 : vector<32x16xf32>
    %c0_4 = arith.constant 0 : index
    %c0_5 = arith.constant 0 : index
    %6 = vector.load %arg4[%c0_4, %c0_5] : memref<32x1xf32, #tpu.memory_space<vmem>>, vector<32x1xf32>
    %7 = vector.broadcast %6 : vector<32x1xf32> to vector<32x16xf32>
    %8 = arith.addf %5, %7 : vector<32x16xf32>
    %c0_6 = arith.constant 0 : index
    %c0_7 = arith.constant 0 : index
    %9 = vector.load %arg5[%c0_6, %c0_7] : memref<32x1xf32, #tpu.memory_space<vmem>>, vector<32x1xf32>
    %c0_8 = arith.constant 0 : index
    %c0_9 = arith.constant 0 : index
    %10 = vector.load %arg6[%c0_8, %c0_9] : memref<32x1xf32, #tpu.memory_space<vmem>>, vector<32x1xf32>
    %cst = arith.constant dense<0.000000e+00> : vector<16xf32>
    %11 = vector.multi_reduction <add>, %8, %cst [0] : vector<32x16xf32> to vector<16xf32>
    %12 = vector.shape_cast %11 : vector<16xf32> to vector<1x16xf32>
    %cst_10 = arith.constant 3.200000e+01 : f32
    %13 = vector.broadcast %cst_10 : f32 to vector<1x16xf32>
    %14 = arith.divf %12, %13 : vector<1x16xf32>
    %15 = vector.broadcast %14 : vector<1x16xf32> to vector<32x16xf32>
    %16 = arith.subf %8, %15 : vector<32x16xf32>
    %17 = arith.mulf %16, %16 : vector<32x16xf32>
    %cst_11 = arith.constant dense<0.000000e+00> : vector<16xf32>
    %18 = vector.multi_reduction <add>, %17, %cst_11 [0] : vector<32x16xf32> to vector<16xf32>
    %19 = vector.shape_cast %18 : vector<16xf32> to vector<1x16xf32>
    %cst_12 = arith.constant 3.200000e+01 : f32
    %20 = vector.broadcast %cst_12 : f32 to vector<1x16xf32>
    %21 = arith.divf %19, %20 : vector<1x16xf32>
    %cst_13 = arith.constant 9.99999974E-6 : f32
    %22 = vector.broadcast %cst_13 : f32 to vector<1x16xf32>
    %23 = arith.addf %21, %22 : vector<1x16xf32>
    %24 = math.rsqrt %23 : vector<1x16xf32>
    %25 = vector.broadcast %24 : vector<1x16xf32> to vector<32x16xf32>
    %26 = arith.mulf %16, %25 : vector<32x16xf32>
    %27 = vector.broadcast %9 : vector<32x1xf32> to vector<32x16xf32>
    %28 = arith.mulf %26, %27 : vector<32x16xf32>
    %29 = vector.broadcast %10 : vector<32x1xf32> to vector<32x16xf32>
    %30 = arith.addf %28, %29 : vector<32x16xf32>
    %c0_14 = arith.constant 0 : index
    %c0_15 = arith.constant 0 : index
    %31 = vector.load %arg7[%c0_14, %c0_15] : memref<16x32xf32, #tpu.memory_space<vmem>>, vector<16x32xf32>
    %cst_16 = arith.constant dense<0.000000e+00> : vector<16x16xf32>
    %32 = tpu.matmul %31, %30, %cst_16 {dimension_numbers = #tpu.dot_dimension_numbers<[1], [0], [0], [1], [0, 0, 1, 1], [], []>} : vector<16x32xf32>, vector<32x16xf32>, vector<16x16xf32> -> vector<16x16xf32>
    %c0_17 = arith.constant 0 : index
    %c0_18 = arith.constant 0 : index
    %33 = vector.load %arg8[%c0_17, %c0_18] : memref<16x1xf32, #tpu.memory_space<vmem>>, vector<16x1xf32>
    %34 = vector.broadcast %33 : vector<16x1xf32> to vector<16x16xf32>
    %35 = arith.addf %32, %34 : vector<16x16xf32>
    %c0_19 = arith.constant 0 : index
    %c0_20 = arith.constant 0 : index
    %36 = vector.load %arg9[%c0_19, %c0_20] : memref<32x16xf32, #tpu.memory_space<vmem>>, vector<32x16xf32>
    %cst_21 = arith.constant dense<0.000000e+00> : vector<32x16xf32>
    %37 = tpu.matmul %36, %35, %cst_21 {dimension_numbers = #tpu.dot_dimension_numbers<[1], [0], [0], [1], [0, 0, 1, 1], [], []>} : vector<32x16xf32>, vector<16x16xf32>, vector<32x16xf32> -> vector<32x16xf32>
    %c0_22 = arith.constant 0 : index
    %c0_23 = arith.constant 0 : index
    %38 = vector.load %arg10[%c0_22, %c0_23] : memref<32x1xf32, #tpu.memory_space<vmem>>, vector<32x1xf32>
    %39 = vector.broadcast %38 : vector<32x1xf32> to vector<32x16xf32>
    %40 = arith.addf %37, %39 : vector<32x16xf32>
    %41 = arith.addf %30, %40 : vector<32x16xf32>
    %c0_24 = arith.constant 0 : index
    %c0_25 = arith.constant 0 : index
    %42 = vector.load %arg11[%c0_24, %c0_25] : memref<32x1xf32, #tpu.memory_space<vmem>>, vector<32x1xf32>
    %c0_26 = arith.constant 0 : index
    %c0_27 = arith.constant 0 : index
    %43 = vector.load %arg12[%c0_26, %c0_27] : memref<32x1xf32, #tpu.memory_space<vmem>>, vector<32x1xf32>
    %cst_28 = arith.constant dense<0.000000e+00> : vector<16xf32>
    %44 = vector.multi_reduction <add>, %41, %cst_28 [0] : vector<32x16xf32> to vector<16xf32>
    %45 = vector.shape_cast %44 : vector<16xf32> to vector<1x16xf32>
    %cst_29 = arith.constant 3.200000e+01 : f32
    %46 = vector.broadcast %cst_29 : f32 to vector<1x16xf32>
    %47 = arith.divf %45, %46 : vector<1x16xf32>
    %48 = vector.broadcast %47 : vector<1x16xf32> to vector<32x16xf32>
    %49 = arith.subf %41, %48 : vector<32x16xf32>
    %50 = arith.mulf %49, %49 : vector<32x16xf32>
    %cst_30 = arith.constant dense<0.000000e+00> : vector<16xf32>
    %51 = vector.multi_reduction <add>, %50, %cst_30 [0] : vector<32x16xf32> to vector<16xf32>
    %52 = vector.shape_cast %51 : vector<16xf32> to vector<1x16xf32>
    %cst_31 = arith.constant 3.200000e+01 : f32
    %53 = vector.broadcast %cst_31 : f32 to vector<1x16xf32>
    %54 = arith.divf %52, %53 : vector<1x16xf32>
    %cst_32 = arith.constant 9.99999974E-6 : f32
    %55 = vector.broadcast %cst_32 : f32 to vector<1x16xf32>
    %56 = arith.addf %54, %55 : vector<1x16xf32>
    %57 = math.rsqrt %56 : vector<1x16xf32>
    %58 = vector.broadcast %57 : vector<1x16xf32> to vector<32x16xf32>
    %59 = arith.mulf %49, %58 : vector<32x16xf32>
    %60 = vector.broadcast %42 : vector<32x1xf32> to vector<32x16xf32>
    %61 = arith.mulf %59, %60 : vector<32x16xf32>
    %62 = vector.broadcast %43 : vector<32x1xf32> to vector<32x16xf32>
    %63 = arith.addf %61, %62 : vector<32x16xf32>
    %c0_33 = arith.constant 0 : index
    %c0_34 = arith.constant 0 : index
    %64 = vector.load %arg13[%c0_33, %c0_34] : memref<32x1xf32, #tpu.memory_space<vmem>>, vector<32x1xf32>
    %c0_35 = arith.constant 0 : index
    %c0_36 = arith.constant 0 : index
    %65 = vector.load %arg14[%c0_35, %c0_36] : memref<32x1xf32, #tpu.memory_space<vmem>>, vector<32x1xf32>
    %cst_37 = arith.constant dense<0.000000e+00> : vector<16xf32>
    %66 = vector.multi_reduction <add>, %63, %cst_37 [0] : vector<32x16xf32> to vector<16xf32>
    %67 = vector.shape_cast %66 : vector<16xf32> to vector<1x16xf32>
    %cst_38 = arith.constant 3.200000e+01 : f32
    %68 = vector.broadcast %cst_38 : f32 to vector<1x16xf32>
    %69 = arith.divf %67, %68 : vector<1x16xf32>
    %70 = vector.broadcast %69 : vector<1x16xf32> to vector<32x16xf32>
    %71 = arith.subf %63, %70 : vector<32x16xf32>
    %72 = arith.mulf %71, %71 : vector<32x16xf32>
    %cst_39 = arith.constant dense<0.000000e+00> : vector<16xf32>
    %73 = vector.multi_reduction <add>, %72, %cst_39 [0] : vector<32x16xf32> to vector<16xf32>
    %74 = vector.shape_cast %73 : vector<16xf32> to vector<1x16xf32>
    %cst_40 = arith.constant 3.200000e+01 : f32
    %75 = vector.broadcast %cst_40 : f32 to vector<1x16xf32>
    %76 = arith.divf %74, %75 : vector<1x16xf32>
    %cst_41 = arith.constant 9.99999974E-6 : f32
    %77 = vector.broadcast %cst_41 : f32 to vector<1x16xf32>
    %78 = arith.addf %76, %77 : vector<1x16xf32>
    %79 = math.rsqrt %78 : vector<1x16xf32>
    %80 = vector.broadcast %79 : vector<1x16xf32> to vector<32x16xf32>
    %81 = arith.mulf %71, %80 : vector<32x16xf32>
    %82 = vector.broadcast %64 : vector<32x1xf32> to vector<32x16xf32>
    %83 = arith.mulf %81, %82 : vector<32x16xf32>
    %84 = vector.broadcast %65 : vector<32x1xf32> to vector<32x16xf32>
    %85 = arith.addf %83, %84 : vector<32x16xf32>
    %c0_42 = arith.constant 0 : index
    %c0_43 = arith.constant 0 : index
    %86 = vector.load %arg15[%c0_42, %c0_43] : memref<4x32xf32, #tpu.memory_space<vmem>>, vector<4x32xf32>
    %cst_44 = arith.constant dense<0.000000e+00> : vector<4x16xf32>
    %87 = tpu.matmul %86, %85, %cst_44 {dimension_numbers = #tpu.dot_dimension_numbers<[1], [0], [0], [1], [0, 0, 1, 1], [], []>} : vector<4x32xf32>, vector<32x16xf32>, vector<4x16xf32> -> vector<4x16xf32>
    %c0_45 = arith.constant 0 : index
    %c0_46 = arith.constant 0 : index
    %88 = vector.load %arg16[%c0_45, %c0_46] : memref<4x1xf32, #tpu.memory_space<vmem>>, vector<4x1xf32>
    %89 = vector.broadcast %88 : vector<4x1xf32> to vector<4x16xf32>
    %90 = arith.addf %87, %89 : vector<4x16xf32>
    %c0_47 = arith.constant 0 : index
    %c0_48 = arith.constant 0 : index
    %91 = vector.load %arg17[%c0_47, %c0_48] : memref<4x16xf32, #tpu.memory_space<vmem>>, vector<4x16xf32>
    tpu.vector_store %arg17[%c0_47, %c0_48], %90 {strides = array<i32>} : memref<4x16xf32, #tpu.memory_space<vmem>>, vector<4x16xf32>,
    return
  }
  func.func @transform_0(%arg0: i32) -> (i32, i32) {
    %c0_i32 = arith.constant 0 : i32
    %c0_i32_0 = arith.constant 0 : i32
    %c0_i32_1 = arith.constant 0 : i32
    return %c0_i32, %c0_i32_0 : i32, i32
  }
  func.func @transform_1(%arg0: i32) -> (i32, i32) {
    %c0_i32 = arith.constant 0 : i32
    %c0_i32_0 = arith.constant 0 : i32
    %c0_i32_1 = arith.constant 0 : i32
    return %c0_i32, %c0_i32_0 : i32, i32
  }
  func.func @transform_2(%arg0: i32) -> i32 {
    %c0_i32 = arith.constant 0 : i32
    %c0_i32_0 = arith.constant 0 : i32
    return %c0_i32 : i32
  }
  func.func @transform_3(%arg0: i32) -> (i32, i32) {
    %c0_i32 = arith.constant 0 : i32
    %c0_i32_0 = arith.constant 0 : i32
    %c0_i32_1 = arith.constant 0 : i32
    return %c0_i32, %c0_i32_0 : i32, i32
  }
  func.func @transform_4(%arg0: i32) -> (i32, i32) {
    %c0_i32 = arith.constant 0 : i32
    %c0_i32_0 = arith.constant 0 : i32
    %c0_i32_1 = arith.constant 0 : i32
    return %c0_i32, %c0_i32_0 : i32, i32
  }
  func.func @transform_5(%arg0: i32) -> (i32, i32) {
    %c0_i32 = arith.constant 0 : i32
    %c0_i32_0 = arith.constant 0 : i32
    %c0_i32_1 = arith.constant 0 : i32
    return %c0_i32, %c0_i32_0 : i32, i32
  }
  func.func @transform_6(%arg0: i32) -> (i32, i32) {
    %c0_i32 = arith.constant 0 : i32
    %c0_i32_0 = arith.constant 0 : i32
    %c0_i32_1 = arith.constant 0 : i32
    return %c0_i32, %c0_i32_0 : i32, i32
  }
  func.func @transform_7(%arg0: i32) -> (i32, i32) {
    %c0_i32 = arith.constant 0 : i32
    %c0_i32_0 = arith.constant 0 : i32
    %c0_i32_1 = arith.constant 0 : i32
    return %c0_i32, %c0_i32_0 : i32, i32
  }
  func.func @transform_8(%arg0: i32) -> (i32, i32) {
    %c0_i32 = arith.constant 0 : i32
    %c0_i32_0 = arith.constant 0 : i32
    %c0_i32_1 = arith.constant 0 : i32
    return %c0_i32, %c0_i32_0 : i32, i32
  }
  func.func @transform_9(%arg0: i32) -> (i32, i32) {
    %c0_i32 = arith.constant 0 : i32
    %c0_i32_0 = arith.constant 0 : i32
    %c0_i32_1 = arith.constant 0 : i32
    return %c0_i32, %c0_i32_0 : i32, i32
  }
  func.func @transform_10(%arg0: i32) -> (i32, i32) {
    %c0_i32 = arith.constant 0 : i32
    %c0_i32_0 = arith.constant 0 : i32
    %c0_i32_1 = arith.constant 0 : i32
    return %c0_i32, %c0_i32_0 : i32, i32
  }
  func.func @transform_11(%arg0: i32) -> (i32, i32) {
    %c0_i32 = arith.constant 0 : i32
    %c0_i32_0 = arith.constant 0 : i32
    %c0_i32_1 = arith.constant 0 : i32
    return %c0_i32, %c0_i32_0 : i32, i32
  }
  func.func @transform_12(%arg0: i32) -> (i32, i32) {
    %c0_i32 = arith.constant 0 : i32
    %c0_i32_0 = arith.constant 0 : i32
    %c0_i32_1 = arith.constant 0 : i32
    return %c0_i32, %c0_i32_0 : i32, i32
  }
  func.func @transform_13(%arg0: i32) -> (i32, i32) {
    %c0_i32 = arith.constant 0 : i32
    %c0_i32_0 = arith.constant 0 : i32
    %c0_i32_1 = arith.constant 0 : i32
    return %c0_i32, %c0_i32_0 : i32, i32
  }
  func.func @transform_14(%arg0: i32) -> (i32, i32) {
    %c0_i32 = arith.constant 0 : i32
    %c0_i32_0 = arith.constant 0 : i32
    %c0_i32_1 = arith.constant 0 : i32
    return %c0_i32, %c0_i32_0 : i32, i32
  }
  func.func @transform_15(%arg0: i32) -> (i32, i32) {
    %c0_i32 = arith.constant 0 : i32
    %c0_i32_0 = arith.constant 0 : i32
    %c0_i32_1 = arith.constant 0 : i32
    return %c0_i32, %c0_i32_0 : i32, i32
  }
  func.func @transform_16(%arg0: i32) -> (i32, i32) {
    %c0_i32 = arith.constant 0 : i32
    %c0_i32_0 = arith.constant 0 : i32
    %c0_i32_1 = arith.constant 0 : i32
    return %c0_i32, %c0_i32_0 : i32, i32
  }
}

</mosaic_0001>

<bundles_post_ra>
// kernel: trans_forward.3
= control target key start
LH: loop header
LB: loop body
LE: loop exit
PB: predicated region body
PF: predicated region fallthrough
CT: control target
= control target key end

     0   :  { %v774_v0 = vmov 0   ;;  %vm214_vm0 = vcmask 261120   ;;  %vm108_vm1 = vcmask 130048   ;;  %vm776_vm2 = vmmov 0   ;;  %s1054_s3 = inlined_call_operand.vmem [shape: f32[32,1], index: 3, kind: input, shape index: {}]   ;;  %s1055_s4 = inlined_call_operand.vmem [shape: f32[32,1], index: 4, kind: input, shape index: {}]   ;;  %s1056_s5 = inlined_call_operand.vmem [shape: f32[32,1], index: 5, kind: input, shape index: {}]   ;;  %s1057_s7 = inlined_call_operand.vmem [shape: f32[16,1], index: 7, kind: input, shape index: {}]   ;;  %s1058_s9 = inlined_call_operand.vmem [shape: f32[32,1], index: 9, kind: input, shape index: {}]   ;;  %s1059_s10 = inlined_call_operand.vmem [shape: f32[32,1], index: 10, kind: input, shape index: {}]   ;;  %s1060_s11 = inlined_call_operand.vmem [shape: f32[32,1], index: 11, kind: input, shape index: {}]   ;;  %s1061_s12 = inlined_call_operand.vmem [shape: f32[32,1], index: 12, kind: input, shape index: {}]   ;;  %s1062_s13 = inlined_call_operand.vmem [shape: f32[32,1], index: 13, kind: input, shape index: {}]   ;;  %s1063_s15 = inlined_call_operand.vmem [shape: f32[4,1], index: 15, kind: input, shape index: {}]   ;;  %s1064_s6 = inlined_call_operand.vmem [shape: f32[16,32], index: 6, kind: input, shape index: {}]   ;;  %s1065_s1 = inlined_call_operand.vmem [shape: f32[32,16], index: 1, kind: input, shape index: {}]   ;;  %s1066_s2 = inlined_call_operand.<no memory space> [shape: f32[1], index: 2, kind: input, shape index: {}]   ;;  %s1067_s0 = inlined_call_operand.vmem [shape: f32[32,16], index: 0, kind: input, shape index: {}]   ;;  %s1068_s8 = inlined_call_operand.vmem [shape: f32[32,16], index: 8, kind: input, shape index: {}]   ;;  %s1069_s14 = inlined_call_operand.vmem [shape: f32[4,32], index: 14, kind: input, shape index: {}]   ;;  %s1070_s16 = inlined_call_operand.vmem [shape: f32[4,16], index: 16, kind: output, shape index: {}]  }
   0x1   :  { %1072 = sst [smem:[#allocation3_spill]] %s1054_s3  ;;  %767 = vset.pattern.permute.xlu1 %v774_v0  ;;  %766 = vset.pattern.permute.xlu0 %v774_v0  ;;  %v102_v5 = vld [vmem:[%s1055_s4 + $0x10] sm:$0xff]  ;;  %v103_v6 = vld [vmem:[%s1055_s4 + $0x18] sm:$0xff]  ;;  %v101_v7 = vld [vmem:[%s1055_s4 + $0x8] sm:$0xff]  ;;  %v63_v37 = vstv %s1066_s2  ;;  %vm701_vm3 = vcmask 125952  }
   0x2   :  { %s1073_s23 = sld [smem:[#allocation3_spill]]  ;;  %v107_v8 = vld [vmem:[%s1056_s5 + $0x18] sm:$0xff]  ;;  %v100_v9 = vld [vmem:[%s1055_s4] sm:$0xff]  ;;  %v106_v10 = vld [vmem:[%s1056_s5 + $0x10] sm:$0xff] }
   0x3   :  { %v104_v11 = vld [vmem:[%s1056_s5] sm:$0xff]  ;;  %v105_v12 = vld [vmem:[%s1056_s5 + $0x8] sm:$0xff]  ;;  %v303_v17 = vld [vmem:[%s1058_s9 + $0x18] sm:$0xff] }
   0x4   :  { %v202_v13 = vld [vmem:[%s1057_s7] sm:$0xff]  ;;  %v203_v14 = vld [vmem:[%s1057_s7 + $0x8] sm:$0xff]  ;;  %v302_v18 = vld [vmem:[%s1058_s9 + $0x10] sm:$0xff] }
   0x5   :  { %v301_v15 = vld [vmem:[%s1058_s9 + $0x8] sm:$0xff]  ;;  %v300_v16 = vld [vmem:[%s1058_s9] sm:$0xff]  ;;  %v427_v22 = vld [vmem:[%s1059_s10 + $0x10] sm:$0xff] }
   0x6   :  { %v426_v19 = vld [vmem:[%s1059_s10 + $0x8] sm:$0xff]  ;;  %v425_v20 = vld [vmem:[%s1059_s10] sm:$0xff]  ;;  %v428_v23 = vld [vmem:[%s1059_s10 + $0x18] sm:$0xff] }
   0x7   :  { %v429_v21 = vld [vmem:[%s1060_s11] sm:$0xff]  ;;  %v430_v24 = vld [vmem:[%s1060_s11 + $0x8] sm:$0xff]  ;;  %v432_v25 = vld [vmem:[%s1060_s11 + $0x18] sm:$0xff] }
   0x8   :  { %v74_v1 = vld [vmem:[%s1073_s23 + $0x10] sm:$0xff]  ;;  %v72_v2 = vld [vmem:[%s1073_s23] sm:$0xff]  ;;  %v75_v3 = vld [vmem:[%s1073_s23 + $0x18] sm:$0xff] }
   0x9   :  { %88 = vperm.xlu1 %767, %v74_v1   ;;  %78 = vperm.xlu0 %766, %v72_v2   ;;  %v73_v4 = vld [vmem:[%s1073_s23 + $0x8] sm:$0xff]  ;;  %v431_v26 = vld [vmem:[%s1060_s11 + $0x10] sm:$0xff]  ;;  %v526_v28 = vld [vmem:[%s1061_s12 + $0x18] sm:$0xff] }
   0xa   :  { %v525_v27 = vld [vmem:[%s1061_s12 + $0x10] sm:$0xff]  ;;  %v524_v29 = vld [vmem:[%s1061_s12 + $0x8] sm:$0xff]  ;;  %v530_v30 = vld [vmem:[%s1062_s13 + $0x18] sm:$0xff] }
   0xb   :  { %v523_v31 = vld [vmem:[%s1061_s12] sm:$0xff]  ;;  %v529_v32 = vld [vmem:[%s1062_s13 + $0x10] sm:$0xff]  ;;  %v528_v34 = vld [vmem:[%s1062_s13 + $0x8] sm:$0xff] }
   0xc   :  { %v527_v33 = vld [vmem:[%s1062_s13] sm:$0xff]  ;;  %v61_v39 = vld [vmem:[%s1065_s1 + $0x10] sm:$0xff]  ;;  %v60_v40 = vld [vmem:[%s1065_s1 + $0x8] sm:$0xff] }
   0xd   :  { %93 = vperm.xlu1 %767, %v75_v3   ;;  %83 = vperm.xlu0 %766, %v73_v4   ;;  %v622_v35 = vld [vmem:[%s1063_s15] sm:$0xf]  ;;  %v62_v43 = vld [vmem:[%s1065_s1 + $0x18] sm:$0xff]  ;;  %v66_v44 = vmul.f32 %v63_v37, %v61_v39  ;;  %v65_v45 = vmul.f32 %v63_v37, %v60_v40  ;;  %v57_v46 = vld [vmem:[%s1067_s0 + $0x10] sm:$0xff] }
   0xe   :  { %v200_v36 = vld [vmem:[%s1064_s6] sm:$0xff]  ;;  %v56_v47 = vld [vmem:[%s1067_s0 + $0x8] sm:$0xff]  ;;  %v67_v49 = vmul.f32 %v63_v37, %v62_v43  ;;  %v58_v52 = vld [vmem:[%s1067_s0 + $0x18] sm:$0xff] }
   0xf   :  { %739 = vmatprep.mubr.msk.f32.mxu0 %vm214_vm0, %v200_v36  ;;  %v59_v38 = vld [vmem:[%s1065_s1] sm:$0xff]  ;;  %v70_v53 = vadd.f32 %v66_v44, %v57_v46  ;;  %v69_v54 = vadd.f32 %v65_v45, %v56_v47 }
  0x10   :  { %v64_v41 = vmul.f32 %v63_v37, %v59_v38  ;;  %v55_v42 = vld [vmem:[%s1067_s0] sm:$0xff]  ;;  %v71_v56 = vadd.f32 %v67_v49, %v58_v52 }
  0x11   :  { %164 = vperm.xlu1 %767, %v102_v5   ;;  %169 = vperm.xlu0 %766, %v103_v6  }
  0x12   :  { %v68_v48 = vadd.f32 %v64_v41, %v55_v42 }
  0x15   :  { %159 = vperm.xlu1 %767, %v101_v7   ;;  %193 = vperm.xlu0 %766, %v107_v8  }
  0x19   :  { %154 = vperm.xlu1 %767, %v100_v9   ;;  %188 = vperm.xlu0 %766, %v106_v10  }
  0x1d   :  { %178 = vperm.xlu1 %767, %v104_v11   ;;  %183 = vperm.xlu0 %766, %v105_v12  }
  0x21   :  { %206 = vperm.xlu1 %767, %v202_v13   ;;  %211 = vperm.xlu0 %766, %v203_v14  }
  0x25   :  { %311 = vperm.xlu1 %767, %v301_v15   ;;  %306 = vperm.xlu0 %766, %v300_v16  }
  0x29   :  { %321 = vperm.xlu1 %767, %v303_v17   ;;  %316 = vperm.xlu0 %766, %v302_v18  }
  0x2d   :  { %482 = vperm.xlu1 %767, %v426_v19   ;;  %477 = vperm.xlu0 %766, %v425_v20  }
  0x31   :  { %501 = vperm.xlu1 %767, %v429_v21   ;;  %487 = vperm.xlu0 %766, %v427_v22  }
  0x35   :  { %492 = vperm.xlu1 %767, %v428_v23   ;;  %506 = vperm.xlu0 %766, %v430_v24  }
  0x39   :  { %516 = vperm.xlu1 %767, %v432_v25   ;;  %511 = vperm.xlu0 %766, %v431_v26  }
  0x3d   :  { %585 = vperm.xlu1 %767, %v525_v27   ;;  %590 = vperm.xlu0 %766, %v526_v28  }
  0x41   :  { %580 = vperm.xlu1 %767, %v524_v29   ;;  %614 = vperm.xlu0 %766, %v530_v30  }
  0x45   :  { %575 = vperm.xlu1 %767, %v523_v31   ;;  %609 = vperm.xlu0 %766, %v529_v32  }
  0x49   :  { %599 = vperm.xlu1 %767, %v527_v33   ;;  %604 = vperm.xlu0 %766, %v528_v34  }
  0x4d   :  { %625 = vperm.xlu0 %766, %v622_v35  }
  0x84   :  { %v89_v50 = vpop.permute.xlu1 %88  ;;  %v79_v51 = vpop.permute.xlu0 %78 }
  0x85   :  { %v96_v55 = vadd.f32 %v79_v51, %v68_v48  ;;  %v98_v59 = vadd.f32 %v89_v50, %v70_v53 }
  0x87   :  { %v109_v61 = vsel %vm108_vm1, %v96_v55, 0.0  ;;  %v112_v1 = vsel %vm108_vm1, %v98_v59, 0.0 }
  0x88   :  { %v94_v57 = vpop.permute.xlu1 %93  ;;  %v84_v58 = vpop.permute.xlu0 %83 }
  0x89   :  { %v97_v60 = vadd.f32 %v84_v58, %v69_v54  ;;  %v99_v62 = vadd.f32 %v94_v57, %v71_v56  ;;  %v201_v56 = vld [vmem:[%s1064_s6 + $0x8] sm:$0xff]  ;;  %v296_v57 = vld [vmem:[%s1068_s8] sm:$0xff] }
  0x8a   :  { %746 = vmatprep.mubr.msk.f32.mxu1 %vm108_vm1, %v296_v57 }
  0x8b   :  { %v110_v63 = vsel %vm108_vm1, %v97_v60, 0.0  ;;  %v114_v3 = vsel %vm108_vm1, %v99_v62, 0.0 }
  0x8c   :  { %v111_v0 = vadd.f32 %v110_v63, %v109_v61  ;;  %v170_v35 = vpop.permute.xlu0 %169  ;;  %v165_v36 = vpop.permute.xlu1 %164 }
  0x8e   :  { %v113_v2 = vadd.f32 %v112_v1, %v111_v0  ;;  %v297_v0 = vld [vmem:[%s1068_s8 + $0x8] sm:$0xff]  ;;  %v298_v1 = vld [vmem:[%s1068_s8 + $0x10] sm:$0xff] }
  0x90   :  { %v115_v4 = vadd.f32 %v114_v3, %v113_v2  ;;  %v194_v37 = vpop.permute.xlu0 %193  ;;  %v160_v38 = vpop.permute.xlu1 %159  ;;  %v299_v2 = vld [vmem:[%s1068_s8 + $0x18] sm:$0xff]  ;;  %v775_v3 = vmov 0.0  }
  0x92   :  { %v116_v5 = vrot.slane %v115_v4, 4 }
  0x94   :  { %v117_v6 = vadd.f32 %v116_v5, %v115_v4  ;;  %v189_v43 = vpop.permute.xlu0 %188  ;;  %v155_v47 = vpop.permute.xlu1 %154 }
  0x96   :  { %v118_v7 = vrot.slane %v117_v6, 2 }
  0x98   :  { %v119_v8 = vadd.f32 %v118_v7, %v117_v6  ;;  %v184_v52 = vpop.permute.xlu0 %183  ;;  %v179_v54 = vpop.permute.xlu1 %178 }
  0x9a   :  { %v120_v9 = vrot.slane %v119_v8, 1 }
  0x9c   :  { %v121_v10 = vadd.f32 %v120_v9, %v119_v8  ;;  %v212_v58 = vpop.permute.xlu0 %211  ;;  %v207_v61 = vpop.permute.xlu1 %206 }
  0x9e   :  { %v123_v11 = vmul.f32 0.03125, %v121_v10 }
  0xa0   :  { %v124_v12 = vsub.f32 %v96_v55, %v123_v11  ;;  %v125_v13 = vsub.f32 %v97_v60, %v123_v11  ;;  %v127_v14 = vsub.f32 %v99_v62, %v123_v11  ;;  %v126_v15 = vsub.f32 %v98_v59, %v123_v11  ;;  %v312_v4 = vpop.permute.xlu1 %311  ;;  %v307_v5 = vpop.permute.xlu0 %306 }
  0xa2   :  { %v128_v16 = vmul.f32 %v124_v12, %v124_v12  ;;  %v129_v17 = vmul.f32 %v125_v13, %v125_v13  ;;  %v130_v18 = vmul.f32 %v126_v15, %v126_v15  ;;  %v131_v21 = vmul.f32 %v127_v14, %v127_v14 }
  0xa4   :  { %v132_v19 = vsel %vm108_vm1, %v128_v16, 0.0  ;;  %v133_v20 = vsel %vm108_vm1, %v129_v17, 0.0  ;;  %v135_v23 = vsel %vm108_vm1, %v130_v18, 0.0  ;;  %v137_v25 = vsel %vm108_vm1, %v131_v21, 0.0  ;;  %v322_v10 = vpop.permute.xlu1 %321 }
  0xa5   :  { %v134_v22 = vadd.f32 %v133_v20, %v132_v19 }
  0xa7   :  { %v136_v24 = vadd.f32 %v135_v23, %v134_v22 }
  0xa9   :  { %v138_v26 = vadd.f32 %v137_v25, %v136_v24 }
  0xab   :  { %v139_v27 = vrot.slane %v138_v26, 4 }
  0xad   :  { %v140_v28 = vadd.f32 %v139_v27, %v138_v26 }
  0xaf   :  { %v141_v29 = vrot.slane %v140_v28, 2 }
  0xb1   :  { %v142_v30 = vadd.f32 %v141_v29, %v140_v28 }
  0xb3   :  { %v143_v31 = vrot.slane %v142_v30, 1 }
  0xb5   :  { %v144_v32 = vadd.f32 %v143_v31, %v142_v30 }
  0xb7   :  { %v145_v33 = vmul.f32 0.03125, %v144_v32 }
  0xb9   :  { %v146_v34 = vadd.f32 1e-05, %v145_v33 }
  0xbb   :  { %768 = vrsqrt.f32 %v146_v34 }
  0xc8   :  { %v769_v39 = vpop.eup %768 }
  0xc9   :  { %v150_v40 = vmul.f32 %v769_v39, %v126_v15  ;;  %v151_v41 = vmul.f32 %v769_v39, %v127_v14  ;;  %v149_v42 = vmul.f32 %v769_v39, %v125_v13  ;;  %v148_v46 = vmul.f32 %v769_v39, %v124_v12  ;;  %v317_v15 = vpop.permute.xlu0 %316 }
  0xcb   :  { %v174_v44 = vmul.f32 %v165_v36, %v150_v40  ;;  %v175_v45 = vmul.f32 %v170_v35, %v151_v41  ;;  %v173_v48 = vmul.f32 %v160_v38, %v149_v42  ;;  %v172_v50 = vmul.f32 %v155_v47, %v148_v46 }
  0xcd   :  { %v199_v49 = vadd.f32 %v194_v37, %v175_v45  ;;  %v198_v51 = vadd.f32 %v189_v43, %v174_v44  ;;  %v197_v53 = vadd.f32 %v184_v52, %v173_v48  ;;  %v196_v55 = vadd.f32 %v179_v54, %v172_v50  ;;  %v478_v57 = vpop.permute.xlu0 %477 }
  0xcf   :  { %731 = vmatprep.subr.mxu0 %v199_v49 }
  0xd0   :  { %732 = vmatpush3.msra.mxu0 %v199_v49 }
  0xd1   :  { %733 = vmatprep.subr.mxu0 %v198_v51 }
  0xd2   :  { %734 = vmatpush3.msra.mxu0 %v198_v51 }
  0xd3   :  { %735 = vmatprep.subr.mxu0 %v197_v53 }
  0xd4   :  { %736 = vmatpush3.msra.mxu0 %v197_v53 }
  0xd5   :  { %737 = vmatprep.subr.mxu0 %v196_v55 }
  0xd6   :  { %738 = vmatpush3.msra.mxu0 %v196_v55 }
  0xd7   :  { %740 = vmatmul.mubr.msk.f32.vlgmr.msra.gmra.mxu0 %vm214_vm0, %v201_v56 }
 0x197   :  { %v741_v59 = vpop.f32.mrf.mxu0 }
 0x198   :  { %v293_v60 = vadd.f32 %v741_v59, %v212_v58  ;;  %v483_v58 = vpop.permute.xlu1 %482  ;;  %v488_v59 = vpop.permute.xlu0 %487 }
 0x199   :  { %v287_v62 = vpop.f32.mrf.mxu0 }
 0x19a   :  { %v288_v63 = vadd.f32 %v287_v62, %v207_v61  ;;  %742 = vmatprep.subr.mxu1 %v293_v60 }
 0x19b   :  { %743 = vmatpush3.msra.mxu1 %v293_v60 }
 0x19c   :  { %744 = vmatprep.subr.mxu1 %v288_v63  ;;  %v502_v60 = vpop.permute.xlu1 %501  ;;  %v507_v61 = vpop.permute.xlu0 %506 }
 0x19d   :  { %745 = vmatpush3.msra.mxu1 %v288_v63 }
 0x19e   :  { %747 = vmatmul.mubr.msk.f32.vlgmr.msra.gmra.mxu1 %vm108_vm1, %v297_v0  ;;  %752 = vmatprep.subr.mxu1 %v775_v3 }
 0x19f   :  { %749 = vmatprep.mubr.msk.f32.mxu1 %vm108_vm1, %v298_v1 }
 0x1a0   :  { %v493_v63 = vpop.permute.xlu1 %492 }
 0x1a2   :  { %750 = vmatmul.mubr.msk.f32.gmra.mxu1 %vm108_vm1, %v299_v2 }
 0x1a3   :  { %760 = vmatprep.mubr.msk.f32.mxu1 %vm776_vm2, %v775_v3 }
 0x25e   :  { %v748_v6 = vpop.f32.mrf.mxu1 }
 0x25f   :  { %v408_v7 = vadd.f32 %v748_v6, %v312_v4 }
 0x260   :  { %v402_v8 = vpop.f32.mrf.mxu1 }
 0x261   :  { %v403_v9 = vadd.f32 %v402_v8, %v307_v5  ;;  %v422_v12 = vadd.f32 %v408_v7, %v197_v53 }
 0x262   :  { %v751_v11 = vpop.f32.mrf.mxu1 }
 0x263   :  { %v421_v13 = vadd.f32 %v403_v9, %v196_v55  ;;  %v418_v14 = vadd.f32 %v751_v11, %v322_v10  ;;  %v434_v19 = vsel %vm108_vm1, %v422_v12, 0.0  ;;  %v512_v9 = vpop.permute.xlu0 %511 }
 0x264   :  { %v412_v16 = vpop.f32.mrf.mxu1 }
 0x265   :  { %v433_v17 = vsel %vm108_vm1, %v421_v13, 0.0  ;;  %v413_v18 = vadd.f32 %v412_v16, %v317_v15  ;;  %v424_v20 = vadd.f32 %v418_v14, %v199_v49 }
 0x266   :  { %v435_v22 = vadd.f32 %v434_v19, %v433_v17 }
 0x267   :  { %v423_v21 = vadd.f32 %v413_v18, %v198_v51  ;;  %v438_v25 = vsel %vm108_vm1, %v424_v20, 0.0 }
 0x269   :  { %v436_v23 = vsel %vm108_vm1, %v423_v21, 0.0 }
 0x26a   :  { %v437_v24 = vadd.f32 %v436_v23, %v435_v22 }
 0x26c   :  { %v439_v26 = vadd.f32 %v438_v25, %v437_v24 }
 0x26e   :  { %v440_v27 = vrot.slane %v439_v26, 4 }
 0x270   :  { %v441_v28 = vadd.f32 %v440_v27, %v439_v26 }
 0x272   :  { %v442_v29 = vrot.slane %v441_v28, 2 }
 0x274   :  { %v443_v30 = vadd.f32 %v442_v29, %v441_v28 }
 0x276   :  { %v444_v31 = vrot.slane %v443_v30, 1 }
 0x278   :  { %v445_v32 = vadd.f32 %v444_v31, %v443_v30 }
 0x27a   :  { %v446_v33 = vmul.f32 0.03125, %v445_v32 }
 0x27c   :  { %v447_v34 = vsub.f32 %v421_v13, %v446_v33  ;;  %v448_v35 = vsub.f32 %v422_v12, %v446_v33  ;;  %v449_v36 = vsub.f32 %v423_v21, %v446_v33  ;;  %v450_v37 = vsub.f32 %v424_v20, %v446_v33  ;;  %v517_v13 = vpop.permute.xlu1 %516 }
 0x27e   :  { %v451_v38 = vmul.f32 %v447_v34, %v447_v34  ;;  %v452_v39 = vmul.f32 %v448_v35, %v448_v35  ;;  %v453_v40 = vmul.f32 %v449_v36, %v449_v36  ;;  %v454_v41 = vmul.f32 %v450_v37, %v450_v37 }
 0x280   :  { %v455_v42 = vsel %vm108_vm1, %v451_v38, 0.0  ;;  %v456_v43 = vsel %vm108_vm1, %v452_v39, 0.0  ;;  %v458_v45 = vsel %vm108_vm1, %v453_v40, 0.0  ;;  %v460_v47 = vsel %vm108_vm1, %v454_v41, 0.0 }
 0x281   :  { %v457_v44 = vadd.f32 %v456_v43, %v455_v42 }
 0x283   :  { %v459_v46 = vadd.f32 %v458_v45, %v457_v44 }
 0x285   :  { %v461_v48 = vadd.f32 %v460_v47, %v459_v46 }
 0x287   :  { %v462_v49 = vrot.slane %v461_v48, 4 }
 0x289   :  { %v463_v50 = vadd.f32 %v462_v49, %v461_v48 }
 0x28b   :  { %v464_v51 = vrot.slane %v463_v50, 2 }
 0x28d   :  { %v465_v52 = vadd.f32 %v464_v51, %v463_v50 }
 0x28f   :  { %v466_v53 = vrot.slane %v465_v52, 1 }
 0x291   :  { %v467_v54 = vadd.f32 %v466_v53, %v465_v52  ;;  %v591_v52 = vpop.permute.xlu0 %590  ;;  %v586_v53 = vpop.permute.xlu1 %585 }
 0x293   :  { %v468_v55 = vmul.f32 0.03125, %v467_v54 }
 0x295   :  { %v469_v56 = vadd.f32 1e-05, %v468_v55  ;;  %v615_v54 = vpop.permute.xlu0 %614  ;;  %v581_v55 = vpop.permute.xlu1 %580 }
 0x297   :  { %770 = vrsqrt.f32 %v469_v56 }
 0x2a4   :  { %v771_v62 = vpop.eup %770 }
 0x2a5   :  { %v471_v0 = vmul.f32 %v771_v62, %v447_v34  ;;  %v472_v1 = vmul.f32 %v771_v62, %v448_v35  ;;  %v473_v2 = vmul.f32 %v771_v62, %v449_v36  ;;  %v474_v4 = vmul.f32 %v771_v62, %v450_v37 }
 0x2a7   :  { %v495_v5 = vmul.f32 %v478_v57, %v471_v0  ;;  %v496_v6 = vmul.f32 %v483_v58, %v472_v1  ;;  %v497_v7 = vmul.f32 %v488_v59, %v473_v2  ;;  %v498_v8 = vmul.f32 %v493_v63, %v474_v4  ;;  %v576_v0 = vpop.permute.xlu1 %575 }
 0x2a9   :  { %v519_v10 = vadd.f32 %v502_v60, %v495_v5  ;;  %v520_v11 = vadd.f32 %v507_v61, %v496_v6  ;;  %v521_v12 = vadd.f32 %v512_v9, %v497_v7  ;;  %v522_v14 = vadd.f32 %v517_v13, %v498_v8  ;;  %v610_v60 = vpop.permute.xlu0 %609 }
 0x2ab   :  { %v531_v15 = vsel %vm108_vm1, %v519_v10, 0.0  ;;  %v532_v16 = vsel %vm108_vm1, %v520_v11, 0.0  ;;  %v534_v18 = vsel %vm108_vm1, %v521_v12, 0.0  ;;  %v536_v20 = vsel %vm108_vm1, %v522_v14, 0.0  ;;  %v600_v8 = vpop.permute.xlu1 %599 }
 0x2ac   :  { %v533_v17 = vadd.f32 %v532_v16, %v531_v15 }
 0x2ad   :  { %v605_v6 = vpop.permute.xlu0 %604 }
 0x2ae   :  { %v535_v19 = vadd.f32 %v534_v18, %v533_v17 }
 0x2b0   :  { %v537_v21 = vadd.f32 %v536_v20, %v535_v19 }
 0x2b2   :  { %v538_v22 = vrot.slane %v537_v21, 4 }
 0x2b4   :  { %v539_v23 = vadd.f32 %v538_v22, %v537_v21 }
 0x2b6   :  { %v540_v24 = vrot.slane %v539_v23, 2 }
 0x2b8   :  { %v541_v25 = vadd.f32 %v540_v24, %v539_v23 }
 0x2ba   :  { %v542_v26 = vrot.slane %v541_v25, 1 }
 0x2bc   :  { %v543_v27 = vadd.f32 %v542_v26, %v541_v25 }
 0x2be   :  { %v544_v28 = vmul.f32 0.03125, %v543_v27 }
 0x2c0   :  { %v545_v29 = vsub.f32 %v519_v10, %v544_v28  ;;  %v546_v30 = vsub.f32 %v520_v11, %v544_v28  ;;  %v547_v31 = vsub.f32 %v521_v12, %v544_v28  ;;  %v548_v32 = vsub.f32 %v522_v14, %v544_v28  ;;  %v621_v10 = vld [vmem:[%s1069_s14] sm:$0xf]  ;;  %v626_v11 = vpop.permute.xlu0 %625 }
 0x2c2   :  { %v549_v33 = vmul.f32 %v545_v29, %v545_v29  ;;  %v550_v34 = vmul.f32 %v546_v30, %v546_v30  ;;  %v551_v35 = vmul.f32 %v547_v31, %v547_v31  ;;  %v552_v38 = vmul.f32 %v548_v32, %v548_v32 }
 0x2c4   :  { %v553_v36 = vsel %vm108_vm1, %v549_v33, 0.0  ;;  %v554_v37 = vsel %vm108_vm1, %v550_v34, 0.0  ;;  %v556_v40 = vsel %vm108_vm1, %v551_v35, 0.0  ;;  %v558_v42 = vsel %vm108_vm1, %v552_v38, 0.0 }
 0x2c5   :  { %v555_v39 = vadd.f32 %v554_v37, %v553_v36 }
 0x2c7   :  { %v557_v41 = vadd.f32 %v556_v40, %v555_v39 }
 0x2c9   :  { %v559_v43 = vadd.f32 %v558_v42, %v557_v41 }
 0x2cb   :  { %v560_v44 = vrot.slane %v559_v43, 4 }
 0x2cd   :  { %v561_v45 = vadd.f32 %v560_v44, %v559_v43 }
 0x2cf   :  { %v562_v46 = vrot.slane %v561_v45, 2 }
 0x2d1   :  { %v563_v47 = vadd.f32 %v562_v46, %v561_v45 }
 0x2d3   :  { %v564_v48 = vrot.slane %v563_v47, 1 }
 0x2d5   :  { %v565_v49 = vadd.f32 %v564_v48, %v563_v47 }
 0x2d7   :  { %v566_v50 = vmul.f32 0.03125, %v565_v49 }
 0x2d9   :  { %v567_v51 = vadd.f32 1e-05, %v566_v50 }
 0x2db   :  { %772 = vrsqrt.f32 %v567_v51 }
 0x2e8   :  { %v773_v56 = vpop.eup %772 }
 0x2e9   :  { %v572_v57 = vmul.f32 %v773_v56, %v548_v32  ;;  %v571_v58 = vmul.f32 %v773_v56, %v547_v31  ;;  %v570_v59 = vmul.f32 %v773_v56, %v546_v30  ;;  %v569_v63 = vmul.f32 %v773_v56, %v545_v29 }
 0x2eb   :  { %v596_v61 = vmul.f32 %v591_v52, %v572_v57  ;;  %v595_v62 = vmul.f32 %v586_v53, %v571_v58  ;;  %v594_v2 = vmul.f32 %v581_v55, %v570_v59  ;;  %v593_v5 = vmul.f32 %v576_v0, %v569_v63 }
 0x2ed   :  { %v620_v1 = vadd.f32 %v615_v54, %v596_v61  ;;  %v619_v4 = vadd.f32 %v610_v60, %v595_v62  ;;  %v618_v7 = vadd.f32 %v605_v6, %v594_v2  ;;  %v617_v9 = vadd.f32 %v600_v8, %v593_v5 }
 0x2ef   :  { %753 = vmatpush3.msra.mxu1 %v620_v1 }
 0x2f0   :  { %754 = vmatprep.subr.mxu1 %v775_v3 }
 0x2f1   :  { %755 = vmatpush3.msra.mxu1 %v619_v4 }
 0x2f2   :  { %756 = vmatprep.subr.mxu1 %v775_v3 }
 0x2f3   :  { %757 = vmatpush3.msra.mxu1 %v618_v7 }
 0x2f4   :  { %758 = vmatprep.subr.mxu1 %v775_v3 }
 0x2f5   :  { %759 = vmatpush3.msra.mxu1 %v617_v9 }
 0x2f6   :  { %761 = vmatmul.mubr.msk.f32.vlgmr.msra.gmra.mxu1 %vm214_vm0, %v621_v10 }
 0x3b6   :  { %v697_v12 = vpop.f32.mrf.mxu1 }
 0x3b7   :  { %v698_v13 = vadd.f32 %v697_v12, %v626_v11 }
 0x3b8   :  { %v762_v14 = vpop.f32.mrf.mxu1 }
 0x3b9   :  { %702 = vst.msk [vmem:[%s1070_s16] sm:$0xf] %vm701_vm3, %v698_v13 }

// kernel: trans_forward.2
= control target key start
LH: loop header
LB: loop body
LE: loop exit
PB: predicated region body
PF: predicated region fallthrough
CT: control target
= control target key end

     0   :  { %vm47_vm0 = vcmask 97280   ;;  %s12987_s15 = smov 126   ;;  %s12988_s16 = smov 127   ;;  %vm37_vm1 = vcmask 1043456   ;;  %vm354_vm2 = vcmask 261120   ;;  %v12990_v27 = vmov 0   ;;  %s15167_s0 = inlined_call_operand.vmem [shape: f32[2,4,10], index: 0, kind: input, shape index: {}]   ;;  %s15168_s1 = inlined_call_operand.vmem [shape: f32[32,12], index: 1, kind: input, shape index: {}]   ;;  %s15169_s3 = inlined_call_operand.vmem [shape: f32[96,32], index: 3, kind: input, shape index: {}]   ;;  %s15170_s2 = inlined_call_operand.vmem [shape: f32[32,8], index: 2, kind: input, shape index: {}]   ;;  %s15171_s4 = inlined_call_operand.vmem [shape: f32[96,1], index: 4, kind: input, shape index: {}]   ;;  %s15172_s7 = inlined_call_operand.vmem [shape: f32[32,16], index: 7, kind: output, shape index: {0}]   ;;  %s15173_s5 = inlined_call_operand.vmem [shape: f32[32,32], index: 5, kind: input, shape index: {}]   ;;  %s15174_s6 = inlined_call_operand.vmem [shape: f32[32,16], index: 6, kind: input, shape index: {}]   ;;  %s15175_s8 = inlined_call_operand.vmem [shape: f32[32,16], index: 8, kind: output, shape index: {1}]   ;;  %s15176_s9 = inlined_call_operand.vmem [shape: f32[16,128], index: 9, kind: output, shape index: {2}]  }
   0x1   :  { %v11692_v0 = vld [vmem:[%s15167_s0 + $0x4] sm:$0xf]  ;;  %v29_v1 = vld [vmem:[%s15167_s0] sm:$0xf]  ;;  %v40_v10 = vld [vmem:[%s15168_s1 + $0x8] sm:$0xff]  ;;  %s12989_s29 = smov 8   ;;  %12985 = vset.pattern.permute.xlu0 %v12990_v27  ;;  %12986 = vset.pattern.permute.xlu1 %v12990_v27 }
   0x2   :  { %v39_v2 = vld [vmem:[%s15168_s1] sm:$0xff]  ;;  %154 = vrot.lane.b32.xlu0 %v11692_v0, %s12987_s15  ;;  %v150_v3 = vrot.slane %v11692_v0, 4  ;;  %35 = vrot.lane.b32.xlu1 %v29_v1, %s12987_s15  ;;  %v31_v4 = vrot.slane %v29_v1, 4  ;;  %v41_v12 = vld [vmem:[%s15168_s1 + $0x10] sm:$0xff]  ;;  %vm260_vm3 = vcmask 64512   ;;  %vm265_vm4 = vcmask 130048  }
   0x3   :  { %12276 = vmatprep.mubr.msk.f32.mxu1 %vm47_vm0, %v39_v2  ;;  %12266 = vmatprep.mubr.msk.f32.mxu0 %vm47_vm0, %v39_v2  ;;  %v42_v13 = vld [vmem:[%s15168_s1 + $0x18] sm:$0xff]  ;;  %v270_v15 = vld [vmem:[%s15169_s3] sm:$0xff]  ;;  %v45_v19 = vld [vmem:[%s15170_s2 + $0x10] sm:$0xff]  ;;  %vm12993_vm5 = vmmov 0   ;;  %s12996_s27 = smov 123   ;;  %s12997_s28 = smov 124  }
   0x4   :  { %v46_v17 = vld [vmem:[%s15170_s2 + $0x18] sm:$0xff]  ;;  %v44_v21 = vld [vmem:[%s15170_s2 + $0x8] sm:$0xff]  ;;  %v43_v24 = vld [vmem:[%s15170_s2] sm:$0xff]  ;;  %s12998_s30 = smov 125   ;;  %vm2141_vm6 = vcmask 31744   ;;  %s13004_s23 = smov 32  }
   0x5   :  { %v286_v28 = vld [vmem:[%s15171_s4 + $0x20] sm:$0xff]  ;;  %v287_v29 = vld [vmem:[%s15171_s4 + $0x28] sm:$0xff]  ;;  %v289_v30 = vld [vmem:[%s15171_s4 + $0x38] sm:$0xff]  ;;  %s13005_s24 = smov 48   ;;  %s13006_s25 = smov 64   ;;  %vm11658_vm7 = vcmask 392192  }
   0x6   :  { %151 = vrot.lane.b32.xlu0 %v150_v3, %s12988_s16  ;;  %32 = vrot.lane.b32.xlu1 %v31_v4, %s12988_s16  ;;  %v288_v31 = vld [vmem:[%s15171_s4 + $0x30] sm:$0xff]  ;;  %v271_v48 = vld [vmem:[%s15169_s3 + $0x8] sm:$0xff]  ;;  %s13008_s1 = smov 96   ;;  %vm11661_vm8 = vcmask 523264   ;;  %vm11664_vm9 = vcmask 654336   ;;  %vm11667_vm10 = vcmask 785408  }
   0x7   :  { %v272_v49 = vld [vmem:[%s15169_s3 + $0x10] sm:$0xff]  ;;  %v273_v50 = vld [vmem:[%s15169_s3 + $0x18] sm:$0xff]  ;;  %v274_v51 = vld [vmem:[%s15169_s3 + $0x20] sm:$0xff]  ;;  %vm11670_vm11 = vcmask 916480  }
   0x8   :  { %v275_v52 = vld [vmem:[%s15169_s3 + $0x28] sm:$0xff]  ;;  %v276_v53 = vld [vmem:[%s15169_s3 + $0x30] sm:$0xff]  ;;  %v277_v54 = vld [vmem:[%s15169_s3 + $0x38] sm:$0xff] }
   0x9   :  { %v278_v55 = vld [vmem:[%s15169_s3 + $0x40] sm:$0xff]  ;;  %v279_v56 = vld [vmem:[%s15169_s3 + $0x48] sm:$0xff]  ;;  %v280_v57 = vld [vmem:[%s15169_s3 + $0x50] sm:$0xff] }
   0xa   :  { %v281_v58 = vld [vmem:[%s15169_s3 + $0x58] sm:$0xff]  ;;  %s12991_s3 = smov 120  }
  0x74   :  { %v155_v5 = vpop.permute.xlu0 %154  ;;  %v36_v6 = vpop.permute.xlu1 %35 }
  0x75   :  { %12272 = vmatprep.subr.msk.mxu1 %vm37_vm1, %v155_v5  ;;  %12262 = vmatprep.subr.msk.mxu0 %vm37_vm1, %v36_v6 }
  0x76   :  { %12273 = vmatpush3.msk.msra.mxu1 %vm37_vm1, %v155_v5  ;;  %12263 = vmatpush3.msk.msra.mxu0 %vm37_vm1, %v36_v6 }
  0x78   :  { %v152_v7 = vpop.permute.xlu0 %151  ;;  %v33_v8 = vpop.permute.xlu1 %32 }
  0x79   :  { %v156_v9 = vsel %vm37_vm1, %v11692_v0, %v152_v7  ;;  %v38_v11 = vsel %vm37_vm1, %v29_v1, %v33_v8 }
  0x7a   :  { %12274 = vmatprep.subr.mxu1 %v156_v9  ;;  %12264 = vmatprep.subr.mxu0 %v38_v11 }
  0x7b   :  { %12275 = vmatpush3.msra.mxu1 %v156_v9  ;;  %12265 = vmatpush3.msra.mxu0 %v38_v11 }
  0x7c   :  { %12277 = vmatmul.mubr.msk.f32.vlgmr.msra.gmra.mxu1 %vm47_vm0, %v40_v10  ;;  %12267 = vmatmul.mubr.msk.f32.vlgmr.msra.gmra.mxu0 %vm47_vm0, %v40_v10 }
  0x7d   :  { %12279 = vmatprep.mubr.msk.f32.mxu1 %vm47_vm0, %v41_v12  ;;  %12269 = vmatprep.mubr.msk.f32.mxu0 %vm47_vm0, %v41_v12 }
  0x80   :  { %12280 = vmatmul.mubr.msk.f32.gmra.mxu1 %vm47_vm0, %v42_v13  ;;  %12270 = vmatmul.mubr.msk.f32.gmra.mxu0 %vm47_vm0, %v42_v13 }
  0x81   :  { %12290 = vmatprep.mubr.msk.f32.mxu0 %vm354_vm2, %v270_v15  ;;  %v282_v15 = vld [vmem:[%s15171_s4] sm:$0xff] }
 0x13c   :  { %v12278_v14 = vpop.f32.mrf.mxu1  ;;  %v12268_v32 = vpop.f32.mrf.mxu0 }
 0x13d   :  { %v231_v25 = vadd.f32 %v12278_v14, %v44_v21  ;;  %v134_v41 = vadd.f32 %v12268_v32, %v44_v21 }
 0x13e   :  { %v225_v16 = vpop.f32.mrf.mxu1  ;;  %v128_v33 = vpop.f32.mrf.mxu0 }
 0x13f   :  { %v226_v26 = vadd.f32 %v225_v16, %v43_v24  ;;  %v129_v44 = vadd.f32 %v128_v33, %v43_v24  ;;  %v283_v16 = vld [vmem:[%s15171_s4 + $0x8] sm:$0xff] }
 0x140   :  { %v12281_v18 = vpop.f32.mrf.mxu1  ;;  %v12271_v34 = vpop.f32.mrf.mxu0 }
 0x141   :  { %v241_v20 = vadd.f32 %v12281_v18, %v46_v17  ;;  %v144_v35 = vadd.f32 %v12271_v34, %v46_v17  ;;  %v284_v17 = vld [vmem:[%s15171_s4 + $0x10] sm:$0xff]  ;;  %v290_v34 = vld [vmem:[%s15171_s4 + $0x40] sm:$0xff] }
 0x142   :  { %v235_v22 = vpop.f32.mrf.mxu1  ;;  %v138_v36 = vpop.f32.mrf.mxu0 }
 0x143   :  { %v236_v23 = vadd.f32 %v235_v22, %v45_v19  ;;  %254 = vrot.lane.b32.xlu0 %v241_v20, %s12989_s29  ;;  %v139_v38 = vadd.f32 %v138_v36, %v45_v19 }
 0x145   :  { %252 = vrot.lane.b32.xlu1 %v236_v23, %s12989_s29  ;;  %v285_v23 = vld [vmem:[%s15171_s4 + $0x18] sm:$0xff] }
 0x147   :  { %250 = vrot.lane.b32.xlu0 %v231_v25, %s12989_s29 }
 0x149   :  { %248 = vrot.lane.b32.xlu1 %v226_v26, %s12989_s29  ;;  %v293_v26 = vld [vmem:[%s15171_s4 + $0x58] sm:$0xff] }
 0x14b   :  { %316 = vperm.xlu0 %12985, %v286_v28  }
 0x14d   :  { %321 = vperm.xlu1 %12986, %v287_v29   ;;  %v291_v29 = vld [vmem:[%s15171_s4 + $0x48] sm:$0xff] }
 0x14f   :  { %331 = vperm.xlu0 %12985, %v289_v30   ;;  %v292_v30 = vld [vmem:[%s15171_s4 + $0x50] sm:$0xff]  ;;  %s12994_s4 = smov 121  }
 0x151   :  { %326 = vperm.xlu1 %12986, %v288_v31  }
 0x1b5   :  { %v255_v37 = vpop.permute.xlu0 %254 }
 0x1b6   :  { %v264_v39 = vsel %vm260_vm3, %v144_v35, %v255_v37  ;;  %v516_v35 = vld [vmem:[%s15173_s5] sm:$0xff]  ;;  %v12992_v37 = vmov 0.0  }
 0x1b7   :  { %269 = vst.msk [vmem:[%s15172_s7 + $0x18] sm:$0xff] %vm265_vm4, %v264_v39  ;;  %12282 = vmatprep.subr.mxu0 %v264_v39  ;;  %v253_v40 = vpop.permute.xlu1 %252  ;;  %12316 = vmatprep.mubr.msk.f32.mxu1 %vm354_vm2, %v516_v35 }
 0x1b8   :  { %12283 = vmatpush3.msra.mxu0 %v264_v39  ;;  %v263_v42 = vsel %vm260_vm3, %v139_v38, %v253_v40 }
 0x1b9   :  { %v251_v43 = vpop.permute.xlu0 %250  ;;  %268 = vst.msk [vmem:[%s15172_s7 + $0x10] sm:$0xff] %vm265_vm4, %v263_v42  ;;  %12284 = vmatprep.subr.mxu0 %v263_v42 }
 0x1ba   :  { %12285 = vmatpush3.msra.mxu0 %v263_v42  ;;  %v262_v45 = vsel %vm260_vm3, %v134_v41, %v251_v43 }
 0x1bb   :  { %267 = vst.msk [vmem:[%s15172_s7 + $0x8] sm:$0xff] %vm265_vm4, %v262_v45  ;;  %12286 = vmatprep.subr.mxu0 %v262_v45  ;;  %v249_v46 = vpop.permute.xlu1 %248 }
 0x1bc   :  { %12287 = vmatpush3.msra.mxu0 %v262_v45  ;;  %v261_v47 = vsel %vm260_vm3, %v129_v44, %v249_v46 }
 0x1bd   :  { %266 = vst.msk [vmem:[%s15172_s7] sm:$0xff] %vm265_vm4, %v261_v47  ;;  %12288 = vmatprep.subr.mxu0 %v261_v47 }
 0x1be   :  { %12289 = vmatpush3.msra.mxu0 %v261_v47 }
 0x1bf   :  { %12291 = vmatmul.mubr.msk.f32.vlgmr.msra.gmra.mxu0 %vm354_vm2, %v271_v48  ;;  %12342 = vmatprep.subr.mxu0 %v12992_v37 }
 0x1c0   :  { %12293 = vmatprep.mubr.msk.f32.mxu0 %vm354_vm2, %v272_v49 }
 0x1c3   :  { %12294 = vmatmul.mubr.msk.f32.gmra.mxu0 %vm354_vm2, %v273_v50 }
 0x1c4   :  { %12296 = vmatprep.mubr.msk.f32.mxu0 %vm354_vm2, %v274_v51 }
 0x1c6   :  { %v317_v0 = vpop.permute.xlu0 %316 }
 0x1c7   :  { %12297 = vmatmul.mubr.msk.f32.gmra.mxu0 %vm354_vm2, %v275_v52 }
 0x1c8   :  { %12299 = vmatprep.mubr.msk.f32.mxu0 %vm354_vm2, %v276_v53  ;;  %v322_v1 = vpop.permute.xlu1 %321 }
 0x1ca   :  { %v332_v11 = vpop.permute.xlu0 %331 }
 0x1cb   :  { %12300 = vmatmul.mubr.msk.f32.gmra.mxu0 %vm354_vm2, %v277_v54 }
 0x1cc   :  { %12302 = vmatprep.mubr.msk.f32.mxu0 %vm354_vm2, %v278_v55  ;;  %v327_v8 = vpop.permute.xlu1 %326 }
 0x1cf   :  { %12303 = vmatmul.mubr.msk.f32.gmra.mxu0 %vm354_vm2, %v279_v56 }
 0x1d0   :  { %12305 = vmatprep.mubr.msk.f32.mxu0 %vm354_vm2, %v280_v57 }
 0x1d3   :  { %12306 = vmatmul.mubr.msk.f32.gmra.mxu0 %vm354_vm2, %v281_v58 }
 0x1d4   :  { %12344 = vmatprep.mubr.msk.f32.mxu0 %vm12993_vm5, %v12992_v37 }
 0x27f   :  { %v13186_v59 = vpop.f32.mrf.mxu0 }
 0x281   :  { %v13188_v60 = vpop.f32.mrf.mxu0 }
 0x283   :  { %v13190_v61 = vpop.f32.mrf.mxu0 }
 0x285   :  { %v13192_v62 = vpop.f32.mrf.mxu0 }
 0x287   :  { %v12298_v63 = vpop.f32.mrf.mxu0 }
 0x288   :  { %v13196_v5 = vadd.f32 %v12298_v63, %v322_v1 }
 0x289   :  { %v477_v2 = vpop.f32.mrf.mxu0 }
 0x28a   :  { %v13194_v3 = vadd.f32 %v477_v2, %v317_v0  ;;  %v13210_v10 = vrot.slane %v13196_v5, 4 }
 0x28b   :  { %v12301_v4 = vpop.f32.mrf.mxu0 }
 0x28c   :  { %661 = vrot.lane.b32.xlu1 %v13194_v3, %s12991_s3  ;;  %v13201_v6 = vrot.slane %v13194_v3, 4  ;;  %v13214_v12 = vadd.f32 %v12301_v4, %v332_v11 }
 0x28d   :  { %v487_v7 = vpop.f32.mrf.mxu0 }
 0x28e   :  { %664 = vrot.lane.b32.xlu0 %v13201_v6, %s12991_s3  ;;  %v13205_v9 = vadd.f32 %v487_v7, %v327_v8  ;;  %v13226_v14 = vrot.slane %v13214_v12, 4 }
 0x290   :  { %667 = vrot.lane.b32.xlu1 %v13196_v5, %s12991_s3  ;;  %v13219_v13 = vrot.slane %v13205_v9, 4 }
 0x292   :  { %670 = vrot.lane.b32.xlu0 %v13210_v10, %s12991_s3 }
 0x294   :  { %673 = vrot.lane.b32.xlu1 %v13205_v9, %s12991_s3 }
 0x296   :  { %676 = vrot.lane.b32.xlu0 %v13219_v13, %s12991_s3 }
 0x298   :  { %679 = vrot.lane.b32.xlu1 %v13214_v12, %s12991_s3 }
 0x29a   :  { %682 = vrot.lane.b32.xlu0 %v13226_v14, %s12991_s3 }
 0x29c   :  { %685 = vrot.lane.b32.xlu1 %v13194_v3, %s12989_s29 }
 0x29e   :  { %687 = vrot.lane.b32.xlu0 %v13201_v6, %s12989_s29 }
 0x2a0   :  { %689 = vrot.lane.b32.xlu1 %v13196_v5, %s12989_s29 }
 0x2a2   :  { %691 = vrot.lane.b32.xlu0 %v13210_v10, %s12989_s29 }
 0x2a4   :  { %693 = vrot.lane.b32.xlu1 %v13205_v9, %s12989_s29 }
 0x2a6   :  { %697 = vrot.lane.b32.xlu0 %v13214_v12, %s12989_s29 }
 0x2a8   :  { %296 = vperm.xlu1 %12986, %v282_v15  }
 0x2aa   :  { %301 = vperm.xlu0 %12985, %v283_v16  }
 0x2ac   :  { %699 = vrot.lane.b32.xlu1 %v13226_v14, %s12989_s29 }
 0x2ae   :  { %695 = vrot.lane.b32.xlu0 %v13219_v13, %s12989_s29 }
 0x2b0   :  { %306 = vperm.xlu1 %12986, %v284_v17  }
 0x2fe   :  { %v13255_v18 = vpop.permute.xlu1 %661 }
 0x2ff   :  { %701 = vrot.lane.b32.xlu1 %v13255_v18, %s12989_s29 }
 0x300   :  { %v13259_v19 = vpop.permute.xlu0 %664 }
 0x302   :  { %v13261_v20 = vpop.permute.xlu1 %667 }
 0x303   :  { %705 = vrot.lane.b32.xlu0 %v13261_v20, %s12989_s29 }
 0x304   :  { %v13265_v21 = vpop.permute.xlu0 %670 }
 0x305   :  { %707 = vrot.lane.b32.xlu1 %v13265_v21, %s12989_s29 }
 0x306   :  { %v13269_v22 = vpop.permute.xlu1 %673 }
 0x307   :  { %703 = vrot.lane.b32.xlu0 %v13259_v19, %s12989_s29 }
 0x308   :  { %v13276_v24 = vpop.permute.xlu0 %676 }
 0x309   :  { %709 = vrot.lane.b32.xlu1 %v13269_v22, %s12989_s29 }
 0x30a   :  { %v13280_v25 = vpop.permute.xlu1 %679 }
 0x30b   :  { %311 = vperm.xlu0 %12985, %v285_v23  }
 0x30c   :  { %v13287_v27 = vpop.permute.xlu0 %682 }
 0x30d   :  { %713 = vrot.lane.b32.xlu1 %v13280_v25, %s12989_s29 }
 0x30e   :  { %v686_v28 = vpop.permute.xlu1 %685 }
 0x30f   :  { %711 = vrot.lane.b32.xlu0 %v13276_v24, %s12989_s29  ;;  %v13301_v33 = vsel %vm260_vm3, %v13194_v3, %v686_v28 }
 0x310   :  { %v688_v31 = vpop.permute.xlu0 %687 }
 0x311   :  { %351 = vperm.xlu1 %12986, %v293_v26   ;;  %v13321_v40 = vsel %vm260_vm3, %v13201_v6, %v688_v31  ;;  %v12304_v6 = vpop.f32.mrf.mxu0  ;;  %v519_v31 = vld [vmem:[%s15173_s5 + $0x18] sm:$0xff] }
 0x312   :  { %v690_v32 = vpop.permute.xlu1 %689 }
 0x313   :  { %715 = vrot.lane.b32.xlu0 %v13287_v27, %s12989_s29  ;;  %v13315_v38 = vsel %vm260_vm3, %v13196_v5, %v690_v32 }
 0x314   :  { %v692_v36 = vpop.permute.xlu0 %691 }
 0x315   :  { %341 = vperm.xlu1 %12986, %v291_v29   ;;  %v13335_v43 = vsel %vm260_vm3, %v13210_v10, %v692_v36  ;;  %v518_v29 = vld [vmem:[%s15173_s5 + $0x10] sm:$0xff] }
 0x316   :  { %v694_v39 = vpop.permute.xlu1 %693 }
 0x317   :  { %346 = vperm.xlu0 %12985, %v292_v30   ;;  %v13329_v41 = vsel %vm260_vm3, %v13205_v9, %v694_v39  ;;  %v497_v9 = vpop.f32.mrf.mxu0 }
 0x318   :  { %v698_v42 = vpop.permute.xlu0 %697 }
 0x319   :  { %750 = vrot.lane.b32.xlu1 %v13301_v33, %s12991_s3  ;;  %v13341_v45 = vsel %vm260_vm3, %v13214_v12, %v698_v42  ;;  %v12307_v12 = vpop.f32.mrf.mxu0 }
 0x31b   :  { %336 = vperm.xlu0 %12985, %v290_v34   ;;  %v507_v17 = vpop.f32.mrf.mxu0 }
 0x31d   :  { %904 = vrot.lane.b32.xlu1 %v13315_v38, %s12991_s3 }
 0x31f   :  { %827 = vrot.lane.b32.xlu0 %v13321_v40, %s12991_s3 }
 0x321   :  { %1058 = vrot.lane.b32.xlu1 %v13329_v41, %s12991_s3 }
 0x323   :  { %981 = vrot.lane.b32.xlu0 %v13335_v43, %s12991_s3  ;;  %v297_v44 = vpop.permute.xlu1 %296 }
 0x324   :  { %v13346_v46 = vadd.f32 %v13188_v60, %v297_v44 }
 0x325   :  { %1212 = vrot.lane.b32.xlu1 %v13341_v45, %s12991_s3  ;;  %v302_v48 = vpop.permute.xlu0 %301 }
 0x326   :  { %v13357_v50 = vadd.f32 %v13186_v59, %v302_v48  ;;  %v13360_v51 = vrot.slane %v13346_v46, 4 }
 0x327   :  { %v700_v47 = vpop.permute.xlu1 %699 }
 0x328   :  { %v13350_v49 = vsel %vm260_vm3, %v13226_v14, %v700_v47  ;;  %v13370_v54 = vrot.slane %v13357_v50, 4 }
 0x329   :  { %633 = vrot.lane.b32.xlu1 %v13346_v46, %s12991_s3  ;;  %1289 = vrot.lane.b32.xlu0 %v13350_v49, %s12991_s3  ;;  %v696_v56 = vpop.permute.xlu0 %695 }
 0x32a   :  { %v13383_v57 = vsel %vm260_vm3, %v13219_v13, %v696_v56 }
 0x32b   :  { %v307_v52 = vpop.permute.xlu1 %306 }
 0x32c   :  { %v13367_v53 = vadd.f32 %v13192_v62, %v307_v52 }
 0x32d   :  { %637 = vrot.lane.b32.xlu1 %v13357_v50, %s12991_s3  ;;  %635 = vrot.lane.b32.xlu0 %v13360_v51, %s12991_s3 }
 0x32e   :  { %v13377_v55 = vrot.slane %v13367_v53, 4 }
 0x331   :  { %639 = vrot.lane.b32.xlu0 %v13370_v54, %s12991_s3  ;;  %641 = vrot.lane.b32.xlu1 %v13367_v53, %s12991_s3 }
 0x335   :  { %643 = vrot.lane.b32.xlu0 %v13377_v55, %s12991_s3 }
 0x339   :  { %1135 = vrot.lane.b32.xlu0 %v13383_v57, %s12991_s3 }
 0x371   :  { %v702_v58 = vpop.permute.xlu1 %701 }
 0x372   :  { %v13401_v1 = vsel %vm260_vm3, %v13255_v18, %v702_v58 }
 0x375   :  { %v706_v59 = vpop.permute.xlu0 %705 }
 0x376   :  { %v13389_v60 = vsel %vm260_vm3, %v13261_v20, %v706_v59 }
 0x377   :  { %1520 = vrot.lane.b32.xlu1 %v13389_v60, %s12991_s3  ;;  %v708_v62 = vpop.permute.xlu1 %707 }
 0x378   :  { %v13395_v63 = vsel %vm260_vm3, %v13265_v21, %v708_v62 }
 0x379   :  { %v704_v0 = vpop.permute.xlu0 %703  ;;  %1597 = vrot.lane.b32.xlu0 %v13395_v63, %s12991_s3 }
 0x37a   :  { %v13407_v3 = vsel %vm260_vm3, %v13259_v19, %v704_v0 }
 0x37b   :  { %1366 = vrot.lane.b32.xlu1 %v13401_v1, %s12991_s3  ;;  %v710_v2 = vpop.permute.xlu1 %709 }
 0x37c   :  { %v13419_v7 = vsel %vm260_vm3, %v13269_v22, %v710_v2 }
 0x37d   :  { %1443 = vrot.lane.b32.xlu0 %v13407_v3, %s12991_s3 }
 0x37f   :  { %v714_v4 = vpop.permute.xlu1 %713 }
 0x380   :  { %v13413_v5 = vsel %vm260_vm3, %v13280_v25, %v714_v4 }
 0x381   :  { %1828 = vrot.lane.b32.xlu1 %v13413_v5, %s12991_s3 }
 0x385   :  { %1674 = vrot.lane.b32.xlu1 %v13419_v7, %s12991_s3 }
 0x386   :  { %v312_v8 = vpop.permute.xlu0 %311 }
 0x387   :  { %v13424_v10 = vadd.f32 %v13190_v61, %v312_v8 }
 0x389   :  { %645 = vrot.lane.b32.xlu1 %v13424_v10, %s12991_s3  ;;  %v13447_v25 = vrot.slane %v13424_v10, 4 }
 0x38a   :  { %v712_v11 = vpop.permute.xlu0 %711 }
 0x38b   :  { %v13440_v19 = vsel %vm260_vm3, %v13276_v24, %v712_v11 }
 0x38c   :  { %v352_v13 = vpop.permute.xlu1 %351 }
 0x38d   :  { %v513_v14 = vadd.f32 %v12307_v12, %v352_v13  ;;  %2148 = vrot.lane.b32.xlu1 %v13301_v33, %s12994_s4 }
 0x38e   :  { %v716_v15 = vpop.permute.xlu0 %715 }
 0x38f   :  { %v13432_v16 = vsel %vm260_vm3, %v13287_v27, %v716_v15  ;;  %12308 = vmatprep.subr.mxu1 %v513_v14  ;;  %v517_v27 = vld [vmem:[%s15173_s5 + $0x8] sm:$0xff]  ;;  %s12995_s5 = smov 122  }
 0x390   :  { %1905 = vrot.lane.b32.xlu0 %v13432_v16, %s12991_s3  ;;  %12309 = vmatpush3.msra.mxu1 %v513_v14  ;;  %v342_v61 = vpop.permute.xlu1 %341 }
 0x391   :  { %2296 = vrot.lane.b32.xlu1 %v13315_v38, %s12994_s4  ;;  %v503_v22 = vadd.f32 %v12304_v6, %v342_v61 }
 0x392   :  { %v347_v18 = vpop.permute.xlu0 %346 }
 0x393   :  { %v508_v20 = vadd.f32 %v507_v17, %v347_v18 }
 0x394   :  { %1751 = vrot.lane.b32.xlu0 %v13440_v19, %s12991_s3  ;;  %v751_v21 = vpop.permute.xlu1 %750 }
 0x395   :  { %2444 = vrot.lane.b32.xlu1 %v13329_v41, %s12994_s4  ;;  %12310 = vmatprep.subr.mxu1 %v508_v20 }
 0x396   :  { %v337_v23 = vpop.permute.xlu0 %336  ;;  %12311 = vmatpush3.msra.mxu1 %v508_v20 }
 0x397   :  { %v498_v26 = vadd.f32 %v497_v9, %v337_v23  ;;  %12312 = vmatprep.subr.mxu1 %v503_v22 }
 0x398   :  { %647 = vrot.lane.b32.xlu0 %v13447_v25, %s12991_s3  ;;  %12313 = vmatpush3.msra.mxu1 %v503_v22  ;;  %v905_v24 = vpop.permute.xlu1 %904  ;;  %s13009_s3 = smov 112  }
 0x399   :  { %2592 = vrot.lane.b32.xlu1 %v13341_v45, %s12994_s4  ;;  %12314 = vmatprep.subr.mxu1 %v498_v26 }
 0x39a   :  { %v828_v28 = vpop.permute.xlu0 %827  ;;  %12315 = vmatpush3.msra.mxu1 %v498_v26 }
 0x39b   :  { %12317 = vmatmul.mubr.msk.f32.vlgmr.msra.gmra.mxu1 %vm354_vm2, %v517_v27  ;;  %12322 = vmatprep.subr.mxu1 %v12992_v37 }
 0x39c   :  { %2222 = vrot.lane.b32.xlu0 %v13321_v40, %s12994_s4  ;;  %12323 = vmatpush3.xpose.msk.msra.mxu1 %vm260_vm3, %v751_v21  ;;  %v1059_v30 = vpop.permute.xlu1 %1058 }
 0x39d   :  { %2740 = vrot.lane.b32.xlu1 %v13401_v1, %s12994_s4  ;;  %12343 = vmatpush3.xpose.msk.msra.mxu0 %vm260_vm3, %v1059_v30 }
 0x39e   :  { %v982_v32 = vpop.permute.xlu0 %981  ;;  %12319 = vmatprep.mubr.msk.f32.mxu1 %vm354_vm2, %v518_v29  ;;  %12352 = vmatprep.subr.mxu0 %v12992_v37 }
 0x39f   :  { %12320 = vmatmul.mubr.msk.f32.gmra.mxu1 %vm354_vm2, %v519_v31  ;;  %12327 = vmatprep.subr.mxu1 %v12992_v37 }
 0x3a0   :  { %2370 = vrot.lane.b32.xlu0 %v13335_v43, %s12994_s4  ;;  %12345 = vmatmul.mubr.msk.f32.vlgmr.msra.gmra.mxu0 %vm260_vm3, %v13367_v53  ;;  %v1213_v34 = vpop.permute.xlu1 %1212 }
 0x3a1   :  { %2888 = vrot.lane.b32.xlu1 %v13389_v60, %s12994_s4  ;;  %12353 = vmatpush3.xpose.msk.msra.mxu0 %vm260_vm3, %v1213_v34 }
 0x3a2   :  { %v1290_v35 = vpop.permute.xlu0 %1289  ;;  %12324 = vmatprep.mubr.msk.f32.mxu1 %vm12993_vm5, %v12992_v37  ;;  %12354 = vmatprep.mubr.msk.f32.mxu0 %vm12993_vm5, %v12992_v37 }
 0x3a3   :  { %12325 = vmatmul.mubr.msk.f32.vlgmr.msra.gmra.mxu1 %vm260_vm3, %v13346_v46  ;;  %12362 = vmatprep.subr.mxu0 %v12992_v37 }
 0x3a4   :  { %12328 = vmatpush3.xpose.msk.msra.mxu1 %vm260_vm3, %v828_v28  ;;  %2518 = vrot.lane.b32.xlu0 %v13383_v57, %s12994_s4  ;;  %v13584_v47 = vpop.permute.xlu1 %633 }
 0x3a5   :  { %12355 = vmatmul.mubr.msk.f32.vlgmr.msra.gmra.mxu0 %vm260_vm3, %v13424_v10  ;;  %3036 = vrot.lane.b32.xlu1 %v13419_v7, %s12994_s4 }
 0x3a6   :  { %v13495_v36 = vpop.permute.xlu0 %635  ;;  %12329 = vmatprep.mubr.msk.f32.mxu1 %vm12993_vm5, %v12992_v37  ;;  %12332 = vmatprep.subr.mxu1 %v12992_v37 }
 0x3a7   :  { %12330 = vmatmul.mubr.msk.f32.vlgmr.msra.gmra.mxu1 %vm260_vm3, %v13360_v51  ;;  %12364 = vmatprep.mubr.msk.f32.mxu0 %vm12993_vm5, %v12992_v37 }
 0x3a8   :  { %12333 = vmatpush3.xpose.msk.msra.mxu1 %vm260_vm3, %v905_v24  ;;  %2666 = vrot.lane.b32.xlu0 %v13350_v49, %s12994_s4  ;;  %v13592_v48 = vpop.permute.xlu1 %637 }
 0x3a9   :  { %3184 = vrot.lane.b32.xlu1 %v13413_v5, %s12994_s4  ;;  %12334 = vmatprep.mubr.msk.f32.mxu1 %vm12993_vm5, %v12992_v37 }
 0x3aa   :  { %v13511_v39 = vpop.permute.xlu0 %639  ;;  %12337 = vmatprep.subr.mxu1 %v12992_v37 }
 0x3ab   :  { %12335 = vmatmul.mubr.msk.f32.vlgmr.msra.gmra.mxu1 %vm260_vm3, %v13357_v50 }
 0x3ac   :  { %12338 = vmatpush3.xpose.msk.msra.mxu1 %vm260_vm3, %v982_v32  ;;  %2814 = vrot.lane.b32.xlu0 %v13407_v3, %s12994_s4  ;;  %v13600_v52 = vpop.permute.xlu1 %641 }
 0x3ad   :  { %3498 = vrot.lane.b32.xlu1 %v13301_v33, %s12995_s5  ;;  %12339 = vmatprep.mubr.msk.f32.mxu1 %vm12993_vm5, %v12992_v37 }
 0x3ae   :  { %v13523_v42 = vpop.permute.xlu0 %643  ;;  %12347 = vmatprep.subr.mxu1 %v12992_v37 }
 0x3af   :  { %12340 = vmatmul.mubr.msk.f32.vlgmr.msra.gmra.mxu1 %vm260_vm3, %v13370_v54 }
 0x3b0   :  { %2962 = vrot.lane.b32.xlu0 %v13395_v63, %s12994_s4  ;;  %12349 = vmatprep.mubr.msk.f32.mxu1 %vm12993_vm5, %v12992_v37 }
 0x3b1   :  { %3646 = vrot.lane.b32.xlu1 %v13315_v38, %s12995_s5 }
 0x3b2   :  { %v1136_v44 = vpop.permute.xlu0 %1135 }
 0x3b3   :  { %12348 = vmatpush3.xpose.msk.msra.mxu1 %vm260_vm3, %v1136_v44 }
 0x3b4   :  { %3110 = vrot.lane.b32.xlu0 %v13440_v19, %s12994_s4  ;;  %12357 = vmatprep.subr.mxu1 %v12992_v37 }
 0x3b5   :  { %3794 = vrot.lane.b32.xlu1 %v13329_v41, %s12995_s5 }
 0x3b6   :  { %12350 = vmatmul.mubr.msk.f32.vlgmr.msra.gmra.mxu1 %vm260_vm3, %v13377_v55 }
 0x3b7   :  { %12358 = vmatpush3.xpose.msk.msra.mxu1 %vm260_vm3, %v1290_v35  ;;  %12359 = vmatprep.mubr.msk.f32.mxu1 %vm12993_vm5, %v12992_v37 }
 0x3b8   :  { %3258 = vrot.lane.b32.xlu0 %v13432_v16, %s12994_s4  ;;  %12367 = vmatprep.subr.mxu1 %v12992_v37 }
 0x3b9   :  { %3942 = vrot.lane.b32.xlu1 %v13341_v45, %s12995_s5 }
 0x3ba   :  { %12360 = vmatmul.mubr.msk.f32.vlgmr.msra.gmra.mxu1 %vm260_vm3, %v13447_v25 }
 0x3bb   :  { %12369 = vmatprep.mubr.msk.f32.mxu1 %vm12993_vm5, %v12992_v37 }
 0x3bc   :  { %3572 = vrot.lane.b32.xlu0 %v13321_v40, %s12995_s5 }
 0x3bd   :  { %4090 = vrot.lane.b32.xlu1 %v13401_v1, %s12995_s5 }
 0x3c0   :  { %3720 = vrot.lane.b32.xlu0 %v13335_v43, %s12995_s5 }
 0x3c1   :  { %4238 = vrot.lane.b32.xlu1 %v13389_v60, %s12995_s5 }
 0x3c4   :  { %3868 = vrot.lane.b32.xlu0 %v13383_v57, %s12995_s5 }
 0x3c5   :  { %4386 = vrot.lane.b32.xlu1 %v13419_v7, %s12995_s5 }
 0x3c8   :  { %4016 = vrot.lane.b32.xlu0 %v13350_v49, %s12995_s5 }
 0x3c9   :  { %4534 = vrot.lane.b32.xlu1 %v13413_v5, %s12995_s5 }
 0x3cc   :  { %4164 = vrot.lane.b32.xlu0 %v13407_v3, %s12995_s5 }
 0x3cd   :  { %4848 = vrot.lane.b32.xlu1 %v13301_v33, %s12996_s27 }
 0x3d0   :  { %4312 = vrot.lane.b32.xlu0 %v13395_v63, %s12995_s5 }
 0x3d1   :  { %4996 = vrot.lane.b32.xlu1 %v13315_v38, %s12996_s27 }
 0x3d4   :  { %4460 = vrot.lane.b32.xlu0 %v13440_v19, %s12995_s5 }
 0x3d5   :  { %5144 = vrot.lane.b32.xlu1 %v13329_v41, %s12996_s27 }
 0x3d8   :  { %4608 = vrot.lane.b32.xlu0 %v13432_v16, %s12995_s5 }
 0x3d9   :  { %5292 = vrot.lane.b32.xlu1 %v13341_v45, %s12996_s27 }
 0x3dc   :  { %4922 = vrot.lane.b32.xlu0 %v13321_v40, %s12996_s27 }
 0x3dd   :  { %5440 = vrot.lane.b32.xlu1 %v13401_v1, %s12996_s27 }
 0x3e0   :  { %5070 = vrot.lane.b32.xlu0 %v13335_v43, %s12996_s27 }
 0x3e1   :  { %5588 = vrot.lane.b32.xlu1 %v13389_v60, %s12996_s27 }
 0x3e4   :  { %5218 = vrot.lane.b32.xlu0 %v13383_v57, %s12996_s27 }
 0x3e5   :  { %5736 = vrot.lane.b32.xlu1 %v13419_v7, %s12996_s27 }
 0x3e8   :  { %5366 = vrot.lane.b32.xlu0 %v13350_v49, %s12996_s27 }
 0x3e9   :  { %5884 = vrot.lane.b32.xlu1 %v13413_v5, %s12996_s27  ;;  %v1521_v56 = vpop.permute.xlu1 %1520 }
 0x3eb   :  { %v1598_v58 = vpop.permute.xlu0 %1597 }
 0x3ec   :  { %5514 = vrot.lane.b32.xlu0 %v13407_v3, %s12996_s27 }
 0x3ed   :  { %6198 = vrot.lane.b32.xlu1 %v13301_v33, %s12997_s28  ;;  %v1367_v59 = vpop.permute.xlu1 %1366 }
 0x3ee   :  { %12363 = vmatpush3.xpose.msk.msra.mxu0 %vm260_vm3, %v1367_v59 }
 0x3ef   :  { %v1444_v62 = vpop.permute.xlu0 %1443  ;;  %12372 = vmatprep.subr.mxu0 %v12992_v37 }
 0x3f0   :  { %5662 = vrot.lane.b32.xlu0 %v13395_v63, %s12996_s27  ;;  %12368 = vmatpush3.xpose.msk.msra.mxu1 %vm260_vm3, %v1444_v62 }
 0x3f1   :  { %6346 = vrot.lane.b32.xlu1 %v13315_v38, %s12997_s28  ;;  %12365 = vmatmul.mubr.msk.f32.vlgmr.msra.gmra.mxu0 %vm260_vm3, %v13584_v47 }
 0x3f2   :  { %12373 = vmatpush3.xpose.msk.msra.mxu0 %vm260_vm3, %v1521_v56  ;;  %12377 = vmatprep.subr.mxu1 %v12992_v37 }
 0x3f3   :  { %12370 = vmatmul.mubr.msk.f32.vlgmr.msra.gmra.mxu1 %vm260_vm3, %v13495_v36  ;;  %v1829_v0 = vpop.permute.xlu1 %1828  ;;  %12374 = vmatprep.mubr.msk.f32.mxu0 %vm12993_vm5, %v12992_v37 }
 0x3f4   :  { %5810 = vrot.lane.b32.xlu0 %v13440_v19, %s12996_s27  ;;  %12378 = vmatpush3.xpose.msk.msra.mxu1 %vm260_vm3, %v1598_v58 }
 0x3f5   :  { %6494 = vrot.lane.b32.xlu1 %v13329_v41, %s12997_s28  ;;  %12375 = vmatmul.mubr.msk.f32.vlgmr.msra.gmra.mxu0 %vm260_vm3, %v13592_v48 }
 0x3f6   :  { %12379 = vmatprep.mubr.msk.f32.mxu1 %vm12993_vm5, %v12992_v37  ;;  %12382 = vmatprep.subr.mxu0 %v12992_v37 }
 0x3f7   :  { %12380 = vmatmul.mubr.msk.f32.vlgmr.msra.gmra.mxu1 %vm260_vm3, %v13511_v39  ;;  %v1675_v2 = vpop.permute.xlu1 %1674  ;;  %12384 = vmatprep.mubr.msk.f32.mxu0 %vm12993_vm5, %v12992_v37 }
 0x3f8   :  { %5958 = vrot.lane.b32.xlu0 %v13432_v16, %s12996_s27  ;;  %12383 = vmatpush3.xpose.msk.msra.mxu0 %vm260_vm3, %v1675_v2 }
 0x3f9   :  { %6642 = vrot.lane.b32.xlu1 %v13341_v45, %s12997_s28  ;;  %12392 = vmatprep.subr.mxu0 %v12992_v37 }
 0x3fa   :  { %12387 = vmatprep.subr.mxu1 %v12992_v37  ;;  %12389 = vmatprep.mubr.msk.f32.mxu1 %vm12993_vm5, %v12992_v37 }
 0x3fb   :  { %12385 = vmatmul.mubr.msk.f32.vlgmr.msra.gmra.mxu0 %vm260_vm3, %v13600_v52  ;;  %v13652_v4 = vpop.permute.xlu1 %645 }
 0x3fc   :  { %6272 = vrot.lane.b32.xlu0 %v13321_v40, %s12997_s28  ;;  %12393 = vmatpush3.xpose.msk.msra.mxu0 %vm260_vm3, %v1829_v0 }
 0x3fd   :  { %6790 = vrot.lane.b32.xlu1 %v13401_v1, %s12997_s28  ;;  %12394 = vmatprep.mubr.msk.f32.mxu0 %vm12993_vm5, %v12992_v37 }
 0x3fe   :  { %12402 = vmatprep.subr.mxu0 %v12992_v37 }
 0x3ff   :  { %12395 = vmatmul.mubr.msk.f32.vlgmr.msra.gmra.mxu0 %vm260_vm3, %v13652_v4  ;;  %v2149_v6 = vpop.permute.xlu1 %2148 }
 0x400   :  { %6420 = vrot.lane.b32.xlu0 %v13335_v43, %s12997_s28  ;;  %12403 = vmatpush3.xpose.msk.msra.mxu0 %vm260_vm3, %v2149_v6 }
 0x401   :  { %6938 = vrot.lane.b32.xlu1 %v13389_v60, %s12997_s28  ;;  %12404 = vmatprep.mubr.msk.f32.mxu0 %vm12993_vm5, %v12992_v37 }
 0x402   :  { %v1906_v8 = vpop.permute.xlu0 %1905  ;;  %12412 = vmatprep.subr.mxu0 %v12992_v37 }
 0x403   :  { %12405 = vmatmul.mubr.msk.f32.vlgmr.msra.gmra.mxu0 %vm260_vm3, %v13346_v46  ;;  %v2297_v9 = vpop.permute.xlu1 %2296 }
 0x404   :  { %6568 = vrot.lane.b32.xlu0 %v13383_v57, %s12997_s28  ;;  %12413 = vmatpush3.xpose.msk.msra.mxu0 %vm260_vm3, %v2297_v9 }
 0x405   :  { %7086 = vrot.lane.b32.xlu1 %v13419_v7, %s12997_s28  ;;  %12414 = vmatprep.mubr.msk.f32.mxu0 %vm12993_vm5, %v12992_v37 }
 0x406   :  { %v1752_v11 = vpop.permute.xlu0 %1751  ;;  %12422 = vmatprep.subr.mxu0 %v12992_v37 }
 0x407   :  { %12388 = vmatpush3.xpose.msk.msra.mxu1 %vm260_vm3, %v1752_v11  ;;  %12415 = vmatmul.mubr.msk.f32.vlgmr.msra.gmra.mxu0 %vm260_vm3, %v13357_v50  ;;  %v2445_v12 = vpop.permute.xlu1 %2444 }
 0x408   :  { %6716 = vrot.lane.b32.xlu0 %v13350_v49, %s12997_s28  ;;  %12423 = vmatpush3.xpose.msk.msra.mxu0 %vm260_vm3, %v2445_v12 }
 0x409   :  { %7234 = vrot.lane.b32.xlu1 %v13413_v5, %s12997_s28  ;;  %12397 = vmatprep.subr.mxu1 %v12992_v37 }
 0x40a   :  { %v13691_v13 = vpop.permute.xlu0 %647  ;;  %12390 = vmatmul.mubr.msk.f32.vlgmr.msra.gmra.mxu1 %vm260_vm3, %v13523_v42  ;;  %12424 = vmatprep.mubr.msk.f32.mxu0 %vm12993_vm5, %v12992_v37 }
 0x40b   :  { %12398 = vmatpush3.xpose.msk.msra.mxu1 %vm260_vm3, %v1906_v8  ;;  %12425 = vmatmul.mubr.msk.f32.vlgmr.msra.gmra.mxu0 %vm260_vm3, %v13367_v53  ;;  %v2593_v14 = vpop.permute.xlu1 %2592 }
 0x40c   :  { %12432 = vmatprep.subr.mxu0 %v12992_v37  ;;  %6864 = vrot.lane.b32.xlu0 %v13407_v3, %s12997_s28 }
 0x40d   :  { %12433 = vmatpush3.xpose.msk.msra.mxu0 %vm260_vm3, %v2593_v14  ;;  %7548 = vrot.lane.b32.xlu1 %v13301_v33, %s12998_s30 }
 0x40e   :  { %12399 = vmatprep.mubr.msk.f32.mxu1 %vm12993_vm5, %v12992_v37  ;;  %v2223_v15 = vpop.permute.xlu0 %2222  ;;  %12407 = vmatprep.subr.mxu1 %v12992_v37 }
 0x40f   :  { %12400 = vmatmul.mubr.msk.f32.vlgmr.msra.gmra.mxu1 %vm260_vm3, %v13691_v13  ;;  %12434 = vmatprep.mubr.msk.f32.mxu0 %vm12993_vm5, %v12992_v37  ;;  %v2741_v61 = vpop.permute.xlu1 %2740 }
 0x410   :  { %12408 = vmatpush3.xpose.msk.msra.mxu1 %vm260_vm3, %v2223_v15  ;;  %12435 = vmatmul.mubr.msk.f32.vlgmr.msra.gmra.mxu0 %vm260_vm3, %v13424_v10 }
 0x411   :  { %12442 = vmatprep.subr.mxu0 %v12992_v37  ;;  %7012 = vrot.lane.b32.xlu0 %v13395_v63, %s12997_s28 }
 0x412   :  { %12443 = vmatpush3.xpose.msk.msra.mxu0 %vm260_vm3, %v2741_v61  ;;  %7696 = vrot.lane.b32.xlu1 %v13315_v38, %s12998_s30  ;;  %v2371_v17 = vpop.permute.xlu0 %2370 }
 0x413   :  { %12409 = vmatprep.mubr.msk.f32.mxu1 %vm12993_vm5, %v12992_v37  ;;  %12417 = vmatprep.subr.mxu1 %v12992_v37  ;;  %v2889_v18 = vpop.permute.xlu1 %2888 }
 0x414   :  { %12410 = vmatmul.mubr.msk.f32.vlgmr.msra.gmra.mxu1 %vm260_vm3, %v13360_v51  ;;  %12444 = vmatprep.mubr.msk.f32.mxu0 %vm12993_vm5, %v12992_v37 }
 0x415   :  { %12418 = vmatpush3.xpose.msk.msra.mxu1 %vm260_vm3, %v2371_v17  ;;  %12445 = vmatmul.mubr.msk.f32.vlgmr.msra.gmra.mxu0 %vm260_vm3, %v13584_v47 }
 0x416   :  { %12452 = vmatprep.subr.mxu0 %v12992_v37  ;;  %7160 = vrot.lane.b32.xlu0 %v13440_v19, %s12997_s28  ;;  %v2519_v20 = vpop.permute.xlu0 %2518 }
 0x417   :  { %12453 = vmatpush3.xpose.msk.msra.mxu0 %vm260_vm3, %v2889_v18  ;;  %7844 = vrot.lane.b32.xlu1 %v13329_v41, %s12998_s30  ;;  %v3037_v21 = vpop.permute.xlu1 %3036 }
 0x418   :  { %12419 = vmatprep.mubr.msk.f32.mxu1 %vm12993_vm5, %v12992_v37  ;;  %12427 = vmatprep.subr.mxu1 %v12992_v37 }
 0x419   :  { %12420 = vmatmul.mubr.msk.f32.vlgmr.msra.gmra.mxu1 %vm260_vm3, %v13370_v54  ;;  %12454 = vmatprep.mubr.msk.f32.mxu0 %vm12993_vm5, %v12992_v37 }
 0x41a   :  { %12428 = vmatpush3.xpose.msk.msra.mxu1 %vm260_vm3, %v2519_v20  ;;  %12455 = vmatmul.mubr.msk.f32.vlgmr.msra.gmra.mxu0 %vm260_vm3, %v13592_v48  ;;  %v2667_v22 = vpop.permute.xlu0 %2666 }
 0x41b   :  { %12462 = vmatprep.subr.mxu0 %v12992_v37  ;;  %7308 = vrot.lane.b32.xlu0 %v13432_v16, %s12997_s28  ;;  %v3185_v23 = vpop.permute.xlu1 %3184 }
 0x41c   :  { %12463 = vmatpush3.xpose.msk.msra.mxu0 %vm260_vm3, %v3037_v21  ;;  %7992 = vrot.lane.b32.xlu1 %v13341_v45, %s12998_s30 }
 0x41d   :  { %12429 = vmatprep.mubr.msk.f32.mxu1 %vm12993_vm5, %v12992_v37  ;;  %12437 = vmatprep.subr.mxu1 %v12992_v37 }
 0x41e   :  { %12430 = vmatmul.mubr.msk.f32.vlgmr.msra.gmra.mxu1 %vm260_vm3, %v13377_v55  ;;  %12464 = vmatprep.mubr.msk.f32.mxu0 %vm12993_vm5, %v12992_v37  ;;  %v2815_v26 = vpop.permute.xlu0 %2814 }
 0x41f   :  { %12438 = vmatpush3.xpose.msk.msra.mxu1 %vm260_vm3, %v2667_v22  ;;  %12465 = vmatmul.mubr.msk.f32.vlgmr.msra.gmra.mxu0 %vm260_vm3, %v13600_v52  ;;  %v3499_v24 = vpop.permute.xlu1 %3498 }
 0x420   :  { %12472 = vmatprep.subr.mxu0 %v12992_v37  ;;  %7622 = vrot.lane.b32.xlu0 %v13321_v40, %s12998_s30 }
 0x421   :  { %12473 = vmatpush3.xpose.msk.msra.mxu0 %vm260_vm3, %v3185_v23  ;;  %8140 = vrot.lane.b32.xlu1 %v13401_v1, %s12998_s30  ;;  %v521_v23 = vld [vmem:[%s15174_s6 + $0x8] sm:$0xff] }
 0x422   :  { %12439 = vmatprep.mubr.msk.f32.mxu1 %vm12993_vm5, %v12992_v37  ;;  %12447 = vmatprep.subr.mxu1 %v12992_v37  ;;  %v2963_v27 = vpop.permute.xlu0 %2962 }
 0x423   :  { %12440 = vmatmul.mubr.msk.f32.vlgmr.msra.gmra.mxu1 %vm260_vm3, %v13447_v25  ;;  %12474 = vmatprep.mubr.msk.f32.mxu0 %vm12993_vm5, %v12992_v37  ;;  %v3647_v28 = vpop.permute.xlu1 %3646 }
 0x424   :  { %12448 = vmatpush3.xpose.msk.msra.mxu1 %vm260_vm3, %v2815_v26  ;;  %12475 = vmatmul.mubr.msk.f32.vlgmr.msra.gmra.mxu0 %vm260_vm3, %v13652_v4 }
 0x425   :  { %12482 = vmatprep.subr.mxu0 %v12992_v37  ;;  %7770 = vrot.lane.b32.xlu0 %v13335_v43, %s12998_s30 }
 0x426   :  { %12483 = vmatpush3.xpose.msk.msra.mxu0 %vm260_vm3, %v3499_v24  ;;  %8288 = vrot.lane.b32.xlu1 %v13389_v60, %s12998_s30  ;;  %v3111_v29 = vpop.permute.xlu0 %3110 }
 0x427   :  { %12449 = vmatprep.mubr.msk.f32.mxu1 %vm12993_vm5, %v12992_v37  ;;  %12457 = vmatprep.subr.mxu1 %v12992_v37  ;;  %v3795_v30 = vpop.permute.xlu1 %3794 }
 0x428   :  { %12450 = vmatmul.mubr.msk.f32.vlgmr.msra.gmra.mxu1 %vm260_vm3, %v13495_v36  ;;  %12484 = vmatprep.mubr.msk.f32.mxu0 %vm12993_vm5, %v12992_v37 }
 0x429   :  { %12458 = vmatpush3.xpose.msk.msra.mxu1 %vm260_vm3, %v2963_v27  ;;  %12485 = vmatmul.mubr.msk.f32.vlgmr.msra.gmra.mxu0 %vm260_vm3, %v13346_v46 }
 0x42a   :  { %12492 = vmatprep.subr.mxu0 %v12992_v37  ;;  %7918 = vrot.lane.b32.xlu0 %v13383_v57, %s12998_s30  ;;  %v3259_v31 = vpop.permute.xlu0 %3258 }
 0x42b   :  { %12493 = vmatpush3.xpose.msk.msra.mxu0 %vm260_vm3, %v3647_v28  ;;  %12459 = vmatprep.mubr.msk.f32.mxu1 %vm12993_vm5, %v12992_v37  ;;  %v3943_v32 = vpop.permute.xlu1 %3942  ;;  %v520_v28 = vld [vmem:[%s15174_s6] sm:$0xff] }
 0x42c   :  { %8436 = vrot.lane.b32.xlu1 %v13419_v7, %s12998_s30  ;;  %12460 = vmatmul.mubr.msk.f32.vlgmr.msra.gmra.mxu1 %vm260_vm3, %v13511_v39 }
 0x42d   :  { %12467 = vmatprep.subr.mxu1 %v12992_v37  ;;  %12494 = vmatprep.mubr.msk.f32.mxu0 %vm12993_vm5, %v12992_v37 }
 0x42e   :  { %12468 = vmatpush3.xpose.msk.msra.mxu1 %vm260_vm3, %v3111_v29  ;;  %12495 = vmatmul.mubr.msk.f32.vlgmr.msra.gmra.mxu0 %vm260_vm3, %v13357_v50  ;;  %v3573_v34 = vpop.permute.xlu0 %3572 }
 0x42f   :  { %12502 = vmatprep.subr.mxu0 %v12992_v37  ;;  %8066 = vrot.lane.b32.xlu0 %v13350_v49, %s12998_s30  ;;  %v4091_v35 = vpop.permute.xlu1 %4090 }
 0x430   :  { %12503 = vmatpush3.xpose.msk.msra.mxu0 %vm260_vm3, %v3795_v30  ;;  %12469 = vmatprep.mubr.msk.f32.mxu1 %vm12993_vm5, %v12992_v37 }
 0x431   :  { %8584 = vrot.lane.b32.xlu1 %v13413_v5, %s12998_s30  ;;  %12470 = vmatmul.mubr.msk.f32.vlgmr.msra.gmra.mxu1 %vm260_vm3, %v13523_v42 }
 0x432   :  { %12477 = vmatprep.subr.mxu1 %v12992_v37  ;;  %12504 = vmatprep.mubr.msk.f32.mxu0 %vm12993_vm5, %v12992_v37  ;;  %v3721_v44 = vpop.permute.xlu0 %3720 }
 0x433   :  { %12478 = vmatpush3.xpose.msk.msra.mxu1 %vm260_vm3, %v3259_v31  ;;  %12505 = vmatmul.mubr.msk.f32.vlgmr.msra.gmra.mxu0 %vm260_vm3, %v13367_v53  ;;  %v4239_v56 = vpop.permute.xlu1 %4238  ;;  %v523_v31 = vld [vmem:[%s15174_s6 + $0x18] sm:$0xff] }
 0x434   :  { %12512 = vmatprep.subr.mxu0 %v12992_v37  ;;  %8214 = vrot.lane.b32.xlu0 %v13407_v3, %s12998_s30 }
 0x435   :  { %12513 = vmatpush3.xpose.msk.msra.mxu0 %vm260_vm3, %v3943_v32  ;;  %12479 = vmatprep.mubr.msk.f32.mxu1 %vm12993_vm5, %v12992_v37 }
 0x436   :  { %8898 = vrot.lane.b32.xlu1 %v13301_v33, %s12987_s15  ;;  %12480 = vmatmul.mubr.msk.f32.vlgmr.msra.gmra.mxu1 %vm260_vm3, %v13691_v13  ;;  %v3869_v58 = vpop.permute.xlu0 %3868 }
 0x437   :  { %12487 = vmatprep.subr.mxu1 %v12992_v37  ;;  %12514 = vmatprep.mubr.msk.f32.mxu0 %vm12993_vm5, %v12992_v37  ;;  %v4387_v59 = vpop.permute.xlu1 %4386 }
 0x438   :  { %12488 = vmatpush3.xpose.msk.msra.mxu1 %vm260_vm3, %v3573_v34  ;;  %12515 = vmatmul.mubr.msk.f32.vlgmr.msra.gmra.mxu0 %vm260_vm3, %v13424_v10 }
 0x439   :  { %12522 = vmatprep.subr.mxu0 %v12992_v37  ;;  %8362 = vrot.lane.b32.xlu0 %v13395_v63, %s12998_s30 }
 0x43a   :  { %12523 = vmatpush3.xpose.msk.msra.mxu0 %vm260_vm3, %v4091_v35  ;;  %12489 = vmatprep.mubr.msk.f32.mxu1 %vm12993_vm5, %v12992_v37  ;;  %v4017_v62 = vpop.permute.xlu0 %4016 }
 0x43b   :  { %9046 = vrot.lane.b32.xlu1 %v13315_v38, %s12987_s15  ;;  %12490 = vmatmul.mubr.msk.f32.vlgmr.msra.gmra.mxu1 %vm260_vm3, %v13360_v51  ;;  %v4535_v0 = vpop.permute.xlu1 %4534 }
 0x43c   :  { %12497 = vmatprep.subr.mxu1 %v12992_v37  ;;  %12524 = vmatprep.mubr.msk.f32.mxu0 %vm12993_vm5, %v12992_v37 }
 0x43d   :  { %12498 = vmatpush3.xpose.msk.msra.mxu1 %vm260_vm3, %v3721_v44  ;;  %12525 = vmatmul.mubr.msk.f32.vlgmr.msra.gmra.mxu0 %vm260_vm3, %v13584_v47 }
 0x43e   :  { %12532 = vmatprep.subr.mxu0 %v12992_v37  ;;  %8510 = vrot.lane.b32.xlu0 %v13440_v19, %s12998_s30  ;;  %v4165_v2 = vpop.permute.xlu0 %4164 }
 0x43f   :  { %12533 = vmatpush3.xpose.msk.msra.mxu0 %vm260_vm3, %v4239_v56  ;;  %12499 = vmatprep.mubr.msk.f32.mxu1 %vm12993_vm5, %v12992_v37  ;;  %v4849_v6 = vpop.permute.xlu1 %4848 }
 0x440   :  { %9194 = vrot.lane.b32.xlu1 %v13329_v41, %s12987_s15  ;;  %12500 = vmatmul.mubr.msk.f32.vlgmr.msra.gmra.mxu1 %vm260_vm3, %v13370_v54 }
 0x441   :  { %12507 = vmatprep.subr.mxu1 %v12992_v37  ;;  %12534 = vmatprep.mubr.msk.f32.mxu0 %vm12993_vm5, %v12992_v37 }
 0x442   :  { %12508 = vmatpush3.xpose.msk.msra.mxu1 %vm260_vm3, %v3869_v58  ;;  %12535 = vmatmul.mubr.msk.f32.vlgmr.msra.gmra.mxu0 %vm260_vm3, %v13592_v48  ;;  %v4313_v8 = vpop.permute.xlu0 %4312 }
 0x443   :  { %12542 = vmatprep.subr.mxu0 %v12992_v37  ;;  %8658 = vrot.lane.b32.xlu0 %v13432_v16, %s12998_s30  ;;  %v4997_v9 = vpop.permute.xlu1 %4996 }
 0x444   :  { %12543 = vmatpush3.xpose.msk.msra.mxu0 %vm260_vm3, %v4387_v59  ;;  %12509 = vmatprep.mubr.msk.f32.mxu1 %vm12993_vm5, %v12992_v37 }
 0x445   :  { %9342 = vrot.lane.b32.xlu1 %v13341_v45, %s12987_s15  ;;  %12510 = vmatmul.mubr.msk.f32.vlgmr.msra.gmra.mxu1 %vm260_vm3, %v13377_v55 }
 0x446   :  { %12517 = vmatprep.subr.mxu1 %v12992_v37  ;;  %12544 = vmatprep.mubr.msk.f32.mxu0 %vm12993_vm5, %v12992_v37  ;;  %v4461_v11 = vpop.permute.xlu0 %4460 }
 0x447   :  { %12518 = vmatpush3.xpose.msk.msra.mxu1 %vm260_vm3, %v4017_v62  ;;  %12545 = vmatmul.mubr.msk.f32.vlgmr.msra.gmra.mxu0 %vm260_vm3, %v13600_v52  ;;  %v5145_v12 = vpop.permute.xlu1 %5144 }
 0x448   :  { %12552 = vmatprep.subr.mxu0 %v12992_v37  ;;  %8972 = vrot.lane.b32.xlu0 %v13321_v40, %s12987_s15 }
 0x449   :  { %12553 = vmatpush3.xpose.msk.msra.mxu0 %vm260_vm3, %v4535_v0  ;;  %12519 = vmatprep.mubr.msk.f32.mxu1 %vm12993_vm5, %v12992_v37 }
 0x44a   :  { %9490 = vrot.lane.b32.xlu1 %v13401_v1, %s12987_s15  ;;  %12520 = vmatmul.mubr.msk.f32.vlgmr.msra.gmra.mxu1 %vm260_vm3, %v13447_v25  ;;  %v4609_v14 = vpop.permute.xlu0 %4608 }
 0x44b   :  { %12527 = vmatprep.subr.mxu1 %v12992_v37  ;;  %12554 = vmatprep.mubr.msk.f32.mxu0 %vm12993_vm5, %v12992_v37  ;;  %v5293_v15 = vpop.permute.xlu1 %5292 }
 0x44c   :  { %12528 = vmatpush3.xpose.msk.msra.mxu1 %vm260_vm3, %v4165_v2  ;;  %12555 = vmatmul.mubr.msk.f32.vlgmr.msra.gmra.mxu0 %vm260_vm3, %v13652_v4 }
 0x44d   :  { %12562 = vmatprep.subr.mxu0 %v12992_v37  ;;  %9120 = vrot.lane.b32.xlu0 %v13335_v43, %s12987_s15 }
 0x44e   :  { %12563 = vmatpush3.xpose.msk.msra.mxu0 %vm260_vm3, %v4849_v6  ;;  %12529 = vmatprep.mubr.msk.f32.mxu1 %vm12993_vm5, %v12992_v37  ;;  %v4923_v61 = vpop.permute.xlu0 %4922 }
 0x44f   :  { %9638 = vrot.lane.b32.xlu1 %v13389_v60, %s12987_s15  ;;  %12530 = vmatmul.mubr.msk.f32.vlgmr.msra.gmra.mxu1 %vm260_vm3, %v13495_v36  ;;  %v5441_v17 = vpop.permute.xlu1 %5440 }
 0x450   :  { %12537 = vmatprep.subr.mxu1 %v12992_v37  ;;  %12564 = vmatprep.mubr.msk.f32.mxu0 %vm12993_vm5, %v12992_v37 }
 0x451   :  { %12538 = vmatpush3.xpose.msk.msra.mxu1 %vm260_vm3, %v4313_v8  ;;  %12565 = vmatmul.mubr.msk.f32.vlgmr.msra.gmra.mxu0 %vm260_vm3, %v13346_v46 }
 0x452   :  { %12572 = vmatprep.subr.mxu0 %v12992_v37  ;;  %9268 = vrot.lane.b32.xlu0 %v13383_v57, %s12987_s15  ;;  %v13927_v18 = vpop.permute.xlu0 %5070 }
 0x453   :  { %12573 = vmatpush3.xpose.msk.msra.mxu0 %vm260_vm3, %v4997_v9  ;;  %12539 = vmatprep.mubr.msk.f32.mxu1 %vm12993_vm5, %v12992_v37  ;;  %v13932_v20 = vpop.permute.xlu1 %5588 }
 0x454   :  { %9786 = vrot.lane.b32.xlu1 %v13419_v7, %s12987_s15  ;;  %12540 = vmatmul.mubr.msk.f32.vlgmr.msra.gmra.mxu1 %vm260_vm3, %v13511_v39 }
 0x455   :  { %12547 = vmatprep.subr.mxu1 %v12992_v37  ;;  %12574 = vmatprep.mubr.msk.f32.mxu0 %vm12993_vm5, %v12992_v37 }
 0x456   :  { %12548 = vmatpush3.xpose.msk.msra.mxu1 %vm260_vm3, %v4461_v11  ;;  %12575 = vmatmul.mubr.msk.f32.vlgmr.msra.gmra.mxu0 %vm260_vm3, %v13357_v50  ;;  %v13944_v21 = vpop.permute.xlu0 %5218 }
 0x457   :  { %12582 = vmatprep.subr.mxu0 %v12992_v37  ;;  %9416 = vrot.lane.b32.xlu0 %v13350_v49, %s12987_s15  ;;  %v13949_v22 = vpop.permute.xlu1 %5736 }
 0x458   :  { %12583 = vmatpush3.xpose.msk.msra.mxu0 %vm260_vm3, %v5145_v12  ;;  %12549 = vmatprep.mubr.msk.f32.mxu1 %vm12993_vm5, %v12992_v37 }
 0x459   :  { %9934 = vrot.lane.b32.xlu1 %v13413_v5, %s12987_s15  ;;  %12550 = vmatmul.mubr.msk.f32.vlgmr.msra.gmra.mxu1 %vm260_vm3, %v13523_v42 }
 0x45a   :  { %12557 = vmatprep.subr.mxu1 %v12992_v37  ;;  %12584 = vmatprep.mubr.msk.f32.mxu0 %vm12993_vm5, %v12992_v37  ;;  %v13964_v26 = vpop.permute.xlu0 %5366 }
 0x45b   :  { %12558 = vmatpush3.xpose.msk.msra.mxu1 %vm260_vm3, %v4609_v14  ;;  %12585 = vmatmul.mubr.msk.f32.vlgmr.msra.gmra.mxu0 %vm260_vm3, %v13367_v53  ;;  %v12318_v24 = vpop.f32.mrf.mxu1  ;;  %v13969_v27 = vpop.permute.xlu1 %5884 }
 0x45c   :  { %12592 = vmatprep.subr.mxu0 %v12992_v37  ;;  %9564 = vrot.lane.b32.xlu0 %v13407_v3, %s12987_s15  ;;  %v608_v29 = vadd.f32 %v12318_v24, %v521_v23 }
 0x45d   :  { %12593 = vmatpush3.xpose.msk.msra.mxu0 %vm260_vm3, %v5293_v15  ;;  %12559 = vmatprep.mubr.msk.f32.mxu1 %vm12993_vm5, %v12992_v37  ;;  %v602_v30 = vpop.f32.mrf.mxu1 }
 0x45e   :  { %10248 = vrot.lane.b32.xlu1 %v13301_v33, %s12988_s16  ;;  %12560 = vmatmul.mubr.msk.f32.vlgmr.msra.gmra.mxu1 %vm260_vm3, %v13691_v13  ;;  %622 = vst.msk [vmem:[%s15175_s8 + $0x8] sm:$0xff] %vm265_vm4, %v608_v29  ;;  %v603_v32 = vadd.f32 %v602_v30, %v520_v28  ;;  %v13991_v34 = vpop.permute.xlu0 %5514  ;;  %v522_v33 = vld [vmem:[%s15174_s6 + $0x10] sm:$0xff] }
 0x45f   :  { %12567 = vmatprep.subr.mxu1 %v12992_v37  ;;  %12594 = vmatprep.mubr.msk.f32.mxu0 %vm12993_vm5, %v12992_v37  ;;  %v12321_v35 = vpop.f32.mrf.mxu1  ;;  %v13996_v44 = vpop.permute.xlu1 %6198 }
 0x460   :  { %12568 = vmatpush3.xpose.msk.msra.mxu1 %vm260_vm3, %v4923_v61  ;;  %12595 = vmatmul.mubr.msk.f32.vlgmr.msra.gmra.mxu0 %vm260_vm3, %v13424_v10  ;;  %621 = vst.msk [vmem:[%s15175_s8] sm:$0xff] %vm265_vm4, %v603_v32  ;;  %v618_v56 = vadd.f32 %v12321_v35, %v523_v31  ;;  %v14008_v58 = vpop.f32.mrf.mxu0  ;;  %v12999_v61 = vmov 1983009808  }
 0x461   :  { %12602 = vmatprep.subr.mxu0 %v12992_v37  ;;  %9712 = vrot.lane.b32.xlu0 %v13395_v63, %s12987_s15  ;;  %v612_v59 = vpop.f32.mrf.mxu1 }
 0x462   :  { %12603 = vmatpush3.xpose.msk.msra.mxu0 %vm260_vm3, %v5441_v17  ;;  %12569 = vmatprep.mubr.msk.f32.mxu1 %vm12993_vm5, %v12992_v37  ;;  %624 = vst.msk [vmem:[%s15175_s8 + $0x18] sm:$0xff] %vm265_vm4, %v618_v56  ;;  %v613_v62 = vadd.f32 %v612_v59, %v522_v33  ;;  %v14020_v0 = vpop.permute.xlu0 %5662  ;;  %v12346_v2 = vpop.f32.mrf.mxu0  ;;  %v1983_v17 = vunpack.c.l.s4 %v12999_v61 }
 0x463   :  { %10396 = vrot.lane.b32.xlu1 %v13315_v38, %s12988_s16  ;;  %12570 = vmatmul.mubr.msk.f32.vlgmr.msra.gmra.mxu1 %vm260_vm3, %v13360_v51  ;;  %v822_v6 = vpop.f32.mrf.mxu1  ;;  %v14026_v8 = vpop.permute.xlu1 %6346 }
 0x464   :  { %12577 = vmatprep.subr.mxu1 %v12992_v37  ;;  %12604 = vmatprep.mubr.msk.f32.mxu0 %vm12993_vm5, %v12992_v37  ;;  %623 = vst.msk [vmem:[%s15175_s8 + $0x10] sm:$0xff] %vm265_vm4, %v613_v62  ;;  %v1984_v28 = vunpack.c.0.s8 %v1983_v17  ;;  %v13000_v62 = vmov 1934713408   ;;  %s13001_s8 = smov 4  }
 0x465   :  { %12578 = vmatpush3.xpose.msk.msra.mxu1 %vm260_vm3, %v13927_v18  ;;  %12605 = vmatmul.mubr.msk.f32.vlgmr.msra.gmra.mxu0 %vm260_vm3, %v13584_v47  ;;  %v14039_v38 = vpop.f32.mrf.mxu0  ;;  %v12326_v9 = vpop.f32.mrf.mxu1  ;;  %v1985_v18 = vlaneseq  ;;  %v2016_v2 = vunpack.c.l.s4 %v13000_v62 }
 0x466   :  { %12612 = vmatprep.subr.mxu0 %v12992_v37  ;;  %9860 = vrot.lane.b32.xlu0 %v13440_v19, %s12987_s15  ;;  %v1997_v11 = vcombine.low %v14008_v58, %v14039_v38  ;;  %v14046_v12 = vpop.permute.xlu0 %5810 }
 0x467   :  { %12613 = vmatpush3.xpose.msk.msra.mxu0 %vm260_vm3, %v13932_v20  ;;  %12579 = vmatprep.mubr.msk.f32.mxu1 %vm12993_vm5, %v12992_v37  ;;  %v12356_v14 = vpop.f32.mrf.mxu0  ;;  %v899_v15 = vpop.f32.mrf.mxu1  ;;  %v1986_v29 = vshrl.u32 %v1985_v18, 7 }
 0x468   :  { %10544 = vrot.lane.b32.xlu1 %v13329_v41, %s12988_s16  ;;  %12580 = vmatmul.mubr.msk.f32.vlgmr.msra.gmra.mxu1 %vm260_vm3, %v13370_v54  ;;  %v14056_v23 = vpop.permute.xlu1 %6494 }
 0x469   :  { %12587 = vmatprep.subr.mxu1 %v12992_v37  ;;  %12614 = vmatprep.mubr.msk.f32.mxu0 %vm12993_vm5, %v12992_v37  ;;  %v12331_v20 = vpop.f32.mrf.mxu1 }
 0x46a   :  { %12588 = vmatpush3.xpose.msk.msra.mxu1 %vm260_vm3, %v13944_v21  ;;  %12615 = vmatmul.mubr.msk.f32.vlgmr.msra.gmra.mxu0 %vm260_vm3, %v13592_v48  ;;  %v14065_v41 = vpop.permute.xlu0 %5958 }
 0x46b   :  { %12622 = vmatprep.subr.mxu0 %v12992_v37  ;;  %10008 = vrot.lane.b32.xlu0 %v13432_v16, %s12987_s15  ;;  %v976_v24 = vpop.f32.mrf.mxu1  ;;  %s13002_s15 = smov 12  }
 0x46c   :  { %12623 = vmatpush3.xpose.msk.msra.mxu0 %vm260_vm3, %v13949_v22  ;;  %12589 = vmatprep.mubr.msk.f32.mxu1 %vm12993_vm5, %v12992_v37  ;;  %v1981_v21 = vcombine.low %v822_v6, %v976_v24  ;;  %v14074_v30 = vpop.permute.xlu1 %6642 }
 0x46d   :  { %10692 = vrot.lane.b32.xlu1 %v13341_v45, %s12988_s16  ;;  %12590 = vmatmul.mubr.msk.f32.vlgmr.msra.gmra.mxu1 %vm260_vm3, %v13377_v55  ;;  %v12336_v31 = vpop.f32.mrf.mxu1  ;;  %v14092_v45 = vsub.s32 %v1984_v28, %v1986_v29 }
 0x46e   :  { %12597 = vmatprep.subr.mxu1 %v12992_v37  ;;  %12624 = vmatprep.mubr.msk.f32.mxu0 %vm12993_vm5, %v12992_v37  ;;  %v14083_v22 = vpop.permute.xlu0 %6272 }
 0x46f   :  { %12598 = vmatpush3.xpose.msk.msra.mxu1 %vm260_vm3, %v13964_v26  ;;  %12625 = vmatmul.mubr.msk.f32.vlgmr.msra.gmra.mxu0 %vm260_vm3, %v13600_v52  ;;  %v1053_v32 = vpop.f32.mrf.mxu1 }
 0x470   :  { %12632 = vmatprep.subr.mxu0 %v12992_v37  ;;  %10322 = vrot.lane.b32.xlu0 %v13321_v40, %s12988_s16  ;;  %v1989_v35 = vcombine.low %v899_v15, %v1053_v32  ;;  %v14094_v33 = vpop.permute.xlu1 %6790  ;;  %v1988_v40 = vrot.slane %v1981_v21, %v14092_v45 }
 0x471   :  { %12633 = vmatpush3.xpose.msk.msra.mxu0 %vm260_vm3, %v13969_v27  ;;  %12599 = vmatprep.mubr.msk.f32.mxu1 %vm12993_vm5, %v12992_v37  ;;  %v12341_v26 = vpop.f32.mrf.mxu1 }
 0x472   :  { %10840 = vrot.lane.b32.xlu1 %v13401_v1, %s12988_s16  ;;  %12600 = vmatmul.mubr.msk.f32.vlgmr.msra.gmra.mxu1 %vm260_vm3, %v13447_v25  ;;  %v1996_v56 = vrot.slane %v1989_v35, %v14092_v45  ;;  %v14106_v59 = vpop.permute.xlu0 %6420 }
 0x473   :  { %12607 = vmatprep.subr.mxu1 %v12992_v37  ;;  %12634 = vmatprep.mubr.msk.f32.mxu0 %vm12993_vm5, %v12992_v37 }
 0x474   :  { %12608 = vmatpush3.xpose.msk.msra.mxu1 %vm260_vm3, %v13991_v34  ;;  %12635 = vmatmul.mubr.msk.f32.vlgmr.msra.gmra.mxu0 %vm260_vm3, %v13652_v4  ;;  %v2013_v1 = vcombine.low %v1988_v40, %v1996_v56  ;;  %v2014_v27 = vcombine.high %v1988_v40, %v1996_v56  ;;  %v14115_v6 = vpop.permute.xlu1 %6938 }
 0x475   :  { %12642 = vmatprep.subr.mxu0 %v12992_v37  ;;  %10470 = vrot.lane.b32.xlu0 %v13335_v43, %s12988_s16  ;;  %v2017_v43 = vunpack.c.0.s8 %v2016_v2 }
 0x476   :  { %12643 = vmatpush3.xpose.msk.msra.mxu0 %vm260_vm3, %v13996_v44  ;;  %12609 = vmatprep.mubr.msk.f32.mxu1 %vm12993_vm5, %v12992_v37  ;;  %v14124_v34 = vpop.permute.xlu0 %6568  ;;  %v1207_v9 = vpop.f32.mrf.mxu1 }
 0x477   :  { %10988 = vrot.lane.b32.xlu1 %v13389_v60, %s12988_s16  ;;  %12610 = vmatmul.mubr.msk.f32.vlgmr.msra.gmra.mxu1 %vm260_vm3, %v13495_v36 }
 0x478   :  { %12617 = vmatprep.subr.mxu1 %v12992_v37  ;;  %12644 = vmatprep.mubr.msk.f32.mxu0 %vm12993_vm5, %v12992_v37  ;;  %v14133_v14 = vpop.permute.xlu1 %7086  ;;  %v12351_v44 = vpop.f32.mrf.mxu1 }
 0x479   :  { %12618 = vmatpush3.xpose.msk.msra.mxu1 %vm260_vm3, %v14020_v0  ;;  %12645 = vmatmul.mubr.msk.f32.vlgmr.msra.gmra.mxu0 %vm260_vm3, %v13346_v46  ;;  %v14152_v0 = vsub.s32 %v2017_v43, %v1986_v29 }
 0x47a   :  { %12652 = vmatprep.subr.mxu0 %v12992_v37  ;;  %10618 = vrot.lane.b32.xlu0 %v13383_v57, %s12988_s16  ;;  %v14142_v60 = vpop.permute.xlu0 %6716  ;;  %v1361_v15 = vpop.f32.mrf.mxu1 }
 0x47b   :  { %12653 = vmatpush3.xpose.msk.msra.mxu0 %vm260_vm3, %v14026_v8  ;;  %12619 = vmatprep.mubr.msk.f32.mxu1 %vm12993_vm5, %v12992_v37  ;;  %v2005_v61 = vcombine.low %v1207_v9, %v1361_v15  ;;  %v2004_v8 = vrot.slane %v1997_v11, %v14092_v45  ;;  %v14178_v11 = vrot.slane %v2013_v1, %v14152_v0 }
 0x47c   :  { %11136 = vrot.lane.b32.xlu1 %v13419_v7, %s12988_s16  ;;  %12620 = vmatmul.mubr.msk.f32.vlgmr.msra.gmra.mxu1 %vm260_vm3, %v13511_v39  ;;  %v14154_v17 = vpop.permute.xlu1 %7234  ;;  %v12361_v57 = vpop.f32.mrf.mxu1 }
 0x47d   :  { %12627 = vmatprep.subr.mxu1 %v12992_v37  ;;  %12654 = vmatprep.mubr.msk.f32.mxu0 %vm12993_vm5, %v12992_v37  ;;  %v2012_v7 = vrot.slane %v2005_v61, %v14092_v45 }
 0x47e   :  { %12628 = vmatpush3.xpose.msk.msra.mxu1 %vm260_vm3, %v14046_v12  ;;  %12655 = vmatmul.mubr.msk.f32.vlgmr.msra.gmra.mxu0 %vm260_vm3, %v13357_v50  ;;  %v14168_v18 = vpop.permute.xlu0 %6864 }
 0x47f   :  { %12662 = vmatprep.subr.mxu0 %v12992_v37  ;;  %10766 = vrot.lane.b32.xlu0 %v13350_v49, %s12988_s16  ;;  %v2029_v58 = vcombine.low %v2004_v8, %v2012_v7  ;;  %v2030_v38 = vcombine.high %v2004_v8, %v2012_v7  ;;  %v14187_v49 = vrot.slane %v2014_v27, %v14152_v0 }
 0x480   :  { %12663 = vmatpush3.xpose.msk.msra.mxu0 %vm260_vm3, %v14056_v23  ;;  %12629 = vmatprep.mubr.msk.f32.mxu1 %vm12993_vm5, %v12992_v37  ;;  %v14180_v12 = vpop.permute.xlu1 %7548 }
 0x481   :  { %11284 = vrot.lane.b32.xlu1 %v13413_v5, %s12988_s16  ;;  %12630 = vmatmul.mubr.msk.f32.vlgmr.msra.gmra.mxu1 %vm260_vm3, %v13523_v42  ;;  %v14190_v20 = vrot.slane %v2029_v58, %v14152_v0  ;;  %v14193_v23 = vrot.slane %v2030_v38, %v14152_v0 }
 0x482   :  { %12637 = vmatprep.subr.mxu1 %v12992_v37  ;;  %12664 = vmatprep.mubr.msk.f32.mxu0 %vm12993_vm5, %v12992_v37 }
 0x483   :  { %12638 = vmatpush3.xpose.msk.msra.mxu1 %vm260_vm3, %v14065_v41  ;;  %12665 = vmatmul.mubr.msk.f32.vlgmr.msra.gmra.mxu0 %vm260_vm3, %v13367_v53  ;;  %v14202_v5 = vpop.permute.xlu0 %7012 }
 0x484   :  { %12672 = vmatprep.subr.mxu0 %v12992_v37  ;;  %10914 = vrot.lane.b32.xlu0 %v13407_v3, %s12988_s16  ;;  %v14213_v41 = vpop.permute.xlu1 %7696 }
 0x485   :  { %12673 = vmatpush3.xpose.msk.msra.mxu0 %vm260_vm3, %v14074_v30  ;;  %12639 = vmatprep.mubr.msk.f32.mxu1 %vm12993_vm5, %v12992_v37 }
 0x486   :  { %12640 = vmatmul.mubr.msk.f32.vlgmr.msra.gmra.mxu1 %vm260_vm3, %v13691_v13  ;;  %12647 = vmatprep.subr.mxu1 %v12992_v37 }
 0x487   :  { %12674 = vmatprep.mubr.msk.f32.mxu0 %vm12993_vm5, %v12992_v37  ;;  %12648 = vmatpush3.xpose.msk.msra.mxu1 %vm260_vm3, %v14083_v22 }
 0x488   :  { %12675 = vmatmul.mubr.msk.f32.vlgmr.msra.gmra.mxu0 %vm260_vm3, %v13424_v10  ;;  %12682 = vmatprep.subr.mxu0 %v12992_v37  ;;  %v7161_v3 = vpop.permute.xlu0 %7160 }
 0x489   :  { %11062 = vrot.lane.b32.xlu0 %v13395_v63, %s12988_s16  ;;  %12683 = vmatpush3.xpose.msk.msra.mxu0 %vm260_vm3, %v14094_v33  ;;  %v7845_v30 = vpop.permute.xlu1 %7844 }
 0x48a   :  { %12649 = vmatprep.mubr.msk.f32.mxu1 %vm12993_vm5, %v12992_v37  ;;  %12657 = vmatprep.subr.mxu1 %v12992_v37 }
 0x48b   :  { %12650 = vmatmul.mubr.msk.f32.vlgmr.msra.gmra.mxu1 %vm260_vm3, %v13360_v51  ;;  %12684 = vmatprep.mubr.msk.f32.mxu0 %vm12993_vm5, %v12992_v37 }
 0x48c   :  { %12658 = vmatpush3.xpose.msk.msra.mxu1 %vm260_vm3, %v14106_v59  ;;  %12685 = vmatmul.mubr.msk.f32.vlgmr.msra.gmra.mxu0 %vm260_vm3, %v13584_v47 }
 0x48d   :  { %12692 = vmatprep.subr.mxu0 %v12992_v37  ;;  %11210 = vrot.lane.b32.xlu0 %v13440_v19, %s12988_s16  ;;  %v7309_v63 = vpop.permute.xlu0 %7308 }
 0x48e   :  { %12693 = vmatpush3.xpose.msk.msra.mxu0 %vm260_vm3, %v14115_v6  ;;  %12659 = vmatprep.mubr.msk.f32.mxu1 %vm12993_vm5, %v12992_v37  ;;  %v7993_v31 = vpop.permute.xlu1 %7992 }
 0x48f   :  { %12660 = vmatmul.mubr.msk.f32.vlgmr.msra.gmra.mxu1 %vm260_vm3, %v13370_v54  ;;  %12667 = vmatprep.subr.mxu1 %v12992_v37 }
 0x490   :  { %12694 = vmatprep.mubr.msk.f32.mxu0 %vm12993_vm5, %v12992_v37  ;;  %12668 = vmatpush3.xpose.msk.msra.mxu1 %vm260_vm3, %v14124_v34 }
 0x491   :  { %12695 = vmatmul.mubr.msk.f32.vlgmr.msra.gmra.mxu0 %vm260_vm3, %v13592_v48  ;;  %12702 = vmatprep.subr.mxu0 %v12992_v37 }
 0x492   :  { %11358 = vrot.lane.b32.xlu0 %v13432_v16, %s12988_s16  ;;  %12703 = vmatpush3.xpose.msk.msra.mxu0 %vm260_vm3, %v14133_v14  ;;  %v7623_v19 = vpop.permute.xlu0 %7622  ;;  %s13003_s16 = smov 16  }
 0x493   :  { %12669 = vmatprep.mubr.msk.f32.mxu1 %vm12993_vm5, %v12992_v37  ;;  %12677 = vmatprep.subr.mxu1 %v12992_v37  ;;  %v8141_v22 = vpop.permute.xlu1 %8140 }
 0x494   :  { %12670 = vmatmul.mubr.msk.f32.vlgmr.msra.gmra.mxu1 %vm260_vm3, %v13377_v55  ;;  %12704 = vmatprep.mubr.msk.f32.mxu0 %vm12993_vm5, %v12992_v37 }
 0x495   :  { %12678 = vmatpush3.xpose.msk.msra.mxu1 %vm260_vm3, %v14142_v60  ;;  %12705 = vmatmul.mubr.msk.f32.vlgmr.msra.gmra.mxu0 %vm260_vm3, %v13600_v52 }
 0x496   :  { %12712 = vmatprep.subr.mxu0 %v12992_v37  ;;  %12679 = vmatprep.mubr.msk.f32.mxu1 %vm12993_vm5, %v12992_v37 }
 0x497   :  { %12713 = vmatpush3.xpose.msk.msra.mxu0 %vm260_vm3, %v14154_v17  ;;  %12687 = vmatprep.subr.mxu1 %v12992_v37  ;;  %v7771_v16 = vpop.permute.xlu0 %7770 }
 0x498   :  { %12680 = vmatmul.mubr.msk.f32.vlgmr.msra.gmra.mxu1 %vm260_vm3, %v13447_v25  ;;  %12714 = vmatprep.mubr.msk.f32.mxu0 %vm12993_vm5, %v12992_v37  ;;  %v8289_v32 = vpop.permute.xlu1 %8288 }
 0x499   :  { %12688 = vmatpush3.xpose.msk.msra.mxu1 %vm260_vm3, %v14168_v18  ;;  %12722 = vmatprep.subr.mxu0 %v12992_v37 }
 0x49a   :  { %12715 = vmatmul.mubr.msk.f32.vlgmr.msra.gmra.mxu0 %vm260_vm3, %v13652_v4  ;;  %12689 = vmatprep.mubr.msk.f32.mxu1 %vm12993_vm5, %v12992_v37 }
 0x49b   :  { %12723 = vmatpush3.xpose.msk.msra.mxu0 %vm260_vm3, %v14180_v12  ;;  %12697 = vmatprep.subr.mxu1 %v12992_v37 }
 0x49c   :  { %12690 = vmatmul.mubr.msk.f32.vlgmr.msra.gmra.mxu1 %vm260_vm3, %v13495_v36  ;;  %12724 = vmatprep.mubr.msk.f32.mxu0 %vm12993_vm5, %v12992_v37  ;;  %v7919_v35 = vpop.permute.xlu0 %7918 }
 0x49d   :  { %12698 = vmatpush3.xpose.msk.msra.mxu1 %vm260_vm3, %v14202_v5  ;;  %12732 = vmatprep.subr.mxu0 %v12992_v37 }
 0x49e   :  { %12725 = vmatmul.mubr.msk.f32.vlgmr.msra.gmra.mxu0 %vm260_vm3, %v13346_v46  ;;  %12699 = vmatprep.mubr.msk.f32.mxu1 %vm12993_vm5, %v12992_v37  ;;  %v8437_v33 = vpop.permute.xlu1 %8436 }
 0x49f   :  { %12733 = vmatpush3.xpose.msk.msra.mxu0 %vm260_vm3, %v14213_v41  ;;  %12707 = vmatprep.subr.mxu1 %v12992_v37 }
 0x4a0   :  { %12700 = vmatmul.mubr.msk.f32.vlgmr.msra.gmra.mxu1 %vm260_vm3, %v13511_v39  ;;  %12734 = vmatprep.mubr.msk.f32.mxu0 %vm12993_vm5, %v12992_v37 }
 0x4a1   :  { %12708 = vmatpush3.xpose.msk.msra.mxu1 %vm260_vm3, %v7161_v3  ;;  %12742 = vmatprep.subr.mxu0 %v12992_v37  ;;  %v8067_v26 = vpop.permute.xlu0 %8066 }
 0x4a2   :  { %12735 = vmatmul.mubr.msk.f32.vlgmr.msra.gmra.mxu0 %vm260_vm3, %v13357_v50  ;;  %12709 = vmatprep.mubr.msk.f32.mxu1 %vm12993_vm5, %v12992_v37 }
 0x4a3   :  { %12743 = vmatpush3.xpose.msk.msra.mxu0 %vm260_vm3, %v7845_v30  ;;  %12717 = vmatprep.subr.mxu1 %v12992_v37  ;;  %v8585_v40 = vpop.permute.xlu1 %8584 }
 0x4a4   :  { %12710 = vmatmul.mubr.msk.f32.vlgmr.msra.gmra.mxu1 %vm260_vm3, %v13523_v42  ;;  %12744 = vmatprep.mubr.msk.f32.mxu0 %vm12993_vm5, %v12992_v37 }
 0x4a5   :  { %12718 = vmatpush3.xpose.msk.msra.mxu1 %vm260_vm3, %v7309_v63  ;;  %12752 = vmatprep.subr.mxu0 %v12992_v37 }
 0x4a6   :  { %12745 = vmatmul.mubr.msk.f32.vlgmr.msra.gmra.mxu0 %vm260_vm3, %v13367_v53  ;;  %12719 = vmatprep.mubr.msk.f32.mxu1 %vm12993_vm5, %v12992_v37  ;;  %v8215_v56 = vpop.permute.xlu0 %8214 }
 0x4a7   :  { %12753 = vmatpush3.xpose.msk.msra.mxu0 %vm260_vm3, %v7993_v31  ;;  %12727 = vmatprep.subr.mxu1 %v12992_v37 }
 0x4a8   :  { %12720 = vmatmul.mubr.msk.f32.vlgmr.msra.gmra.mxu1 %vm260_vm3, %v13691_v13  ;;  %12754 = vmatprep.mubr.msk.f32.mxu0 %vm12993_vm5, %v12992_v37  ;;  %v8899_v59 = vpop.permute.xlu1 %8898 }
 0x4a9   :  { %12728 = vmatpush3.xpose.msk.msra.mxu1 %vm260_vm3, %v7623_v19  ;;  %12762 = vmatprep.subr.mxu0 %v12992_v37 }
 0x4aa   :  { %12755 = vmatmul.mubr.msk.f32.vlgmr.msra.gmra.mxu0 %vm260_vm3, %v13424_v10  ;;  %12729 = vmatprep.mubr.msk.f32.mxu1 %vm12993_vm5, %v12992_v37 }
 0x4ab   :  { %12763 = vmatpush3.xpose.msk.msra.mxu0 %vm260_vm3, %v8141_v22  ;;  %12737 = vmatprep.subr.mxu1 %v12992_v37  ;;  %v8363_v1 = vpop.permute.xlu0 %8362 }
 0x4ac   :  { %12730 = vmatmul.mubr.msk.f32.vlgmr.msra.gmra.mxu1 %vm260_vm3, %v13360_v51  ;;  %12764 = vmatprep.mubr.msk.f32.mxu0 %vm12993_vm5, %v12992_v37 }
 0x4ad   :  { %12738 = vmatpush3.xpose.msk.msra.mxu1 %vm260_vm3, %v7771_v16  ;;  %12772 = vmatprep.subr.mxu0 %v12992_v37  ;;  %v9047_v27 = vpop.permute.xlu1 %9046 }
 0x4ae   :  { %12765 = vmatmul.mubr.msk.f32.vlgmr.msra.gmra.mxu0 %vm260_vm3, %v13584_v47  ;;  %12739 = vmatprep.mubr.msk.f32.mxu1 %vm12993_vm5, %v12992_v37 }
 0x4af   :  { %12773 = vmatpush3.xpose.msk.msra.mxu0 %vm260_vm3, %v8289_v32  ;;  %12747 = vmatprep.subr.mxu1 %v12992_v37 }
 0x4b0   :  { %12740 = vmatmul.mubr.msk.f32.vlgmr.msra.gmra.mxu1 %vm260_vm3, %v13370_v54  ;;  %12774 = vmatprep.mubr.msk.f32.mxu0 %vm12993_vm5, %v12992_v37  ;;  %v8511_v62 = vpop.permute.xlu0 %8510 }
 0x4b1   :  { %12748 = vmatpush3.xpose.msk.msra.mxu1 %vm260_vm3, %v7919_v35  ;;  %12782 = vmatprep.subr.mxu0 %v12992_v37  ;;  %v1438_v2 = vpop.f32.mrf.mxu0 }
 0x4b2   :  { %12775 = vmatmul.mubr.msk.f32.vlgmr.msra.gmra.mxu0 %vm260_vm3, %v13592_v48  ;;  %12749 = vmatprep.mubr.msk.f32.mxu1 %vm12993_vm5, %v12992_v37  ;;  %v9195_v6 = vpop.permute.xlu1 %9194 }
 0x4b3   :  { %12783 = vmatpush3.xpose.msk.msra.mxu0 %vm260_vm3, %v8437_v33  ;;  %12757 = vmatprep.subr.mxu1 %v12992_v37  ;;  %v12366_v34 = vpop.f32.mrf.mxu0  ;;  %v1515_v9 = vpop.f32.mrf.mxu1 }
 0x4b4   :  { %12750 = vmatmul.mubr.msk.f32.vlgmr.msra.gmra.mxu1 %vm260_vm3, %v13377_v55  ;;  %12784 = vmatprep.mubr.msk.f32.mxu0 %vm12993_vm5, %v12992_v37 }
 0x4b5   :  { %12758 = vmatpush3.xpose.msk.msra.mxu1 %vm260_vm3, %v8067_v26  ;;  %12792 = vmatprep.subr.mxu0 %v12992_v37  ;;  %v8659_v43 = vpop.permute.xlu0 %8658  ;;  %v12371_v14 = vpop.f32.mrf.mxu1 }
 0x4b6   :  { %12785 = vmatmul.mubr.msk.f32.vlgmr.msra.gmra.mxu0 %vm260_vm3, %v13600_v52  ;;  %12759 = vmatprep.mubr.msk.f32.mxu1 %vm12993_vm5, %v12992_v37  ;;  %v1592_v44 = vpop.f32.mrf.mxu0 }
 0x4b7   :  { %12793 = vmatpush3.xpose.msk.msra.mxu0 %vm260_vm3, %v8585_v40  ;;  %12767 = vmatprep.subr.mxu1 %v12992_v37  ;;  %v9343_v60 = vpop.permute.xlu1 %9342  ;;  %v2049_v15 = vcombine.low %v1438_v2, %v1592_v44  ;;  %v1669_v61 = vpop.f32.mrf.mxu1 }
 0x4b8   :  { %12760 = vmatmul.mubr.msk.f32.vlgmr.msra.gmra.mxu1 %vm260_vm3, %v13447_v25  ;;  %12794 = vmatprep.mubr.msk.f32.mxu0 %vm12993_vm5, %v12992_v37  ;;  %v12376_v17 = vpop.f32.mrf.mxu0  ;;  %v2057_v57 = vcombine.low %v1515_v9, %v1669_v61 }
 0x4b9   :  { %12768 = vmatpush3.xpose.msk.msra.mxu1 %vm260_vm3, %v8215_v56  ;;  %12802 = vmatprep.subr.mxu0 %v12992_v37  ;;  %v12381_v8 = vpop.f32.mrf.mxu1  ;;  %v14395_v18 = vrot.slane %v2049_v15, %v14092_v45 }
 0x4ba   :  { %12795 = vmatmul.mubr.msk.f32.vlgmr.msra.gmra.mxu0 %vm260_vm3, %v13652_v4  ;;  %12769 = vmatprep.mubr.msk.f32.mxu1 %vm12993_vm5, %v12992_v37  ;;  %v8973_v7 = vpop.permute.xlu0 %8972  ;;  %v14398_v58 = vrot.slane %v2057_v57, %v14092_v45 }
 0x4bb   :  { %12803 = vmatpush3.xpose.msk.msra.mxu0 %vm260_vm3, %v8899_v59  ;;  %12777 = vmatprep.subr.mxu1 %v12992_v37  ;;  %v14402_v38 = vpop.f32.mrf.mxu0 }
 0x4bc   :  { %12770 = vmatmul.mubr.msk.f32.vlgmr.msra.gmra.mxu1 %vm260_vm3, %v13495_v36  ;;  %12804 = vmatprep.mubr.msk.f32.mxu0 %vm12993_vm5, %v12992_v37  ;;  %v9491_v12 = vpop.permute.xlu1 %9490  ;;  %v2081_v5 = vcombine.low %v14395_v18, %v14398_v58  ;;  %v2082_v41 = vcombine.high %v14395_v18, %v14398_v58 }
 0x4bd   :  { %12778 = vmatpush3.xpose.msk.msra.mxu1 %vm260_vm3, %v8363_v1  ;;  %12812 = vmatprep.subr.mxu0 %v12992_v37  ;;  %v12386_v3 = vpop.f32.mrf.mxu0 }
 0x4be   :  { %12805 = vmatmul.mubr.msk.f32.vlgmr.msra.gmra.mxu0 %vm260_vm3, %v13346_v46  ;;  %12779 = vmatprep.mubr.msk.f32.mxu1 %vm12993_vm5, %v12992_v37 }
 0x4bf   :  { %12813 = vmatpush3.xpose.msk.msra.mxu0 %vm260_vm3, %v9047_v27  ;;  %12787 = vmatprep.subr.mxu1 %v12992_v37  ;;  %v9121_v30 = vpop.permute.xlu0 %9120  ;;  %v1900_v63 = vpop.f32.mrf.mxu0 }
 0x4c0   :  { %12780 = vmatmul.mubr.msk.f32.vlgmr.msra.gmra.mxu1 %vm260_vm3, %v13511_v39  ;;  %12814 = vmatprep.mubr.msk.f32.mxu0 %vm12993_vm5, %v12992_v37  ;;  %v2065_v31 = vcombine.low %v14402_v38, %v1900_v63  ;;  %v14499_v38 = vrot.slane %v2081_v5, %v14152_v0 }
 0x4c1   :  { %12788 = vmatpush3.xpose.msk.msra.mxu1 %vm260_vm3, %v8511_v62  ;;  %12822 = vmatprep.subr.mxu0 %v12992_v37  ;;  %v9639_v19 = vpop.permute.xlu1 %9638  ;;  %v12396_v22 = vpop.f32.mrf.mxu0 }
 0x4c2   :  { %12815 = vmatmul.mubr.msk.f32.vlgmr.msra.gmra.mxu0 %vm260_vm3, %v13357_v50  ;;  %12789 = vmatprep.mubr.msk.f32.mxu1 %vm12993_vm5, %v12992_v37 }
 0x4c3   :  { %12823 = vmatpush3.xpose.msk.msra.mxu0 %vm260_vm3, %v9195_v6  ;;  %12797 = vmatprep.subr.mxu1 %v12992_v37  ;;  %v14433_v16 = vpop.f32.mrf.mxu0 }
 0x4c4   :  { %12790 = vmatmul.mubr.msk.f32.vlgmr.msra.gmra.mxu1 %vm260_vm3, %v13523_v42  ;;  %12824 = vmatprep.mubr.msk.f32.mxu0 %vm12993_vm5, %v12992_v37  ;;  %v9269_v32 = vpop.permute.xlu0 %9268 }
 0x4c5   :  { %12798 = vmatpush3.xpose.msk.msra.mxu1 %vm260_vm3, %v8659_v43  ;;  %12832 = vmatprep.subr.mxu0 %v12992_v37  ;;  %v12406_v35 = vpop.f32.mrf.mxu0 }
 0x4c6   :  { %12825 = vmatmul.mubr.msk.f32.vlgmr.msra.gmra.mxu0 %vm260_vm3, %v13367_v53  ;;  %12799 = vmatprep.mubr.msk.f32.mxu1 %vm12993_vm5, %v12992_v37  ;;  %v9787_v33 = vpop.permute.xlu1 %9786 }
 0x4c7   :  { %12833 = vmatpush3.xpose.msk.msra.mxu0 %vm260_vm3, %v9343_v60  ;;  %12807 = vmatprep.subr.mxu1 %v12992_v37  ;;  %v14447_v26 = vpop.f32.mrf.mxu0  ;;  %v2072_v60 = vrot.slane %v2065_v31, %v14092_v45 }
 0x4c8   :  { %12800 = vmatmul.mubr.msk.f32.vlgmr.msra.gmra.mxu1 %vm260_vm3, %v13691_v13  ;;  %12834 = vmatprep.mubr.msk.f32.mxu0 %vm12993_vm5, %v12992_v37 }
 0x4c9   :  { %12808 = vmatpush3.xpose.msk.msra.mxu1 %vm260_vm3, %v8973_v7  ;;  %12842 = vmatprep.subr.mxu0 %v12992_v37  ;;  %v9417_v40 = vpop.permute.xlu0 %9416  ;;  %v12416_v56 = vpop.f32.mrf.mxu0 }
 0x4ca   :  { %12835 = vmatmul.mubr.msk.f32.vlgmr.msra.gmra.mxu0 %vm260_vm3, %v13424_v10  ;;  %12809 = vmatprep.mubr.msk.f32.mxu1 %vm12993_vm5, %v12992_v37  ;;  %v1823_v59 = vpop.f32.mrf.mxu1 }
 0x4cb   :  { %12843 = vmatpush3.xpose.msk.msra.mxu0 %vm260_vm3, %v9491_v12  ;;  %12817 = vmatprep.subr.mxu1 %v12992_v37  ;;  %v9935_v1 = vpop.permute.xlu1 %9934  ;;  %v14461_v27 = vpop.f32.mrf.mxu0 }
 0x4cc   :  { %12810 = vmatmul.mubr.msk.f32.vlgmr.msra.gmra.mxu1 %vm260_vm3, %v13360_v51  ;;  %12844 = vmatprep.mubr.msk.f32.mxu0 %vm12993_vm5, %v12992_v37  ;;  %v12391_v62 = vpop.f32.mrf.mxu1 }
 0x4cd   :  { %12818 = vmatpush3.xpose.msk.msra.mxu1 %vm260_vm3, %v9121_v30  ;;  %12852 = vmatprep.subr.mxu0 %v12992_v37  ;;  %v12426_v2 = vpop.f32.mrf.mxu0  ;;  %v14509_v30 = vrot.slane %v2082_v41, %v14152_v0 }
 0x4ce   :  { %12845 = vmatmul.mubr.msk.f32.vlgmr.msra.gmra.mxu0 %vm260_vm3, %v13584_v47  ;;  %12819 = vmatprep.mubr.msk.f32.mxu1 %vm12993_vm5, %v12992_v37  ;;  %v9565_v6 = vpop.permute.xlu0 %9564 }
 0x4cf   :  { %12853 = vmatpush3.xpose.msk.msra.mxu0 %vm260_vm3, %v9639_v19  ;;  %12827 = vmatprep.subr.mxu1 %v12992_v37  ;;  %v1977_v34 = vpop.f32.mrf.mxu1 }
 0x4d0   :  { %12820 = vmatmul.mubr.msk.f32.vlgmr.msra.gmra.mxu1 %vm260_vm3, %v13370_v54  ;;  %12854 = vmatprep.mubr.msk.f32.mxu0 %vm12993_vm5, %v12992_v37  ;;  %v10249_v9 = vpop.permute.xlu1 %10248  ;;  %v2073_v43 = vcombine.low %v1823_v59, %v1977_v34  ;;  %v14479_v14 = vpop.f32.mrf.mxu0 }
 0x4d1   :  { %12828 = vmatpush3.xpose.msk.msra.mxu1 %vm260_vm3, %v9269_v32  ;;  %12862 = vmatprep.subr.mxu0 %v12992_v37  ;;  %v12401_v44 = vpop.f32.mrf.mxu1 }
 0x4d2   :  { %12855 = vmatmul.mubr.msk.f32.vlgmr.msra.gmra.mxu0 %vm260_vm3, %v13592_v48  ;;  %12829 = vmatprep.mubr.msk.f32.mxu1 %vm12993_vm5, %v12992_v37  ;;  %v2080_v15 = vrot.slane %v2073_v43, %v14092_v45  ;;  %v12436_v61 = vpop.f32.mrf.mxu0 }
 0x4d3   :  { %12863 = vmatpush3.xpose.msk.msra.mxu0 %vm260_vm3, %v9787_v33  ;;  %12837 = vmatprep.subr.mxu1 %v12992_v37  ;;  %v9713_v17 = vpop.permute.xlu0 %9712 }
 0x4d4   :  { %12830 = vmatmul.mubr.msk.f32.vlgmr.msra.gmra.mxu1 %vm260_vm3, %v13377_v55  ;;  %12864 = vmatprep.mubr.msk.f32.mxu0 %vm12993_vm5, %v12992_v37  ;;  %v2097_v57 = vcombine.low %v2072_v60, %v2080_v15  ;;  %v2098_v8 = vcombine.high %v2072_v60, %v2080_v15  ;;  %v2292_v7 = vpop.f32.mrf.mxu1  ;;  %v3348_v60 = vcombine.low %v14461_v27, %v14479_v14 }
 0x4d5   :  { %12838 = vmatpush3.xpose.msk.msra.mxu1 %vm260_vm3, %v9417_v40  ;;  %12872 = vmatprep.subr.mxu0 %v12992_v37  ;;  %v10397_v12 = vpop.permute.xlu1 %10396  ;;  %v14503_v3 = vpop.f32.mrf.mxu0 }
 0x4d6   :  { %12865 = vmatmul.mubr.msk.f32.vlgmr.msra.gmra.mxu0 %vm260_vm3, %v13600_v52  ;;  %12839 = vmatprep.mubr.msk.f32.mxu1 %vm12993_vm5, %v12992_v37  ;;  %v14516_v5 = vrot.slane %v2097_v57, %v14152_v0  ;;  %v14519_v63 = vrot.slane %v2098_v8, %v14152_v0  ;;  %v12411_v31 = vpop.f32.mrf.mxu1 }
 0x4d7   :  { %12873 = vmatpush3.xpose.msk.msra.mxu0 %vm260_vm3, %v9935_v1  ;;  %12847 = vmatprep.subr.mxu1 %v12992_v37  ;;  %v12446_v18 = vpop.f32.mrf.mxu0 }
 0x4d8   :  { %12840 = vmatmul.mubr.msk.f32.vlgmr.msra.gmra.mxu1 %vm260_vm3, %v13447_v25  ;;  %12874 = vmatprep.mubr.msk.f32.mxu0 %vm12993_vm5, %v12992_v37  ;;  %v9861_v58 = vpop.permute.xlu0 %9860 }
 0x4d9   :  { %12848 = vmatpush3.xpose.msk.msra.mxu1 %vm260_vm3, %v9565_v6  ;;  %12882 = vmatprep.subr.mxu0 %v12992_v37  ;;  %v2440_v32 = vpop.f32.mrf.mxu1 }
 0x4da   :  { %12875 = vmatmul.mubr.msk.f32.vlgmr.msra.gmra.mxu0 %vm260_vm3, %v13652_v4  ;;  %12849 = vmatprep.mubr.msk.f32.mxu1 %vm12993_vm5, %v12992_v37  ;;  %v10545_v33 = vpop.permute.xlu1 %10544  ;;  %v14541_v40 = vpop.f32.mrf.mxu0  ;;  %v3340_v6 = vcombine.low %v2292_v7, %v2440_v32 }
 0x4db   :  { %12883 = vmatpush3.xpose.msk.msra.mxu0 %vm260_vm3, %v10249_v9  ;;  %12857 = vmatprep.subr.mxu1 %v12992_v37  ;;  %v12421_v56 = vpop.f32.mrf.mxu1 }
 0x4dc   :  { %12850 = vmatmul.mubr.msk.f32.vlgmr.msra.gmra.mxu1 %vm260_vm3, %v13495_v36  ;;  %12884 = vmatprep.mubr.msk.f32.mxu0 %vm12993_vm5, %v12992_v37  ;;  %v12456_v59 = vpop.f32.mrf.mxu0 }
 0x4dd   :  { %12858 = vmatpush3.xpose.msk.msra.mxu1 %vm260_vm3, %v9713_v17  ;;  %12892 = vmatprep.subr.mxu0 %v12992_v37  ;;  %v10009_v1 = vpop.permute.xlu0 %10008  ;;  %v14594_v17 = vrot.slane %v3348_v60, %v14092_v45 }
 0x4de   :  { %12885 = vmatmul.mubr.msk.f32.vlgmr.msra.gmra.mxu0 %vm260_vm3, %v13346_v46  ;;  %12859 = vmatprep.mubr.msk.f32.mxu1 %vm12993_vm5, %v12992_v37  ;;  %v2588_v62 = vpop.f32.mrf.mxu1  ;;  %v3332_v46 = vcombine.low %v14433_v16, %v14447_v26  ;;  %v14576_v16 = vrot.slane %v3340_v6, %v14092_v45 }
 0x4df   :  { %12893 = vmatpush3.xpose.msk.msra.mxu0 %vm260_vm3, %v10397_v12  ;;  %12867 = vmatprep.subr.mxu1 %v12992_v37  ;;  %v10693_v2 = vpop.permute.xlu1 %10692  ;;  %v14557_v34 = vpop.f32.mrf.mxu0 }
 0x4e0   :  { %12860 = vmatmul.mubr.msk.f32.vlgmr.msra.gmra.mxu1 %vm260_vm3, %v13511_v39  ;;  %12894 = vmatprep.mubr.msk.f32.mxu0 %vm12993_vm5, %v12992_v37  ;;  %v12431_v9 = vpop.f32.mrf.mxu1  ;;  %v14585_v27 = vrot.slane %v3332_v46, %v14092_v45 }
 0x4e1   :  { %12868 = vmatpush3.xpose.msk.msra.mxu1 %vm260_vm3, %v9861_v58  ;;  %12902 = vmatprep.subr.mxu0 %v12992_v37  ;;  %v12466_v43 = vpop.f32.mrf.mxu0 }
 0x4e2   :  { %12895 = vmatmul.mubr.msk.f32.vlgmr.msra.gmra.mxu0 %vm260_vm3, %v13357_v50  ;;  %12869 = vmatprep.mubr.msk.f32.mxu1 %vm12993_vm5, %v12992_v37  ;;  %v10323_v44 = vpop.permute.xlu0 %10322  ;;  %v3364_v12 = vcombine.low %v14585_v27, %v14576_v16 }
 0x4e3   :  { %12903 = vmatpush3.xpose.msk.msra.mxu0 %vm260_vm3, %v10545_v33  ;;  %12877 = vmatprep.subr.mxu1 %v12992_v37  ;;  %v2736_v26 = vpop.f32.mrf.mxu1 }
 0x4e4   :  { %12870 = vmatmul.mubr.msk.f32.vlgmr.msra.gmra.mxu1 %vm260_vm3, %v13523_v42  ;;  %12904 = vmatprep.mubr.msk.f32.mxu0 %vm12993_vm5, %v12992_v37  ;;  %v10841_v50 = vpop.permute.xlu1 %10840  ;;  %v3356_v15 = vcombine.low %v2588_v62, %v2736_v26  ;;  %v14582_v61 = vpop.f32.mrf.mxu0  ;;  %v14623_v56 = vrot.slane %v3364_v12, %v14152_v0 }
 0x4e5   :  { %12878 = vmatpush3.xpose.msk.msra.mxu1 %vm260_vm3, %v10009_v1  ;;  %12912 = vmatprep.subr.mxu0 %v12992_v37  ;;  %v12441_v14 = vpop.f32.mrf.mxu1 }
 0x4e6   :  { %12905 = vmatmul.mubr.msk.f32.vlgmr.msra.gmra.mxu0 %vm260_vm3, %v13367_v53  ;;  %12879 = vmatprep.mubr.msk.f32.mxu1 %vm12993_vm5, %v12992_v37  ;;  %v14597_v57 = vrot.slane %v3356_v15, %v14092_v45  ;;  %v12476_v8 = vpop.f32.mrf.mxu0 }
 0x4e7   :  { %12913 = vmatpush3.xpose.msk.msra.mxu0 %vm260_vm3, %v10693_v2  ;;  %12887 = vmatprep.subr.mxu1 %v12992_v37  ;;  %v10471_v7 = vpop.permute.xlu0 %10470 }
 0x4e8   :  { %12880 = vmatmul.mubr.msk.f32.vlgmr.msra.gmra.mxu1 %vm260_vm3, %v13691_v13  ;;  %12914 = vmatprep.mubr.msk.f32.mxu0 %vm12993_vm5, %v12992_v37  ;;  %v3380_v53 = vcombine.low %v14594_v17, %v14597_v57  ;;  %v2884_v31 = vpop.f32.mrf.mxu1 }
 0x4e9   :  { %12888 = vmatpush3.xpose.msk.msra.mxu1 %vm260_vm3, %v10323_v44  ;;  %12922 = vmatprep.subr.mxu0 %v12992_v37  ;;  %v10989_v18 = vpop.permute.xlu1 %10988  ;;  %v14611_v58 = vpop.f32.mrf.mxu0  ;;  %v3400_v44 = vcombine.low %v14503_v3, %v14541_v40  ;;  %v3416_v3 = vcombine.low %v14557_v34, %v14582_v61  ;;  %v3381_v40 = vcombine.high %v14594_v17, %v14597_v57 }
 0x4ea   :  { %12915 = vmatmul.mubr.msk.f32.vlgmr.msra.gmra.mxu0 %vm260_vm3, %v13424_v10  ;;  %12889 = vmatprep.mubr.msk.f32.mxu1 %vm12993_vm5, %v12992_v37  ;;  %v14618_v32 = vrot.slane %v3380_v53, %v14152_v0  ;;  %v12451_v33 = vpop.f32.mrf.mxu1  ;;  %v3365_v61 = vcombine.high %v14585_v27, %v14576_v16 }
 0x4eb   :  { %12923 = vmatpush3.xpose.msk.msra.mxu0 %vm260_vm3, %v10841_v50  ;;  %12897 = vmatprep.subr.mxu1 %v12992_v37  ;;  %v12486_v59 = vpop.f32.mrf.mxu0  ;;  %v3395_v16 = vrot.slane %v3381_v40, %v14152_v0 }
 0x4ec   :  { %12890 = vmatmul.mubr.msk.f32.vlgmr.msra.gmra.mxu1 %vm260_vm3, %v13360_v51  ;;  %12924 = vmatprep.mubr.msk.f32.mxu0 %vm12993_vm5, %v12992_v37  ;;  %v10619_v10 = vpop.permute.xlu0 %10618  ;;  %v3032_v1 = vpop.f32.mrf.mxu1  ;;  %v3397_v14 = vcombine.high %v14623_v56, %v14618_v32  ;;  %v3379_v12 = vrot.slane %v3365_v61, %v14152_v0 }
 0x4ed   :  { %12898 = vmatpush3.xpose.msk.msra.mxu1 %vm260_vm3, %v10471_v7  ;;  %12932 = vmatprep.subr.mxu0 %v12992_v37  ;;  %v3408_v46 = vcombine.low %v2884_v31, %v3032_v1 }
 0x4ee   :  { %12925 = vmatmul.mubr.msk.f32.vlgmr.msra.gmra.mxu0 %vm260_vm3, %v13584_v47  ;;  %12899 = vmatprep.mubr.msk.f32.mxu1 %vm12993_vm5, %v12992_v37  ;;  %v11137_v2 = vpop.permute.xlu1 %11136  ;;  %v14637_v51 = vpop.f32.mrf.mxu0  ;;  %v3398_v59 = vcombine.low %v3379_v12, %v3395_v16 }
 0x4ef   :  { %12933 = vmatpush3.xpose.msk.msra.mxu0 %vm260_vm3, %v10989_v18  ;;  %12907 = vmatprep.subr.mxu1 %v12992_v37  ;;  %v12461_v6 = vpop.f32.mrf.mxu1  ;;  %v3415_v26 = vrot.slane %v3408_v46, %v14092_v45 }
 0x4f0   :  { %12900 = vmatmul.mubr.msk.f32.vlgmr.msra.gmra.mxu1 %vm260_vm3, %v13370_v54  ;;  %12934 = vmatprep.mubr.msk.f32.mxu0 %vm12993_vm5, %v12992_v37  ;;  %v12496_v9 = vpop.f32.mrf.mxu0 }
 0x4f1   :  { %12908 = vmatpush3.xpose.msk.msra.mxu1 %vm260_vm3, %v10619_v10  ;;  %12942 = vmatprep.subr.mxu0 %v12992_v37  ;;  %v10767_v47 = vpop.permute.xlu0 %10766  ;;  %v3180_v43 = vpop.f32.mrf.mxu1 }
 0x4f2   :  { %12935 = vmatmul.mubr.msk.f32.vlgmr.msra.gmra.mxu0 %vm260_vm3, %v13592_v48  ;;  %12909 = vmatprep.mubr.msk.f32.mxu1 %vm12993_vm5, %v12992_v37 }
 0x4f3   :  { %12943 = vmatpush3.xpose.msk.msra.mxu0 %vm260_vm3, %v11137_v2  ;;  %12917 = vmatprep.subr.mxu1 %v12992_v37  ;;  %v14655_v54 = vpop.f32.mrf.mxu0  ;;  %v11285_v60 = vpop.permute.xlu1 %11284 }
 0x4f4   :  { %12910 = vmatmul.mubr.msk.f32.vlgmr.msra.gmra.mxu1 %vm260_vm3, %v13377_v55  ;;  %12944 = vmatprep.mubr.msk.f32.mxu0 %vm12993_vm5, %v12992_v37  ;;  %v12471_v48 = vpop.f32.mrf.mxu1  ;;  %v3407_v55 = vrot.slane %v3400_v44, %v14092_v45 }
 0x4f5   :  { %12918 = vmatpush3.xpose.msk.msra.mxu1 %vm260_vm3, %v10767_v47  ;;  %12952 = vmatprep.subr.mxu0 %v12992_v37  ;;  %v12506_v50 = vpop.f32.mrf.mxu0 }
 0x4f6   :  { %12945 = vmatmul.mubr.msk.f32.vlgmr.msra.gmra.mxu0 %vm260_vm3, %v13600_v52  ;;  %12919 = vmatprep.mubr.msk.f32.mxu1 %vm12993_vm5, %v12992_v37  ;;  %v10915_v34 = vpop.permute.xlu0 %10914  ;;  %v3328_v15 = vpop.f32.mrf.mxu1  ;;  %v3423_v52 = vrot.slane %v3416_v3, %v14092_v45  ;;  %v3432_v27 = vcombine.low %v3407_v55, %v3415_v26  ;;  %v3433_v6 = vcombine.high %v3407_v55, %v3415_v26 }
 0x4f7   :  { %12953 = vmatpush3.xpose.msk.msra.mxu0 %vm260_vm3, %v11285_v60  ;;  %12927 = vmatprep.subr.mxu1 %v12992_v37  ;;  %v3424_v17 = vcombine.low %v3180_v43, %v3328_v15  ;;  %v3399_v60 = vcombine.high %v3379_v12, %v3395_v16  ;;  %v4682_v15 = vcombine.low %v14611_v58, %v14637_v51 }
 0x4f8   :  { %12920 = vmatmul.mubr.msk.f32.vlgmr.msra.gmra.mxu1 %vm260_vm3, %v13447_v25  ;;  %12954 = vmatprep.mubr.msk.f32.mxu0 %vm12993_vm5, %v12992_v37  ;;  %v14684_v57 = vpop.f32.mrf.mxu0  ;;  %v12481_v8 = vpop.f32.mrf.mxu1  ;;  %v3447_v3 = vrot.slane %v3433_v6, %v14152_v0 }
 0x4f9   :  { %12928 = vmatpush3.xpose.msk.msra.mxu1 %vm260_vm3, %v10915_v34  ;;  %12929 = vmatprep.mubr.msk.f32.mxu1 %vm12993_vm5, %v12992_v37  ;;  %v3431_v7 = vrot.slane %v3424_v17, %v14092_v45  ;;  %v4698_v17 = vcombine.low %v14655_v54, %v14684_v57  ;;  %v4689_v16 = vrot.slane %v4682_v15, %v14092_v45 }
 0x4fa   :  { %12955 = vmatmul.mubr.msk.f32.vlgmr.msra.gmra.mxu0 %vm260_vm3, %v13652_v4  ;;  %12937 = vmatprep.subr.mxu1 %v12992_v37  ;;  %v12516_v25 = vpop.f32.mrf.mxu0  ;;  %v14702_v4 = vrot.slane %v3432_v27, %v14152_v0 }
 0x4fb   :  { %v11063_v53 = vpop.permute.xlu0 %11062  ;;  %3470 = vrot.lane.b32.xlu1 %v3397_v14, %s13001_s8  ;;  %v3448_v31 = vcombine.low %v3423_v52, %v3431_v7  ;;  %v3642_v18 = vpop.f32.mrf.mxu1  ;;  %v3449_v33 = vcombine.high %v3423_v52, %v3431_v7  ;;  %v4705_v51 = vrot.slane %v4698_v17, %v14092_v45 }
 0x4fc   :  { %12930 = vmatmul.mubr.msk.f32.vlgmr.msra.gmra.mxu1 %vm260_vm3, %v13495_v36 }
 0x4fd   :  { %12938 = vmatpush3.xpose.msk.msra.mxu1 %vm260_vm3, %v11063_v53  ;;  %12939 = vmatprep.mubr.msk.f32.mxu1 %vm12993_vm5, %v12992_v37  ;;  %v14705_v10 = vrot.slane %v3448_v31, %v14152_v0  ;;  %v14707_v1 = vpop.f32.mrf.mxu0  ;;  %v12491_v2 = vpop.f32.mrf.mxu1  ;;  %v3463_v43 = vrot.slane %v3449_v33, %v14152_v0 }
 0x4fe   :  { %12947 = vmatprep.subr.mxu1 %v12992_v37 }
 0x4ff   :  { %v11211_v36 = vpop.permute.xlu0 %11210  ;;  %3478 = vrot.lane.b32.xlu1 %v3398_v59, %s12989_s29  ;;  %v12526_v9 = vpop.f32.mrf.mxu0  ;;  %v3465_v47 = vcombine.high %v14702_v4, %v14705_v10  ;;  %v3466_v50 = vcombine.low %v3447_v3, %v3463_v43 }
 0x500   :  { %12940 = vmatmul.mubr.msk.f32.vlgmr.msra.gmra.mxu1 %vm260_vm3, %v13511_v39  ;;  %v3790_v44 = vpop.f32.mrf.mxu1 }
 0x501   :  { %12948 = vmatpush3.xpose.msk.msra.mxu1 %vm260_vm3, %v11211_v36  ;;  %12949 = vmatprep.mubr.msk.f32.mxu1 %vm12993_vm5, %v12992_v37  ;;  %v4690_v55 = vcombine.low %v3642_v18, %v3790_v44 }
 0x502   :  { %12957 = vmatprep.subr.mxu1 %v12992_v37  ;;  %v14723_v48 = vpop.f32.mrf.mxu0  ;;  %v12501_v40 = vpop.f32.mrf.mxu1  ;;  %3472 = vrot.lane.b32.xlu0 %v3465_v47, %s13001_s8 }
 0x503   :  { %3486 = vrot.lane.b32.xlu1 %v3399_v60, %s13002_s15  ;;  %v4697_v52 = vrot.slane %v4690_v55, %v14092_v45  ;;  %v4750_v55 = vcombine.low %v14707_v1, %v14723_v48 }
 0x504   :  { %v11359_v39 = vpop.permute.xlu0 %11358  ;;  %12950 = vmatmul.mubr.msk.f32.vlgmr.msra.gmra.mxu1 %vm260_vm3, %v13523_v42  ;;  %v12536_v26 = vpop.f32.mrf.mxu0  ;;  %v3467_v42 = vcombine.high %v3447_v3, %v3463_v43 }
 0x505   :  { %12958 = vmatpush3.xpose.msk.msra.mxu1 %vm260_vm3, %v11359_v39  ;;  %12959 = vmatprep.mubr.msk.f32.mxu1 %vm12993_vm5, %v12992_v37  ;;  %v3938_v34 = vpop.f32.mrf.mxu1  ;;  %v4714_v25 = vcombine.low %v4689_v16, %v4697_v52  ;;  %v4715_v57 = vcombine.high %v4689_v16, %v4697_v52 }
 0x506   :  { %3480 = vrot.lane.b32.xlu0 %v3466_v50, %s12989_s29 }
 0x507   :  { %v4456_v61 = vpop.f32.mrf.mxu0  ;;  %v12511_v14 = vpop.f32.mrf.mxu1  ;;  %v14745_v18 = vrot.slane %v4714_v25, %v14152_v0  ;;  %v4729_v44 = vrot.slane %v4715_v57, %v14152_v0 }
 0x508   :  { %12960 = vmatmul.mubr.msk.f32.vlgmr.msra.gmra.mxu1 %vm260_vm3, %v13691_v13 }
 0x509   :  { %v12546_v8 = vpop.f32.mrf.mxu0 }
 0x50a   :  { %v4086_v37 = vpop.f32.mrf.mxu1  ;;  %3488 = vrot.lane.b32.xlu0 %v3467_v42, %s13002_s15 }
 0x50b   :  { %v4706_v27 = vcombine.low %v3938_v34, %v4086_v37  ;;  %v4757_v37 = vrot.slane %v4750_v55, %v14092_v45 }
 0x50c   :  { %v4604_v7 = vpop.f32.mrf.mxu0  ;;  %v12521_v58 = vpop.f32.mrf.mxu1 }
 0x50d   :  { %v4713_v13 = vrot.slane %v4706_v27, %v14092_v45  ;;  %v4766_v42 = vcombine.low %v4456_v61, %v4604_v7 }
 0x50e   :  { %v12556_v12 = vpop.f32.mrf.mxu0 }
 0x50f   :  { %v4730_v53 = vcombine.low %v4705_v51, %v4713_v13  ;;  %v4731_v31 = vcombine.high %v4705_v51, %v4713_v13  ;;  %v4234_v54 = vpop.f32.mrf.mxu1  ;;  %v4773_v51 = vrot.slane %v4766_v42, %v14092_v45 }
 0x511   :  { %v14748_v33 = vrot.slane %v4730_v53, %v14152_v0  ;;  %v14750_v59 = vpop.f32.mrf.mxu0  ;;  %v12531_v2 = vpop.f32.mrf.mxu1  ;;  %v4745_v6 = vrot.slane %v4731_v31, %v14152_v0 }
 0x513   :  { %v12566_v36 = vpop.f32.mrf.mxu0  ;;  %v4747_v9 = vcombine.high %v14745_v18, %v14748_v33  ;;  %v4748_v40 = vcombine.low %v4729_v44, %v4745_v6  ;;  %v4749_v14 = vcombine.high %v4729_v44, %v4745_v6 }
 0x514   :  { %v4382_v43 = vpop.f32.mrf.mxu1 }
 0x515   :  { %4820 = vrot.lane.b32.xlu1 %v4747_v9, %s13001_s8  ;;  %v4758_v26 = vcombine.low %v4234_v54, %v4382_v43 }
 0x516   :  { %v5066_v60 = vpop.f32.mrf.mxu0  ;;  %v12541_v3 = vpop.f32.mrf.mxu1 }
 0x517   :  { %v4765_v17 = vrot.slane %v4758_v26, %v14092_v45 }
 0x518   :  { %v12576_v39 = vpop.f32.mrf.mxu0 }
 0x519   :  { %v4530_v50 = vpop.f32.mrf.mxu1  ;;  %4828 = vrot.lane.b32.xlu1 %v4748_v40, %s12989_s29  ;;  %v4782_v25 = vcombine.low %v4757_v37, %v4765_v17  ;;  %v4783_v7 = vcombine.high %v4757_v37, %v4765_v17 }
 0x51b   :  { %v5214_v34 = vpop.f32.mrf.mxu0  ;;  %v12551_v15 = vpop.f32.mrf.mxu1  ;;  %v14768_v53 = vrot.slane %v4782_v25, %v14152_v0  ;;  %v4797_v44 = vrot.slane %v4783_v7, %v14152_v0 }
 0x51c   :  { %v6032_v15 = vcombine.low %v14750_v59, %v5066_v60 }
 0x51d   :  { %v12586_v52 = vpop.f32.mrf.mxu0  ;;  %4836 = vrot.lane.b32.xlu1 %v4749_v14, %s13002_s15 }
 0x51e   :  { %v4678_v8 = vpop.f32.mrf.mxu1 }
 0x51f   :  { %v4774_v16 = vcombine.low %v4530_v50, %v4678_v8 }
 0x520   :  { %v5362_v27 = vpop.f32.mrf.mxu0  ;;  %v12561_v58 = vpop.f32.mrf.mxu1 }
 0x521   :  { %v4781_v1 = vrot.slane %v4774_v16, %v14092_v45  ;;  %v6048_v52 = vcombine.low %v5214_v34, %v5362_v27  ;;  %v6039_v58 = vrot.slane %v6032_v15, %v14092_v45 }
 0x522   :  { %v12596_v48 = vpop.f32.mrf.mxu0 }
 0x523   :  { %v4798_v13 = vcombine.low %v4773_v51, %v4781_v1  ;;  %v4799_v12 = vcombine.high %v4773_v51, %v4781_v1  ;;  %v4992_v61 = vpop.f32.mrf.mxu1  ;;  %v6055_v48 = vrot.slane %v6048_v52, %v14092_v45 }
 0x525   :  { %v14771_v31 = vrot.slane %v4798_v13, %v14152_v0  ;;  %v14773_v54 = vpop.f32.mrf.mxu0  ;;  %v12571_v57 = vpop.f32.mrf.mxu1  ;;  %v4813_v2 = vrot.slane %v4799_v12, %v14152_v0 }
 0x527   :  { %v12606_v6 = vpop.f32.mrf.mxu0  ;;  %v4815_v36 = vcombine.high %v14768_v53, %v14771_v31  ;;  %v4816_v39 = vcombine.low %v4797_v44, %v4813_v2  ;;  %v4817_v17 = vcombine.high %v4797_v44, %v4813_v2 }
 0x528   :  { %v5140_v43 = vpop.f32.mrf.mxu1 }
 0x529   :  { %4822 = vrot.lane.b32.xlu0 %v4815_v36, %s13001_s8  ;;  %v6040_v50 = vcombine.low %v4992_v61, %v5140_v43 }
 0x52a   :  { %v5658_v3 = vpop.f32.mrf.mxu0  ;;  %v12581_v40 = vpop.f32.mrf.mxu1 }
 0x52b   :  { %v6047_v8 = vrot.slane %v6040_v50, %v14092_v45 }
 0x52c   :  { %v12616_v26 = vpop.f32.mrf.mxu0 }
 0x52d   :  { %v5288_v55 = vpop.f32.mrf.mxu1  ;;  %4830 = vrot.lane.b32.xlu0 %v4816_v39, %s12989_s29  ;;  %v6064_v13 = vcombine.low %v6039_v58, %v6047_v8  ;;  %v6065_v27 = vcombine.high %v6039_v58, %v6047_v8  ;;  %v6100_v8 = vcombine.low %v14773_v54, %v5658_v3 }
 0x52f   :  { %v5806_v14 = vpop.f32.mrf.mxu0  ;;  %v12591_v42 = vpop.f32.mrf.mxu1  ;;  %v14790_v7 = vrot.slane %v6064_v13, %v14152_v0  ;;  %v6079_v26 = vrot.slane %v6065_v27, %v14152_v0 }
 0x531   :  { %v12626_v37 = vpop.f32.mrf.mxu0  ;;  %4838 = vrot.lane.b32.xlu0 %v4817_v17, %s13002_s15 }
 0x532   :  { %v5436_v16 = vpop.f32.mrf.mxu1 }
 0x533   :  { %v6056_v51 = vcombine.low %v5288_v55, %v5436_v16 }
 0x534   :  { %v5954_v25 = vpop.f32.mrf.mxu0  ;;  %v12601_v1 = vpop.f32.mrf.mxu1 }
 0x535   :  { %v6063_v59 = vrot.slane %v6056_v51, %v14092_v45  ;;  %v6116_v51 = vcombine.low %v5806_v14, %v5954_v25 }
 0x536   :  { %v12636_v60 = vpop.f32.mrf.mxu0 }
 0x537   :  { %v6080_v12 = vcombine.low %v6055_v48, %v6063_v59  ;;  %v6081_v61 = vcombine.high %v6055_v48, %v6063_v59  ;;  %v5584_v34 = vpop.f32.mrf.mxu1  ;;  %v6107_v59 = vrot.slane %v6100_v8, %v14092_v45 }
 0x539   :  { %v14793_v57 = vrot.slane %v6080_v12, %v14152_v0  ;;  %v14795_v2 = vpop.f32.mrf.mxu0  ;;  %v12611_v6 = vpop.f32.mrf.mxu1  ;;  %v6095_v36 = vrot.slane %v6081_v61, %v14152_v0 }
 0x53b   :  { %v12646_v43 = vpop.f32.mrf.mxu0  ;;  %v6097_v44 = vcombine.high %v14790_v7, %v14793_v57  ;;  %v6098_v15 = vcombine.low %v6079_v26, %v6095_v36  ;;  %v6099_v58 = vcombine.high %v6079_v26, %v6095_v36 }
 0x53c   :  { %v5732_v39 = vpop.f32.mrf.mxu1 }
 0x53d   :  { %6170 = vrot.lane.b32.xlu1 %v6097_v44, %s13001_s8  ;;  %v6108_v17 = vcombine.low %v5584_v34, %v5732_v39  ;;  %v6123_v34 = vrot.slane %v6116_v51, %v14092_v45 }
 0x53e   :  { %v6416_v50 = vpop.f32.mrf.mxu0  ;;  %v12621_v55 = vpop.f32.mrf.mxu1 }
 0x53f   :  { %v6115_v1 = vrot.slane %v6108_v17, %v14092_v45 }
 0x540   :  { %v12656_v42 = vpop.f32.mrf.mxu0 }
 0x541   :  { %v5880_v52 = vpop.f32.mrf.mxu1  ;;  %6178 = vrot.lane.b32.xlu1 %v6098_v15, %s12989_s29  ;;  %v6132_v27 = vcombine.low %v6107_v59, %v6115_v1  ;;  %v6133_v43 = vcombine.high %v6107_v59, %v6115_v1  ;;  %v7382_v59 = vcombine.low %v14795_v2, %v6416_v50 }
 0x543   :  { %v6564_v37 = vpop.f32.mrf.mxu0  ;;  %v12631_v16 = vpop.f32.mrf.mxu1  ;;  %v14814_v44 = vrot.slane %v6132_v27, %v14152_v0  ;;  %v6147_v8 = vrot.slane %v6133_v43, %v14152_v0 }
 0x545   :  { %v12666_v48 = vpop.f32.mrf.mxu0  ;;  %6186 = vrot.lane.b32.xlu1 %v6099_v58, %s13002_s15 }
 0x546   :  { %v6028_v13 = vpop.f32.mrf.mxu1 }
 0x547   :  { %v6124_v60 = vcombine.low %v5880_v52, %v6028_v13 }
 0x548   :  { %v6712_v12 = vpop.f32.mrf.mxu0  ;;  %v12641_v61 = vpop.f32.mrf.mxu1 }
 0x549   :  { %v6131_v54 = vrot.slane %v6124_v60, %v14092_v45 }
 0x54a   :  { %v12676_v3 = vpop.f32.mrf.mxu0 }
 0x54b   :  { %v6148_v6 = vcombine.low %v6123_v34, %v6131_v54  ;;  %v6149_v36 = vcombine.high %v6123_v34, %v6131_v54  ;;  %v6342_v14 = vpop.f32.mrf.mxu1  ;;  %v7398_v34 = vcombine.low %v6564_v37, %v6712_v12 }
 0x54c   :  { %v14811_v25 = vpop.f32.mrf.mxu0 }
 0x54d   :  { %v14817_v39 = vrot.slane %v6148_v6, %v14152_v0  ;;  %v12651_v26 = vpop.f32.mrf.mxu1  ;;  %v6163_v15 = vrot.slane %v6149_v36, %v14152_v0  ;;  %v7389_v36 = vrot.slane %v7382_v59, %v14092_v45 }
 0x54e   :  { %v12686_v55 = vpop.f32.mrf.mxu0 }
 0x54f   :  { %v6490_v42 = vpop.f32.mrf.mxu1  ;;  %v6165_v17 = vcombine.high %v14814_v44, %v14817_v39  ;;  %v6166_v48 = vcombine.low %v6147_v8, %v6163_v15  ;;  %v6167_v3 = vcombine.high %v6147_v8, %v6163_v15  ;;  %v7405_v55 = vrot.slane %v7398_v34, %v14092_v45 }
 0x550   :  { %v7390_v51 = vcombine.low %v6342_v14, %v6490_v42 }
 0x551   :  { %v7008_v16 = vpop.f32.mrf.mxu0  ;;  %v12661_v58 = vpop.f32.mrf.mxu1  ;;  %6172 = vrot.lane.b32.xlu0 %v6165_v17, %s13001_s8 }
 0x552   :  { %v7397_v27 = vrot.slane %v7390_v51, %v14092_v45 }
 0x553   :  { %v12696_v1 = vpop.f32.mrf.mxu0 }
 0x554   :  { %v6638_v13 = vpop.f32.mrf.mxu1  ;;  %v7414_v2 = vcombine.low %v7389_v36, %v7397_v27  ;;  %v7415_v8 = vcombine.high %v7389_v36, %v7397_v27 }
 0x555   :  { %v7156_v60 = vpop.f32.mrf.mxu0  ;;  %6180 = vrot.lane.b32.xlu0 %v6166_v48, %s12989_s29 }
 0x556   :  { %v12671_v61 = vpop.f32.mrf.mxu1  ;;  %v14836_v51 = vrot.slane %v7414_v2, %v14152_v0  ;;  %v7429_v27 = vrot.slane %v7415_v8, %v14152_v0 }
 0x557   :  { %v12706_v54 = vpop.f32.mrf.mxu0 }
 0x558   :  { %v6786_v6 = vpop.f32.mrf.mxu1 }
 0x559   :  { %v7406_v43 = vcombine.low %v6638_v13, %v6786_v6  ;;  %6188 = vrot.lane.b32.xlu0 %v6167_v3, %s13002_s15 }
 0x55a   :  { %v7304_v14 = vpop.f32.mrf.mxu0  ;;  %v12681_v26 = vpop.f32.mrf.mxu1 }
 0x55b   :  { %v7413_v50 = vrot.slane %v7406_v43, %v14092_v45  ;;  %v7450_v26 = vcombine.low %v14811_v25, %v7008_v16 }
 0x55c   :  { %v12716_v42 = vpop.f32.mrf.mxu0  ;;  %v6934_v17 = vpop.f32.mrf.mxu1 }
 0x55d   :  { %v7430_v37 = vcombine.low %v7405_v55, %v7413_v50  ;;  %v7431_v12 = vcombine.high %v7405_v55, %v7413_v50  ;;  %v7466_v42 = vcombine.low %v7156_v60, %v7304_v14 }
 0x55e   :  { %v14833_v58 = vpop.f32.mrf.mxu0  ;;  %v12691_v15 = vpop.f32.mrf.mxu1 }
 0x55f   :  { %v14839_v1 = vrot.slane %v7430_v37, %v14152_v0  ;;  %v7445_v59 = vrot.slane %v7431_v12, %v14152_v0 }
 0x560   :  { %v12726_v48 = vpop.f32.mrf.mxu0  ;;  %v7082_v13 = vpop.f32.mrf.mxu1 }
 0x561   :  { %v7447_v61 = vcombine.high %v14836_v51, %v14839_v1  ;;  %v7458_v6 = vcombine.low %v6934_v17, %v7082_v13  ;;  %v7448_v55 = vcombine.low %v7429_v27, %v7445_v59  ;;  %v7457_v48 = vrot.slane %v7450_v26, %v14092_v45 }
 0x562   :  { %v7766_v34 = vpop.f32.mrf.mxu0  ;;  %v12701_v54 = vpop.f32.mrf.mxu1  ;;  %v7449_v17 = vcombine.high %v7429_v27, %v7445_v59 }
 0x563   :  { %7520 = vrot.lane.b32.xlu1 %v7447_v61, %s13001_s8  ;;  %v7465_v37 = vrot.slane %v7458_v6, %v14092_v45  ;;  %v7473_v54 = vrot.slane %v7466_v42, %v14092_v45 }
 0x564   :  { %v12736_v36 = vpop.f32.mrf.mxu0  ;;  %v7230_v43 = vpop.f32.mrf.mxu1 }
 0x565   :  { %v7482_v36 = vcombine.low %v7457_v48, %v7465_v37 }
 0x566   :  { %v7914_v2 = vpop.f32.mrf.mxu0  ;;  %v12711_v50 = vpop.f32.mrf.mxu1 }
 0x567   :  { %7528 = vrot.lane.b32.xlu1 %v7448_v55, %s12989_s29 }
 0x568   :  { %v12746_v12 = vpop.f32.mrf.mxu0  ;;  %v7378_v15 = vpop.f32.mrf.mxu1 }
 0x569   :  { %v7474_v8 = vcombine.low %v7230_v43, %v7378_v15  ;;  %v7483_v12 = vcombine.high %v7457_v48, %v7465_v37  ;;  %v14858_v43 = vrot.slane %v7482_v36, %v14152_v0 }
 0x56a   :  { %v8062_v13 = vpop.f32.mrf.mxu0  ;;  %v12721_v61 = vpop.f32.mrf.mxu1 }
 0x56b   :  { %v7481_v25 = vrot.slane %v7474_v8, %v14092_v45  ;;  %7536 = vrot.lane.b32.xlu1 %v7449_v17, %s13002_s15  ;;  %v7497_v37 = vrot.slane %v7483_v12, %v14152_v0 }
 0x56c   :  { %v12756_v16 = vpop.f32.mrf.mxu0  ;;  %v7692_v60 = vpop.f32.mrf.mxu1 }
 0x56d   :  { %v7498_v14 = vcombine.low %v7473_v54, %v7481_v25  ;;  %v7499_v6 = vcombine.high %v7473_v54, %v7481_v25  ;;  %v8732_v25 = vcombine.low %v14833_v58, %v7766_v34 }
 0x56e   :  { %v14855_v55 = vpop.f32.mrf.mxu0  ;;  %v12731_v50 = vpop.f32.mrf.mxu1 }
 0x56f   :  { %v14861_v59 = vrot.slane %v7498_v14, %v14152_v0  ;;  %v7513_v42 = vrot.slane %v7499_v6, %v14152_v0  ;;  %v8748_v50 = vcombine.low %v7914_v2, %v8062_v13  ;;  %v8739_v21 = vrot.slane %v8732_v25, %v14092_v45 }
 0x570   :  { %v12766_v27 = vpop.f32.mrf.mxu0  ;;  %v7840_v26 = vpop.f32.mrf.mxu1 }
 0x571   :  { %v7515_v15 = vcombine.high %v14858_v43, %v14861_v59  ;;  %v8740_v48 = vcombine.low %v7692_v60, %v7840_v26  ;;  %v7516_v16 = vcombine.low %v7497_v37, %v7513_v42  ;;  %v7517_v60 = vcombine.high %v7497_v37, %v7513_v42 }
 0x572   :  { %v8358_v8 = vpop.f32.mrf.mxu0  ;;  %v12741_v17 = vpop.f32.mrf.mxu1 }
 0x573   :  { %7522 = vrot.lane.b32.xlu0 %v7515_v15, %s13001_s8  ;;  %v8747_v27 = vrot.slane %v8740_v48, %v14092_v45 }
 0x574   :  { %v12776_v54 = vpop.f32.mrf.mxu0  ;;  %v7988_v36 = vpop.f32.mrf.mxu1 }
 0x575   :  { %v8755_v54 = vrot.slane %v8748_v50, %v14092_v45  ;;  %v8764_v61 = vcombine.low %v8739_v21, %v8747_v27  ;;  %v14965_v41 = vpop.permute.xlu0 %3472 }
 0x576   :  { %v8506_v14 = vpop.f32.mrf.mxu0  ;;  %v12751_v6 = vpop.f32.mrf.mxu1 }
 0x577   :  { %7530 = vrot.lane.b32.xlu0 %v7516_v16, %s12989_s29 }
 0x578   :  { %v12786_v17 = vpop.f32.mrf.mxu0  ;;  %v8136_v35 = vpop.f32.mrf.mxu1 }
 0x579   :  { %v8756_v12 = vcombine.low %v7988_v36, %v8136_v35  ;;  %v8765_v17 = vcombine.high %v8739_v21, %v8747_v27  ;;  %v14880_v35 = vrot.slane %v8764_v61, %v14152_v0 }
 0x57a   :  { %v8654_v26 = vpop.f32.mrf.mxu0  ;;  %v12761_v15 = vpop.f32.mrf.mxu1 }
 0x57b   :  { %v8763_v58 = vrot.slane %v8756_v12, %v14092_v45  ;;  %7538 = vrot.lane.b32.xlu0 %v7517_v60, %s13002_s15  ;;  %v8779_v21 = vrot.slane %v8765_v17, %v14152_v0 }
 0x57c   :  { %v12796_v34 = vpop.f32.mrf.mxu0  ;;  %v8284_v2 = vpop.f32.mrf.mxu1 }
 0x57d   :  { %v8780_v13 = vcombine.low %v8755_v54, %v8763_v58  ;;  %v8781_v48 = vcombine.high %v8755_v54, %v8763_v58  ;;  %v8800_v58 = vcombine.low %v14855_v55, %v8358_v8 }
 0x57e   :  { %v14877_v16 = vpop.f32.mrf.mxu0  ;;  %v12771_v6 = vpop.f32.mrf.mxu1 }
 0x57f   :  { %v14883_v42 = vrot.slane %v8780_v13, %v14152_v0  ;;  %v8795_v25 = vrot.slane %v8781_v48, %v14152_v0  ;;  %v8816_v6 = vcombine.low %v8506_v14, %v8654_v26  ;;  %v8807_v15 = vrot.slane %v8800_v58, %v14092_v45 }
 0x580   :  { %v12806_v37 = vpop.f32.mrf.mxu0  ;;  %v8432_v36 = vpop.f32.mrf.mxu1 }
 0x581   :  { %v8797_v50 = vcombine.high %v14880_v35, %v14883_v42  ;;  %v8808_v27 = vcombine.low %v8284_v2, %v8432_v36  ;;  %v8798_v34 = vcombine.low %v8779_v21, %v8795_v25  ;;  %v8799_v2 = vcombine.high %v8779_v21, %v8795_v25 }
 0x582   :  { %v9116_v12 = vpop.f32.mrf.mxu0  ;;  %v12781_v60 = vpop.f32.mrf.mxu1 }
 0x583   :  { %8870 = vrot.lane.b32.xlu1 %v8797_v50, %s13001_s8  ;;  %v8815_v37 = vrot.slane %v8808_v27, %v14092_v45 }
 0x584   :  { %v12816_v61 = vpop.f32.mrf.mxu0  ;;  %v8580_v54 = vpop.f32.mrf.mxu1 }
 0x585   :  { %v8823_v61 = vrot.slane %v8816_v6, %v14092_v45  ;;  %v8832_v9 = vcombine.low %v8807_v15, %v8815_v37 }
 0x586   :  { %v9264_v13 = vpop.f32.mrf.mxu0  ;;  %v12791_v48 = vpop.f32.mrf.mxu1 }
 0x587   :  { %8878 = vrot.lane.b32.xlu1 %v8798_v34, %s12989_s29 }
 0x588   :  { %v12826_v60 = vpop.f32.mrf.mxu0  ;;  %v8728_v52 = vpop.f32.mrf.mxu1 }
 0x589   :  { %v8824_v17 = vcombine.low %v8580_v54, %v8728_v52  ;;  %v8833_v60 = vcombine.high %v8807_v15, %v8815_v37  ;;  %v14902_v52 = vrot.slane %v8832_v9, %v14152_v0 }
 0x58a   :  { %v9412_v36 = vpop.f32.mrf.mxu0  ;;  %v12801_v50 = vpop.f32.mrf.mxu1 }
 0x58b   :  { %v8831_v55 = vrot.slane %v8824_v17, %v14092_v45  ;;  %8886 = vrot.lane.b32.xlu1 %v8799_v2, %s13002_s15  ;;  %v8847_v15 = vrot.slane %v8833_v60, %v14152_v0 }
 0x58c   :  { %v12836_v8 = vpop.f32.mrf.mxu0  ;;  %v9042_v14 = vpop.f32.mrf.mxu1 }
 0x58d   :  { %v8848_v26 = vcombine.low %v8823_v61, %v8831_v55  ;;  %v8849_v27 = vcombine.high %v8823_v61, %v8831_v55  ;;  %v10082_v55 = vcombine.low %v14877_v16, %v9116_v12 }
 0x58e   :  { %v14899_v34 = vpop.f32.mrf.mxu0  ;;  %v12811_v48 = vpop.f32.mrf.mxu1 }
 0x58f   :  { %v14905_v25 = vrot.slane %v8848_v26, %v14152_v0  ;;  %v8863_v58 = vrot.slane %v8849_v27, %v14152_v0  ;;  %v10098_v48 = vcombine.low %v9264_v13, %v9412_v36  ;;  %v10089_v50 = vrot.slane %v10082_v55, %v14092_v45 }
 0x590   :  { %v12846_v21 = vpop.f32.mrf.mxu0  ;;  %v9190_v54 = vpop.f32.mrf.mxu1 }
 0x591   :  { %v8865_v6 = vcombine.high %v14902_v52, %v14905_v25  ;;  %v10090_v37 = vcombine.low %v9042_v14, %v9190_v54  ;;  %v8866_v8 = vcombine.low %v8847_v15, %v8863_v58  ;;  %v8867_v14 = vcombine.high %v8847_v15, %v8863_v58 }
 0x592   :  { %v9708_v17 = vpop.f32.mrf.mxu0  ;;  %v12821_v2 = vpop.f32.mrf.mxu1 }
 0x593   :  { %8872 = vrot.lane.b32.xlu0 %v8865_v6, %s13001_s8  ;;  %v10097_v21 = vrot.slane %v10090_v37, %v14092_v45 }
 0x594   :  { %v12856_v9 = vpop.f32.mrf.mxu0  ;;  %v9338_v61 = vpop.f32.mrf.mxu1 }
 0x595   :  { %v10105_v9 = vrot.slane %v10098_v48, %v14092_v45  ;;  %v10114_v22 = vcombine.low %v10089_v50, %v10097_v21 }
 0x596   :  { %v9856_v26 = vpop.f32.mrf.mxu0  ;;  %v12831_v27 = vpop.f32.mrf.mxu1 }
 0x597   :  { %8880 = vrot.lane.b32.xlu0 %v8866_v8, %s12989_s29 }
 0x598   :  { %v12866_v2 = vpop.f32.mrf.mxu0  ;;  %v9486_v46 = vpop.f32.mrf.mxu1 }
 0x599   :  { %v10106_v60 = vcombine.low %v9338_v61, %v9486_v46  ;;  %v10115_v2 = vcombine.high %v10089_v50, %v10097_v21  ;;  %v14924_v46 = vrot.slane %v10114_v22, %v14152_v0 }
 0x59a   :  { %v10004_v54 = vpop.f32.mrf.mxu0  ;;  %v12841_v6 = vpop.f32.mrf.mxu1 }
 0x59b   :  { %v10113_v16 = vrot.slane %v10106_v60, %v14092_v45  ;;  %8888 = vrot.lane.b32.xlu0 %v8867_v14, %s13002_s15  ;;  %v10129_v50 = vrot.slane %v10115_v2, %v14152_v0 }
 0x59c   :  { %v12876_v12 = vpop.f32.mrf.mxu0  ;;  %v9634_v13 = vpop.f32.mrf.mxu1 }
 0x59d   :  { %v10130_v36 = vcombine.low %v10105_v9, %v10113_v16  ;;  %v10131_v37 = vcombine.high %v10105_v9, %v10113_v16  ;;  %v10150_v16 = vcombine.low %v14899_v34, %v9708_v17 }
 0x59e   :  { %v14921_v8 = vpop.f32.mrf.mxu0  ;;  %v12851_v27 = vpop.f32.mrf.mxu1 }
 0x59f   :  { %v14927_v58 = vrot.slane %v10130_v36, %v14152_v0  ;;  %v10145_v55 = vrot.slane %v10131_v37, %v14152_v0  ;;  %v14937_v27 = vpop.permute.xlu1 %3470 }
 0x5a0   :  { %v12886_v15 = vpop.f32.mrf.mxu0  ;;  %v9782_v61 = vpop.f32.mrf.mxu1 }
 0x5a1   :  { %v10147_v48 = vcombine.high %v14924_v46, %v14927_v58  ;;  %v10158_v21 = vcombine.low %v9634_v13, %v9782_v61  ;;  %v10148_v12 = vcombine.low %v10129_v50, %v10145_v55  ;;  %v10166_v15 = vcombine.low %v9856_v26, %v10004_v54 }
 0x5a2   :  { %v10466_v60 = vpop.f32.mrf.mxu0  ;;  %v12861_v14 = vpop.f32.mrf.mxu1  ;;  %v10157_v13 = vrot.slane %v10150_v16, %v14092_v45  ;;  %v10149_v61 = vcombine.high %v10129_v50, %v10145_v55 }
 0x5a3   :  { %10220 = vrot.lane.b32.xlu1 %v10147_v48, %s13001_s8  ;;  %v10165_v14 = vrot.slane %v10158_v21, %v14092_v45  ;;  %v10173_v34 = vrot.slane %v10166_v15, %v14092_v45  ;;  %v14945_v21 = vpop.permute.xlu1 %3478 }
 0x5a4   :  { %v12896_v22 = vpop.f32.mrf.mxu0  ;;  %v9930_v9 = vpop.f32.mrf.mxu1 }
 0x5a5   :  { %v10182_v17 = vcombine.low %v10157_v13, %v10165_v14 }
 0x5a6   :  { %v10614_v36 = vpop.f32.mrf.mxu0  ;;  %v12871_v37 = vpop.f32.mrf.mxu1 }
 0x5a7   :  { %10228 = vrot.lane.b32.xlu1 %v10148_v12, %s12989_s29  ;;  %v14950_v55 = vrot.slane %v10182_v17, %v14152_v0 }
 0x5a8   :  { %v12906_v6 = vpop.f32.mrf.mxu0  ;;  %v10078_v3 = vpop.f32.mrf.mxu1 }
 0x5a9   :  { %v10174_v2 = vcombine.low %v9930_v9, %v10078_v3  ;;  %v10183_v3 = vcombine.high %v10157_v13, %v10165_v14 }
 0x5aa   :  { %v10762_v48 = vpop.f32.mrf.mxu0  ;;  %v12881_v22 = vpop.f32.mrf.mxu1 }
 0x5ab   :  { %v10181_v37 = vrot.slane %v10174_v2, %v14092_v45  ;;  %10236 = vrot.lane.b32.xlu1 %v10149_v61, %s13002_s15  ;;  %v10197_v14 = vrot.slane %v10183_v3, %v14152_v0  ;;  %v11448_v47 = vcombine.low %v10614_v36, %v10762_v48 }
 0x5ac   :  { %v12916_v26 = vpop.f32.mrf.mxu0  ;;  %v10392_v54 = vpop.f32.mrf.mxu1 }
 0x5ad   :  { %v10198_v12 = vcombine.low %v10173_v34, %v10181_v37  ;;  %v10199_v6 = vcombine.high %v10173_v34, %v10181_v37  ;;  %v14960_v37 = vpop.permute.xlu1 %3486 }
 0x5ae   :  { %v14947_v19 = vpop.f32.mrf.mxu0  ;;  %v12891_v16 = vpop.f32.mrf.mxu1 }
 0x5af   :  { %v14953_v50 = vrot.slane %v10198_v12, %v14152_v0  ;;  %v10213_v2 = vrot.slane %v10199_v6, %v14152_v0  ;;  %v11432_v16 = vcombine.low %v14921_v8, %v10466_v60  ;;  %v11455_v60 = vrot.slane %v11448_v47, %v14092_v45 }
 0x5b0   :  { %v12926_v9 = vpop.f32.mrf.mxu0  ;;  %v10540_v15 = vpop.f32.mrf.mxu1 }
 0x5b1   :  { %15180 = vst [vmem:[#allocation2_spill] sm:$0xff] %v14953_v50  ;;  %v10215_v61 = vcombine.high %v14950_v55, %v14953_v50  ;;  %v11440_v13 = vcombine.low %v10392_v54, %v10540_v15  ;;  %v10216_v6 = vcombine.low %v10197_v14, %v10213_v2  ;;  %v11439_v15 = vrot.slane %v11432_v16, %v14092_v45 }
 0x5b2   :  { %v11058_v22 = vpop.f32.mrf.mxu0  ;;  %v12901_v26 = vpop.f32.mrf.mxu1 }
 0x5b3   :  { %10222 = vrot.lane.b32.xlu0 %v10215_v61, %s13001_s8  ;;  %v14967_v26 = vpop.permute.xlu1 %4820  ;;  %v11447_v34 = vrot.slane %v11440_v13, %v14092_v45  ;;  %v14975_v13 = vpop.permute.xlu0 %3480 }
 0x5b4   :  { %v12936_v17 = vpop.f32.mrf.mxu0  ;;  %v10688_v12 = vpop.f32.mrf.mxu1 }
 0x5b5   :  { %v10217_v17 = vcombine.high %v10197_v14, %v10213_v2 }
 0x5b6   :  { %v11206_v9 = vpop.f32.mrf.mxu0  ;;  %v12911_v40 = vpop.f32.mrf.mxu1 }
 0x5b7   :  { %10230 = vrot.lane.b32.xlu0 %v10216_v6, %s12989_s29  ;;  %v11464_v40 = vcombine.low %v11439_v15, %v11447_v34  ;;  %v14977_v6 = vpop.permute.xlu1 %4828 }
 0x5b8   :  { %v12946_v3 = vpop.f32.mrf.mxu0  ;;  %v10836_v54 = vpop.f32.mrf.mxu1 }
 0x5b9   :  { %v11456_v61 = vcombine.low %v10688_v12, %v10836_v54  ;;  %v11465_v12 = vcombine.high %v11439_v15, %v11447_v34  ;;  %v14980_v2 = vrot.slane %v11464_v40, %v14152_v0  ;;  %v11500_v40 = vcombine.low %v14947_v19, %v11058_v22 }
 0x5ba   :  { %v11354_v62 = vpop.f32.mrf.mxu0  ;;  %v12921_v8 = vpop.f32.mrf.mxu1 }
 0x5bb   :  { %v11463_v29 = vrot.slane %v11456_v61, %v14092_v45  ;;  %10238 = vrot.lane.b32.xlu0 %v10217_v17, %s13002_s15  ;;  %15181 = vst [vmem:[#allocation3_spill] sm:$0xff] %v14980_v2  ;;  %v11479_v34 = vrot.slane %v11465_v12, %v14152_v0 }
 0x5bc   :  { %v12956_v36 = vpop.f32.mrf.mxu0  ;;  %v10984_v48 = vpop.f32.mrf.mxu1 }
 0x5bd   :  { %v11480_v3 = vcombine.low %v11455_v60, %v11463_v29  ;;  %v11481_v28 = vcombine.high %v11455_v60, %v11463_v29  ;;  %v14990_v36 = vpop.permute.xlu0 %3488  ;;  %v4837_v29 = vpop.permute.xlu1 %4836 }
 0x5be   :  { %v12931_v16 = vpop.f32.mrf.mxu1 }
 0x5bf   :  { %v14983_v47 = vrot.slane %v11480_v3, %v14152_v0  ;;  %v11495_v54 = vrot.slane %v11481_v28, %v14152_v0 }
 0x5c0   :  { %v11132_v14 = vpop.f32.mrf.mxu1 }
 0x5c1   :  { %15182 = vst [vmem:[#allocation4_spill] sm:$0xff] %v14983_v47  ;;  %v11497_v61 = vcombine.high %v14980_v2, %v14983_v47  ;;  %v11508_v15 = vcombine.low %v10984_v48, %v11132_v14  ;;  %v11498_v3 = vcombine.low %v11479_v34, %v11495_v54  ;;  %v14995_v16 = vpop.permute.xlu0 %4822  ;;  %v6171_v24 = vpop.permute.xlu1 %6170  ;;  %v11507_v47 = vrot.slane %v11500_v40, %v14092_v45 }
 0x5c2   :  { %v12941_v17 = vpop.f32.mrf.mxu1  ;;  %v11499_v48 = vcombine.high %v11479_v34, %v11495_v54  ;;  %v15183_v54 = vcombine.high %v14178_v11, %v14190_v20 }
 0x5c3   :  { %11570 = vrot.lane.b32.xlu1 %v11497_v61, %s13001_s8  ;;  %v11516_v17 = vcombine.low %v11206_v9, %v11354_v62  ;;  %v11515_v50 = vrot.slane %v11508_v15, %v14092_v45 }
 0x5c4   :  { %v11280_v60 = vpop.f32.mrf.mxu1 }
 0x5c5   :  { %v11523_v61 = vrot.slane %v11516_v17, %v14092_v45  ;;  %v11532_v2 = vcombine.low %v11507_v47, %v11515_v50  ;;  %v4831_v22 = vpop.permute.xlu0 %4830  ;;  %v11533_v15 = vcombine.high %v11507_v47, %v11515_v50 }
 0x5c6   :  { %v12951_v28 = vpop.f32.mrf.mxu1 }
 0x5c7   :  { %11578 = vrot.lane.b32.xlu1 %v11498_v3, %s12989_s29  ;;  %v6179_v28 = vpop.permute.xlu1 %6178  ;;  %v15004_v3 = vrot.slane %v11532_v2, %v14152_v0  ;;  %v11547_v2 = vrot.slane %v11533_v15, %v14152_v0  ;;  %v15189_v15 = vcombine.low %v14790_v7, %v14793_v57 }
 0x5c8   :  { %v11428_v8 = vpop.f32.mrf.mxu1 }
 0x5c9   :  { %v11524_v12 = vcombine.low %v11280_v60, %v11428_v8  ;;  %v4839_v50 = vpop.permute.xlu0 %4838  ;;  %v15184_v60 = vcombine.low %v14187_v49, %v14193_v23 }
 0x5ca   :  { %v12961_v14 = vpop.f32.mrf.mxu1 }
 0x5cb   :  { %v11531_v19 = vrot.slane %v11524_v12, %v14092_v45  ;;  %11586 = vrot.lane.b32.xlu1 %v11499_v48, %s13002_s15  ;;  %v6187_v47 = vpop.permute.xlu1 %6186  ;;  %v15185_v14 = vcombine.high %v14187_v49, %v14193_v23  ;;  %v15187_v49 = vcombine.low %v14745_v18, %v14748_v33  ;;  %v6192_v18 = vsel %vm2141_vm6, %v15189_v15, %v6171_v24  ;;  %v15200_v15 = vld [vmem:[#allocation2_spill] sm:$0xff] }
 0x5cc   :  { %v6194_v33 = vsel %vm260_vm3, %v6192_v18, %v6179_v28  ;;  %v15201_v18 = vcombine.low %v14950_v55, %v15200_v15 }
 0x5cd   :  { %v11548_v62 = vcombine.low %v11523_v61, %v11531_v19  ;;  %v11549_v9 = vcombine.high %v11523_v61, %v11531_v19  ;;  %v6173_v12 = vpop.permute.xlu0 %6172  ;;  %v4842_v23 = vsel %vm2141_vm6, %v15187_v49, %v14967_v26  ;;  %v6196_v26 = vsel %vm47_vm0, %v6194_v33, %v6187_v47 }
 0x5ce   :  { %v15193_v47 = vcombine.low %v14702_v4, %v14705_v10 }
 0x5cf   :  { %v15007_v40 = vrot.slane %v11548_v62, %v14152_v0  ;;  %2119 = vrot.lane.b32.xlu1 %v15183_v54, %s13001_s8  ;;  %v11563_v45 = vrot.slane %v11549_v9, %v14152_v0  ;;  %v15186_v0 = vcombine.low %v14623_v56, %v14618_v32  ;;  %v4844_v32 = vsel %vm260_vm3, %v4842_v23, %v14977_v6 }
 0x5d1   :  { %v11565_v8 = vcombine.high %v15004_v3, %v15007_v40  ;;  %v11564_v34 = vcombine.low %v15004_v3, %v15007_v40  ;;  %v11566_v17 = vcombine.low %v11547_v2, %v11563_v45  ;;  %v3492_v61 = vsel %vm2141_vm6, %v15186_v0, %v14937_v27  ;;  %v6181_v56 = vpop.permute.xlu0 %6180 }
 0x5d2   :  { %v3494_v19 = vsel %vm260_vm3, %v3492_v61, %v14945_v21  ;;  %v11567_v62 = vcombine.high %v11547_v2, %v11563_v45  ;;  %v4846_v21 = vsel %vm47_vm0, %v4844_v32, %v4837_v29  ;;  %v15190_v29 = vcombine.low %v14509_v30, %v14519_v63 }
 0x5d3   :  { %2127 = vrot.lane.b32.xlu1 %v15184_v60, %s12989_s29  ;;  %11572 = vrot.lane.b32.xlu0 %v11565_v8, %s13001_s8  ;;  %v3496_v9 = vsel %vm47_vm0, %v3494_v19, %v14960_v37  ;;  %v15188_v37 = vcombine.high %v14499_v38, %v14516_v5  ;;  %v15191_v45 = vcombine.low %v14836_v51, %v14839_v1 }
 0x5d4   :  { %v15192_v8 = vcombine.high %v14509_v30, %v14519_v63  ;;  %v3493_v51 = vsel %vm2141_vm6, %v15193_v47, %v14965_v41  ;;  %v15194_v30 = vcombine.low %v14768_v53, %v14771_v31  ;;  %v15195_v41 = vcombine.low %v14814_v44, %v14817_v39 }
 0x5d5   :  { %v7521_v48 = vpop.permute.xlu1 %7520  ;;  %v6189_v6 = vpop.permute.xlu0 %6188  ;;  %v3495_v1 = vsel %vm260_vm3, %v3493_v51, %v14975_v13  ;;  %v15196_v53 = vcombine.low %v14858_v43, %v14861_v59  ;;  %v15197_v39 = vcombine.low %v14880_v35, %v14883_v42  ;;  %v15198_v19 = vcombine.low %v14902_v52, %v14905_v25 }
 0x5d6   :  { %v7542_v7 = vsel %vm2141_vm6, %v15191_v45, %v7521_v48  ;;  %v3497_v2 = vsel %vm47_vm0, %v3495_v1, %v14990_v36  ;;  %v4843_v63 = vsel %vm2141_vm6, %v15194_v30, %v14995_v16  ;;  %v6193_v10 = vsel %vm2141_vm6, %v15195_v41, %v6173_v12  ;;  %v15203_v45 = vld [vmem:[#allocation4_spill] sm:$0xff] }
 0x5d7   :  { %2135 = vrot.lane.b32.xlu1 %v15185_v14, %s13002_s15  ;;  %11580 = vrot.lane.b32.xlu0 %v11566_v17, %s12989_s29  ;;  %v4845_v60 = vsel %vm260_vm3, %v4843_v63, %v4831_v22  ;;  %v6195_v13 = vsel %vm260_vm3, %v6193_v10, %v6181_v56  ;;  %v15199_v32 = vcombine.low %v14924_v46, %v14927_v58 }
 0x5d8   :  { %v4847_v4 = vsel %vm47_vm0, %v4845_v60, %v4839_v50  ;;  %v6197_v36 = vsel %vm47_vm0, %v6195_v13, %v6189_v6  ;;  %v15205_v3 = vcombine.low %v14178_v11, %v14190_v20 }
 0x5d9   :  { %v7529_v27 = vpop.permute.xlu1 %7528 }
 0x5da   :  { %v7544_v24 = vsel %vm260_vm3, %v7542_v7, %v7529_v27 }
 0x5db   :  { %11588 = vrot.lane.b32.xlu0 %v11567_v62, %s13002_s15  ;;  %11600 = vrot.lane.b32.xlu1 %v3496_v9, %s13003_s16 }
 0x5dd   :  { %v7537_v54 = vpop.permute.xlu1 %7536 }
 0x5de   :  { %v7546_v57 = vsel %vm47_vm0, %v7544_v24, %v7537_v54 }
 0x5df   :  { %2121 = vrot.lane.b32.xlu0 %v15188_v37, %s13001_s8  ;;  %11608 = vrot.lane.b32.xlu1 %v4846_v21, %s13004_s23 }
 0x5e3   :  { %2129 = vrot.lane.b32.xlu0 %v15190_v29, %s12989_s29  ;;  %11616 = vrot.lane.b32.xlu1 %v6196_v26, %s13005_s24  ;;  %s13007_s29 = smov 80   ;;  %v15202_v29 = vld [vmem:[#allocation3_spill] sm:$0xff] }
 0x5e4   :  { %v15204_v7 = vcombine.low %v15202_v29, %v15203_v45 }
 0x5e5   :  { %v7523_v28 = vpop.permute.xlu0 %7522 }
 0x5e6   :  { %v7543_v31 = vsel %vm2141_vm6, %v15196_v53, %v7523_v28 }
 0x5e7   :  { %2137 = vrot.lane.b32.xlu0 %v15192_v8, %s13002_s15  ;;  %11624 = vrot.lane.b32.xlu1 %v7546_v57, %s13006_s25 }
 0x5e9   :  { %v7531_v17 = vpop.permute.xlu0 %7530 }
 0x5ea   :  { %v7545_v16 = vsel %vm260_vm3, %v7543_v31, %v7531_v17 }
 0x5eb   :  { %11602 = vrot.lane.b32.xlu0 %v3497_v2, %s13003_s16 }
 0x5ed   :  { %v7539_v48 = vpop.permute.xlu0 %7538 }
 0x5ee   :  { %v7547_v50 = vsel %vm47_vm0, %v7545_v16, %v7539_v48 }
 0x5ef   :  { %11610 = vrot.lane.b32.xlu0 %v4847_v4, %s13004_s23 }
 0x5f3   :  { %11618 = vrot.lane.b32.xlu0 %v6197_v36, %s13005_s24 }
 0x5f5   :  { %v8871_v22 = vpop.permute.xlu1 %8870 }
 0x5f6   :  { %v8892_v12 = vsel %vm2141_vm6, %v15197_v39, %v8871_v22 }
 0x5f7   :  { %11626 = vrot.lane.b32.xlu0 %v7547_v50, %s13006_s25 }
 0x5f9   :  { %v8879_v44 = vpop.permute.xlu1 %8878 }
 0x5fa   :  { %v8894_v14 = vsel %vm260_vm3, %v8892_v12, %v8879_v44 }
 0x5fd   :  { %v8887_v0 = vpop.permute.xlu1 %8886 }
 0x5fe   :  { %v8896_v61 = vsel %vm47_vm0, %v8894_v14, %v8887_v0 }
 0x5ff   :  { %11632 = vrot.lane.b32.xlu1 %v8896_v61, %s13007_s29 }
 0x605   :  { %v8873_v43 = vpop.permute.xlu0 %8872 }
 0x606   :  { %v8893_v62 = vsel %vm2141_vm6, %v15198_v19, %v8873_v43 }
 0x609   :  { %v8881_v59 = vpop.permute.xlu0 %8880 }
 0x60a   :  { %v8895_v9 = vsel %vm260_vm3, %v8893_v62, %v8881_v59  ;;  %v15206_v62 = vcombine.low %v14499_v38, %v14516_v5 }
 0x60d   :  { %v8889_v49 = vpop.permute.xlu0 %8888 }
 0x60e   :  { %v8897_v35 = vsel %vm47_vm0, %v8895_v9, %v8889_v49 }
 0x60f   :  { %11634 = vrot.lane.b32.xlu0 %v8897_v35, %s13007_s29 }
 0x615   :  { %v10221_v42 = vpop.permute.xlu1 %10220 }
 0x616   :  { %v10242_v56 = vsel %vm2141_vm6, %v15199_v32, %v10221_v42 }
 0x619   :  { %v10229_v23 = vpop.permute.xlu1 %10228 }
 0x61a   :  { %v10244_v27 = vsel %vm260_vm3, %v10242_v56, %v10229_v23 }
 0x61d   :  { %v10237_v21 = vpop.permute.xlu1 %10236 }
 0x61e   :  { %v10246_v52 = vsel %vm47_vm0, %v10244_v27, %v10237_v21 }
 0x61f   :  { %11640 = vrot.lane.b32.xlu1 %v10246_v52, %s13008_s1 }
 0x625   :  { %v10223_v25 = vpop.permute.xlu0 %10222 }
 0x626   :  { %v10243_v33 = vsel %vm2141_vm6, %v15201_v18, %v10223_v25 }
 0x629   :  { %v10231_v37 = vpop.permute.xlu0 %10230 }
 0x62a   :  { %v10245_v26 = vsel %vm260_vm3, %v10243_v33, %v10231_v37 }
 0x62d   :  { %v10239_v6 = vpop.permute.xlu0 %10238 }
 0x62e   :  { %v10247_v46 = vsel %vm47_vm0, %v10245_v26, %v10239_v6 }
 0x62f   :  { %11642 = vrot.lane.b32.xlu0 %v10247_v46, %s13008_s1 }
 0x635   :  { %v11571_v58 = vpop.permute.xlu1 %11570 }
 0x636   :  { %v11592_v24 = vsel %vm2141_vm6, %v15204_v7, %v11571_v58 }
 0x639   :  { %v11579_v54 = vpop.permute.xlu1 %11578 }
 0x63a   :  { %v11594_v57 = vsel %vm260_vm3, %v11592_v24, %v11579_v54 }
 0x63d   :  { %v11587_v28 = vpop.permute.xlu1 %11586 }
 0x63e   :  { %v11596_v55 = vsel %vm47_vm0, %v11594_v57, %v11587_v28 }
 0x63f   :  { %11648 = vrot.lane.b32.xlu1 %v11596_v55, %s13009_s3 }
 0x641   :  { %v2120_v63 = vpop.permute.xlu1 %2119 }
 0x642   :  { %v2142_v40 = vsel %vm2141_vm6, %v15205_v3, %v2120_v63 }
 0x645   :  { %v11573_v8 = vpop.permute.xlu0 %11572  ;;  %v2128_v60 = vpop.permute.xlu1 %2127 }
 0x646   :  { %v11593_v51 = vsel %vm2141_vm6, %v11564_v34, %v11573_v8  ;;  %v2144_v22 = vsel %vm260_vm3, %v2142_v40, %v2128_v60 }
 0x649   :  { %v11581_v47 = vpop.permute.xlu0 %11580  ;;  %v2136_v17 = vpop.permute.xlu1 %2135 }
 0x64a   :  { %v11595_v1 = vsel %vm260_vm3, %v11593_v51, %v11581_v47  ;;  %v2146_v50 = vsel %vm47_vm0, %v2144_v22, %v2136_v17 }
 0x64d   :  { %v11589_v2 = vpop.permute.xlu0 %11588  ;;  %v11601_v41 = vpop.permute.xlu1 %11600 }
 0x64e   :  { %v11597_v30 = vsel %vm47_vm0, %v11595_v1, %v11589_v2  ;;  %v11654_v44 = vsel %vm265_vm4, %v2146_v50, %v11601_v41 }
 0x64f   :  { %11650 = vrot.lane.b32.xlu0 %v11597_v30, %s13009_s3 }
 0x651   :  { %v2122_v4 = vpop.permute.xlu0 %2121  ;;  %v11609_v13 = vpop.permute.xlu1 %11608 }
 0x652   :  { %v11656_v39 = vsel %vm354_vm2, %v11654_v44, %v11609_v13  ;;  %v2143_v9 = vsel %vm2141_vm6, %v15206_v62, %v2122_v4 }
 0x655   :  { %v2130_v10 = vpop.permute.xlu0 %2129  ;;  %v11617_v48 = vpop.permute.xlu1 %11616 }
 0x656   :  { %v11659_v14 = vsel %vm11658_vm7, %v11656_v39, %v11617_v48  ;;  %v2145_v35 = vsel %vm260_vm3, %v2143_v9, %v2130_v10 }
 0x659   :  { %v2138_v36 = vpop.permute.xlu0 %2137  ;;  %v11625_v31 = vpop.permute.xlu1 %11624 }
 0x65a   :  { %v11662_v11 = vsel %vm11661_vm8, %v11659_v14, %v11625_v31  ;;  %v2147_v42 = vsel %vm47_vm0, %v2145_v35, %v2138_v36 }
 0x65d   :  { %v11603_v53 = vpop.permute.xlu0 %11602 }
 0x65e   :  { %v11655_v23 = vsel %vm265_vm4, %v2147_v42, %v11603_v53 }
 0x661   :  { %v11611_v34 = vpop.permute.xlu0 %11610 }
 0x662   :  { %v11657_v32 = vsel %vm354_vm2, %v11655_v23, %v11611_v34 }
 0x665   :  { %v11619_v20 = vpop.permute.xlu0 %11618 }
 0x666   :  { %v11660_v27 = vsel %vm11658_vm7, %v11657_v32, %v11619_v20 }
 0x669   :  { %v11627_v19 = vpop.permute.xlu0 %11626 }
 0x66a   :  { %v11663_v21 = vsel %vm11661_vm8, %v11660_v27, %v11627_v19 }
 0x671   :  { %v11633_v16 = vpop.permute.xlu1 %11632 }
 0x672   :  { %v11665_v0 = vsel %vm11664_vm9, %v11662_v11, %v11633_v16 }
 0x681   :  { %v11635_v49 = vpop.permute.xlu0 %11634 }
 0x682   :  { %v11666_v52 = vsel %vm11664_vm9, %v11663_v21, %v11635_v49 }
 0x691   :  { %v11641_v12 = vpop.permute.xlu1 %11640 }
 0x692   :  { %v11668_v61 = vsel %vm11667_vm10, %v11665_v0, %v11641_v12 }
 0x6a1   :  { %v11643_v56 = vpop.permute.xlu0 %11642 }
 0x6a2   :  { %v11669_v38 = vsel %vm11667_vm10, %v11666_v52, %v11643_v56 }
 0x6b1   :  { %v11649_v43 = vpop.permute.xlu1 %11648 }
 0x6b2   :  { %v11671_v59 = vsel %vm11670_vm11, %v11668_v61, %v11649_v43 }
 0x6b3   :  { %11673 = vst [vmem:[%s15176_s9] sm:$0xff] %v11671_v59 }
 0x6c1   :  { %v11651_v5 = vpop.permute.xlu0 %11650 }
 0x6c2   :  { %v11672_v25 = vsel %vm11670_vm11, %v11669_v38, %v11651_v5 }
 0x6c3   :  { %11674 = vst [vmem:[%s15176_s9 + $0x8] sm:$0xff] %v11672_v25 }

</bundles_post_ra>
